<compile_context>
chip_gen: v6e
topology: v6e:2x2x1
jax: 0.10.0
libtpu: 0.0.40
codegen_flags: <defaults>
</compile_context>

<pallas_src>
import functools
import math

import jax
import jax.numpy as jnp
from jax.experimental import pallas as pl
from jax.experimental.pallas import tpu as pltpu

D_MODEL = 32
NUM_HEADS = 4
D_FF = 64
NUM_LAYERS = 2
LN_EPS = 1e-5                # torch.nn.LayerNorm default eps
MXU_DTYPE = jnp.float32      # set to jnp.bfloat16 on v6e/v7x for MXU throughput (lossy vs f32 ref)
VEC_WIDTH = 128              # lane-aligned bias/LayerNorm slab width
VEC_ROWS = 16                # sublane-tile-friendly row count (13 used)


# ---------------------------------------------------------------------------
# Fused decoder-stack kernel: whole batch + whole layer stack, ONE program.
# ---------------------------------------------------------------------------
def _decoder_kernel(x_ref, mem_ref, keep_tgt_ref, keep_src_ref,
                    wqkv1_ref, wo1_ref, wq2_ref, wkv2_ref, wo2_ref,
                    wf1_ref, wf2_ref, vec_ref, out_ref,
                    *, d_model, num_heads, d_ff, num_layers):
    D, H, F = d_model, num_heads, d_ff
    dh = D // H
    # NOTE: reference ScaledDotProductAttention scales by sqrt(d_model), not
    # sqrt(d_head) -- reproduced exactly (folded into Q below).
    inv_factor = 1.0 / math.sqrt(D)
    neg_min = jnp.finfo(jnp.float32).min

    x = x_ref[...].astype(jnp.float32)          # (N, D), N = B*S_tgt (batch folded)
    mem = mem_ref[...].astype(jnp.float32)      # (M, D), M = B*S_src
    keep_tgt = keep_tgt_ref[...]                # (N, N) block-diag keep mask (host-built)
    keep_src = keep_src_ref[...]                # (N, M)

    def layernorm(v, g, b):
        mu = jnp.mean(v, axis=-1, keepdims=True)
        var = jnp.mean((v - mu) ** 2, axis=-1, keepdims=True)
        return (v - mu) * jax.lax.rsqrt(var + LN_EPS) * g + b

    def matmul(a, w):
        return jnp.dot(a.astype(MXU_DTYPE), w.astype(MXU_DTYPE),
                       preferred_element_type=jnp.float32)

    def linear(v, w, b):
        return matmul(v, w) + b

    def attention(q, k, v, keep):
        # q: (Nq, D), k/v: (Nk, D), keep: (Nq, Nk).  Heads batched in one
        # (leading-batch-dim) einsum; batch separation handled by `keep`.
        nq, nk = q.shape[0], k.shape[0]
        qh = jnp.swapaxes((q * inv_factor).reshape(nq, H, dh), 0, 1)  # (H,Nq,dh)
        kh = jnp.swapaxes(k.reshape(nk, H, dh), 0, 1)                 # (H,Nk,dh)
        vh = jnp.swapaxes(v.reshape(nk, H, dh), 0, 1)                 # (H,Nk,dh)
        s = jnp.einsum('hqd,hkd->hqk', qh.astype(MXU_DTYPE), kh.astype(MXU_DTYPE),
                       preferred_element_type=jnp.float32)            # (H,Nq,Nk)
        # torch masked_fill(mask == 0, finfo.min) -- exact replace, not a bias.
        s = jnp.where(keep[None, :, :] == 0.0, neg_min, s)
        s = s - jnp.max(s, axis=-1, keepdims=True)
        p = jnp.exp(s)
        w = p / jnp.sum(p, axis=-1, keepdims=True)                    # exact softmax
        ctx = jnp.einsum('hqk,hkd->hqd', w.astype(MXU_DTYPE), vh.astype(MXU_DTYPE),
                         preferred_element_type=jnp.float32)          # (H,Nq,dh)
        return jnp.swapaxes(ctx, 0, 1).reshape(nq, D)                 # (Nq, D)

    for l in range(num_layers):  # static unroll: all parameter indices static
        # ---- per-layer parameters: whole-slab, lane-0-aligned loads ----
        wqkv1 = wqkv1_ref[l]          # (D, 3D)  fused self-attn Q|K|V
        wo1   = wo1_ref[l]            # (D, D)
        wq2   = wq2_ref[l]            # (D, D)
        wkv2  = wkv2_ref[l]           # (D, 2D)  fused cross-attn K|V
        wo2   = wo2_ref[l]            # (D, D)
        wf1   = wf1_ref[l]            # (D, F)
        wf2   = wf2_ref[l]            # (F, D)

        b_qkv1 = vec_ref[l, 0:1, 0:3 * D]
        b_o1   = vec_ref[l, 1:2, 0:D]
        b_q2   = vec_ref[l, 2:3, 0:D]
        b_kv2  = vec_ref[l, 3:4, 0:2 * D]
        b_o2   = vec_ref[l, 4:5, 0:D]
        b_f1   = vec_ref[l, 5:6, 0:F]
        b_f2   = vec_ref[l, 6:7, 0:D]
        g1, bln1 = vec_ref[l, 7:8, 0:D],   vec_ref[l, 8:9, 0:D]
        g2, bln2 = vec_ref[l, 9:10, 0:D],  vec_ref[l, 10:11, 0:D]
        g3, bln3 = vec_ref[l, 11:12, 0:D], vec_ref[l, 12:13, 0:D]

        # ---- masked self-attention + residual ----
        xn = layernorm(x, g1, bln1)
        qkv = linear(xn, wqkv1, b_qkv1)                         # (N, 3D)
        ctx = attention(qkv[:, 0:D], qkv[:, D:2 * D], qkv[:, 2 * D:3 * D],
                        keep_tgt)
        x = x + linear(ctx, wo1, b_o1)

        # ---- encoder-decoder cross-attention + residual ----
        xn = layernorm(x, g2, bln2)
        q = linear(xn, wq2, b_q2)
        kv = linear(mem, wkv2, b_kv2)                           # (M, 2D)
        ctx = attention(q, kv[:, 0:D], kv[:, D:2 * D], keep_src)
        x = x + linear(ctx, wo2, b_o2)

        # ---- feed-forward + residual ----
        # TODO(synk): dropout layers are identity (inference); train-mode
        # stochastic dropout (pltpu PRNG) is not implemented.
        xn = layernorm(x, g3, bln3)
        h = jnp.maximum(linear(xn, wf1, b_f1), 0.0)             # ReLU
        x = x + linear(h, wf2, b_f2)

    out_ref[...] = x.astype(out_ref.dtype)


# ---------------------------------------------------------------------------
# Wrapper: host-side batch fold + mask construction, one pallas_call.
# ---------------------------------------------------------------------------
def decoder_forward(x, encoder_memory, src_mask, tgt_mask, packed_params):
    """Pallas equivalent of Decoder.forward (whole stack, whole batch, one kernel)."""
    (wqkv1, wo1, wq2, wkv2, wo2, wf1, wf2, vec) = packed_params
    B, St, D = x.shape
    Ss = encoder_memory.shape[1]
    L = wqkv1.shape[0]
    F = wf1.shape[2]

    if tgt_mask is None:
        tgt_mask = jnp.ones((B, St, St), jnp.float32)
    if src_mask is None:
        src_mask = jnp.ones((B, St, Ss), jnp.float32)
    tgt_mask = jnp.broadcast_to(tgt_mask, (B, St, St)).astype(jnp.float32)
    src_mask = jnp.broadcast_to(src_mask, (B, St, Ss)).astype(jnp.float32)

    # Host/XLA-side mask prep (review item): block-diagonal "keep" masks over
    # the folded rows so a single attention covers the whole batch without
    # attending across batch elements.
    same = jnp.eye(B, dtype=jnp.float32)                      # (B, B)
    keep_tgt = (same[:, None, :, None] * tgt_mask[:, :, None, :]
                ).reshape(B * St, B * St)
    keep_src = (same[:, None, :, None] * src_mask[:, :, None, :]
                ).reshape(B * St, B * Ss)

    x2 = x.reshape(B * St, D).astype(jnp.float32)
    mem2 = encoder_memory.reshape(B * Ss, D).astype(jnp.float32)

    kernel = functools.partial(_decoder_kernel, d_model=D, num_heads=NUM_HEADS,
                               d_ff=F, num_layers=L)
    args = (x2, mem2, keep_tgt, keep_src,
            wqkv1, wo1, wq2, wkv2, wo2, wf1, wf2, vec)
    vmem = pl.BlockSpec(memory_space=pltpu.MemorySpace.VMEM)  # whole operand in VMEM

    # TODO(synk): at production sizes add a layer-streaming grid axis
    # ("arbitrary", Buffered(2)) so weights are not whole-stack VMEM-resident
    # (v7x has 64 MiB physical VMEM), and split the folded rows across the two
    # v7x TensorCores; at these toy sizes a single program is fastest on all
    # generations.
    out = pl.pallas_call(
        kernel,
        out_shape=jax.ShapeDtypeStruct((B * St, D), jnp.float32),
        in_specs=[vmem] * len(args),
        out_specs=vmem,
    )(*args)
    return out.reshape(B, St, D)


# ---------------------------------------------------------------------------
# Deterministic parameter init (mirrors torch conventions) + packing
# ---------------------------------------------------------------------------
def _init_linear(key, din, dout):
    bound = 1.0 / math.sqrt(din)
    kw, kb = jax.random.split(key)
    w = jax.random.uniform(kw, (din, dout), jnp.float32, -bound, bound)
    b = jax.random.uniform(kb, (1, dout), jnp.float32, -bound, bound)
    return w, b


def init_layer_params(key, d_model, d_ff):
    ks = jax.random.split(key, 10)
    p = {}
    # self-attention projections
    p['wq1'], p['bq1'] = _init_linear(ks[0], d_model, d_model)
    p['wk1'], p['bk1'] = _init_linear(ks[1], d_model, d_model)
    p['wv1'], p['bv1'] = _init_linear(ks[2], d_model, d_model)
    p['wo1'], p['bo1'] = _init_linear(ks[3], d_model, d_model)
    # cross-attention projections
    p['wq2'], p['bq2'] = _init_linear(ks[4], d_model, d_model)
    p['wk2'], p['bk2'] = _init_linear(ks[5], d_model, d_model)
    p['wv2'], p['bv2'] = _init_linear(ks[6], d_model, d_model)
    p['wo2'], p['bo2'] = _init_linear(ks[7], d_model, d_model)
    # feed-forward
    p['w1'], p['b1'] = _init_linear(ks[8], d_model, d_ff)
    p['w2'], p['b2'] = _init_linear(ks[9], d_ff, d_model)
    # layernorms (torch default init: weight=1, bias=0)
    for name in ('1', '2', '3'):
        p['g' + name] = jnp.ones((1, d_model), jnp.float32)
        p['b_ln' + name] = jnp.zeros((1, d_model), jnp.float32)
    return p


def pack_params(layer_params, d_model, d_ff):
    """Pack per-layer params into per-role stacked weight arrays (lane-0-aligned
    whole-slab loads in the kernel) + one 128-lane-wide bias/LN slab."""
    D, F = d_model, d_ff
    wqkv1, wo1, wq2, wkv2, wo2, wf1, wf2, vec = ([] for _ in range(8))
    for p in layer_params:
        wqkv1.append(jnp.concatenate([p['wq1'], p['wk1'], p['wv1']], axis=1))  # (D,3D)
        wo1.append(p['wo1'])
        wq2.append(p['wq2'])
        wkv2.append(jnp.concatenate([p['wk2'], p['wv2']], axis=1))             # (D,2D)
        wo2.append(p['wo2'])
        wf1.append(p['w1'])
        wf2.append(p['w2'])
        rows = [
            jnp.concatenate([p['bq1'], p['bk1'], p['bv1']], axis=1),  # row 0
            p['bo1'], p['bq2'],                                       # rows 1,2
            jnp.concatenate([p['bk2'], p['bv2']], axis=1),            # row 3
            p['bo2'], p['b1'], p['b2'],                               # rows 4,5,6
            p['g1'], p['b_ln1'], p['g2'], p['b_ln2'],                 # rows 7-10
            p['g3'], p['b_ln3'],                                      # rows 11,12
        ]
        rows = [jnp.pad(r, ((0, 0), (0, VEC_WIDTH - r.shape[1]))) for r in rows]
        slab = jnp.concatenate(rows, axis=0)                          # (13, 128)
        slab = jnp.pad(slab, ((0, VEC_ROWS - slab.shape[0]), (0, 0)))  # (16, 128)
        vec.append(slab)
    st = jnp.stack
    return (st(wqkv1), st(wo1), st(wq2), st(wkv2), st(wo2), st(wf1), st(wf2), st(vec))


if __name__ == "__main__":
    key = jax.random.PRNGKey(0)
    B, S_TGT, S_SRC = 2, 8, 8
    kx, km, kp = jax.random.split(key, 3)

    x = jax.random.normal(kx, (B, S_TGT, D_MODEL), jnp.float32)
    encoder_memory = jax.random.normal(km, (B, S_SRC, D_MODEL), jnp.float32)
    # causal target mask (0 => masked), full source mask
    tgt_mask = jnp.broadcast_to(
        jnp.tril(jnp.ones((S_TGT, S_TGT), jnp.float32)), (B, S_TGT, S_TGT))
    src_mask = jnp.ones((B, S_TGT, S_SRC), jnp.float32)

    layer_keys = jax.random.split(kp, NUM_LAYERS)
    layer_params = [init_layer_params(k, D_MODEL, D_FF) for k in layer_keys]
    packed = pack_params(layer_params, D_MODEL, D_FF)

    out = decoder_forward(x, encoder_memory, src_mask, tgt_mask, packed)
    jax.block_until_ready(out)
    assert out.shape == (B, S_TGT, D_MODEL)
    assert bool(jnp.all(jnp.isfinite(out)))
    print("KERNEL_OK")
</pallas_src>

<mosaic_0001>
module attributes {stable_mosaic.version = 11 : i64} {
  func.func @_decoder_kernel(%arg0: memref<16x32xf32, #tpu.memory_space<vmem>>, %arg1: memref<16x32xf32, #tpu.memory_space<vmem>>, %arg2: memref<16x16xf32, #tpu.memory_space<vmem>>, %arg3: memref<16x16xf32, #tpu.memory_space<vmem>>, %arg4: memref<2x32x96xf32, #tpu.memory_space<vmem>>, %arg5: memref<2x32x32xf32, #tpu.memory_space<vmem>>, %arg6: memref<2x32x32xf32, #tpu.memory_space<vmem>>, %arg7: memref<2x32x64xf32, #tpu.memory_space<vmem>>, %arg8: memref<2x32x32xf32, #tpu.memory_space<vmem>>, %arg9: memref<2x32x64xf32, #tpu.memory_space<vmem>>, %arg10: memref<2x64x32xf32, #tpu.memory_space<vmem>>, %arg11: memref<2x16x128xf32, #tpu.memory_space<vmem>>, %arg12: memref<16x32xf32, #tpu.memory_space<vmem>>) attributes {dimension_semantics = [], scalar_prefetch = 0 : i64, scratch_operands = 0 : i64, tpu.core_type = #tpu.core_type<tc>} {
    %c0 = arith.constant 0 : index
    %c0_0 = arith.constant 0 : index
    %0 = vector.load %arg0[%c0, %c0_0] : memref<16x32xf32, #tpu.memory_space<vmem>>, vector<16x32xf32>
    %c0_1 = arith.constant 0 : index
    %c0_2 = arith.constant 0 : index
    %1 = vector.load %arg1[%c0_1, %c0_2] : memref<16x32xf32, #tpu.memory_space<vmem>>, vector<16x32xf32>
    %c0_3 = arith.constant 0 : index
    %c0_4 = arith.constant 0 : index
    %2 = vector.load %arg2[%c0_3, %c0_4] : memref<16x16xf32, #tpu.memory_space<vmem>>, vector<16x16xf32>
    %c0_5 = arith.constant 0 : index
    %c0_6 = arith.constant 0 : index
    %3 = vector.load %arg3[%c0_5, %c0_6] : memref<16x16xf32, #tpu.memory_space<vmem>>, vector<16x16xf32>
    %c0_7 = arith.constant 0 : index
    %c0_8 = arith.constant 0 : index
    %c0_9 = arith.constant 0 : index
    %4 = vector.load %arg4[%c0_7, %c0_8, %c0_9] : memref<2x32x96xf32, #tpu.memory_space<vmem>>, vector<1x32x96xf32>
    %5 = vector.shape_cast %4 : vector<1x32x96xf32> to vector<32x96xf32>
    %c0_10 = arith.constant 0 : index
    %c0_11 = arith.constant 0 : index
    %c0_12 = arith.constant 0 : index
    %6 = vector.load %arg5[%c0_10, %c0_11, %c0_12] : memref<2x32x32xf32, #tpu.memory_space<vmem>>, vector<1x32x32xf32>
    %7 = vector.shape_cast %6 : vector<1x32x32xf32> to vector<32x32xf32>
    %c0_13 = arith.constant 0 : index
    %c0_14 = arith.constant 0 : index
    %c0_15 = arith.constant 0 : index
    %8 = vector.load %arg6[%c0_13, %c0_14, %c0_15] : memref<2x32x32xf32, #tpu.memory_space<vmem>>, vector<1x32x32xf32>
    %9 = vector.shape_cast %8 : vector<1x32x32xf32> to vector<32x32xf32>
    %c0_16 = arith.constant 0 : index
    %c0_17 = arith.constant 0 : index
    %c0_18 = arith.constant 0 : index
    %10 = vector.load %arg7[%c0_16, %c0_17, %c0_18] : memref<2x32x64xf32, #tpu.memory_space<vmem>>, vector<1x32x64xf32>
    %11 = vector.shape_cast %10 : vector<1x32x64xf32> to vector<32x64xf32>
    %c0_19 = arith.constant 0 : index
    %c0_20 = arith.constant 0 : index
    %c0_21 = arith.constant 0 : index
    %12 = vector.load %arg8[%c0_19, %c0_20, %c0_21] : memref<2x32x32xf32, #tpu.memory_space<vmem>>, vector<1x32x32xf32>
    %13 = vector.shape_cast %12 : vector<1x32x32xf32> to vector<32x32xf32>
    %c0_22 = arith.constant 0 : index
    %c0_23 = arith.constant 0 : index
    %c0_24 = arith.constant 0 : index
    %14 = vector.load %arg9[%c0_22, %c0_23, %c0_24] : memref<2x32x64xf32, #tpu.memory_space<vmem>>, vector<1x32x64xf32>
    %15 = vector.shape_cast %14 : vector<1x32x64xf32> to vector<32x64xf32>
    %c0_25 = arith.constant 0 : index
    %c0_26 = arith.constant 0 : index
    %c0_27 = arith.constant 0 : index
    %16 = vector.load %arg10[%c0_25, %c0_26, %c0_27] : memref<2x64x32xf32, #tpu.memory_space<vmem>>, vector<1x64x32xf32>
    %17 = vector.shape_cast %16 : vector<1x64x32xf32> to vector<64x32xf32>
    %c0_28 = arith.constant 0 : index
    %c0_29 = arith.constant 0 : index
    %c0_30 = arith.constant 0 : index
    %18 = vector.load %arg11[%c0_28, %c0_29, %c0_30] : memref<2x16x128xf32, #tpu.memory_space<vmem>>, vector<1x1x96xf32>
    %19 = vector.shape_cast %18 : vector<1x1x96xf32> to vector<1x96xf32>
    %c0_31 = arith.constant 0 : index
    %c1 = arith.constant 1 : index
    %c0_32 = arith.constant 0 : index
    %20 = vector.load %arg11[%c0_31, %c1, %c0_32] : memref<2x16x128xf32, #tpu.memory_space<vmem>>, vector<1x1x32xf32>
    %21 = vector.shape_cast %20 : vector<1x1x32xf32> to vector<1x32xf32>
    %c0_33 = arith.constant 0 : index
    %c2 = arith.constant 2 : index
    %c0_34 = arith.constant 0 : index
    %22 = vector.load %arg11[%c0_33, %c2, %c0_34] : memref<2x16x128xf32, #tpu.memory_space<vmem>>, vector<1x1x32xf32>
    %23 = vector.shape_cast %22 : vector<1x1x32xf32> to vector<1x32xf32>
    %c0_35 = arith.constant 0 : index
    %c3 = arith.constant 3 : index
    %c0_36 = arith.constant 0 : index
    %24 = vector.load %arg11[%c0_35, %c3, %c0_36] : memref<2x16x128xf32, #tpu.memory_space<vmem>>, vector<1x1x64xf32>
    %25 = vector.shape_cast %24 : vector<1x1x64xf32> to vector<1x64xf32>
    %c0_37 = arith.constant 0 : index
    %c4 = arith.constant 4 : index
    %c0_38 = arith.constant 0 : index
    %26 = vector.load %arg11[%c0_37, %c4, %c0_38] : memref<2x16x128xf32, #tpu.memory_space<vmem>>, vector<1x1x32xf32>
    %27 = vector.shape_cast %26 : vector<1x1x32xf32> to vector<1x32xf32>
    %c0_39 = arith.constant 0 : index
    %c5 = arith.constant 5 : index
    %c0_40 = arith.constant 0 : index
    %28 = vector.load %arg11[%c0_39, %c5, %c0_40] : memref<2x16x128xf32, #tpu.memory_space<vmem>>, vector<1x1x64xf32>
    %29 = vector.shape_cast %28 : vector<1x1x64xf32> to vector<1x64xf32>
    %c0_41 = arith.constant 0 : index
    %c6 = arith.constant 6 : index
    %c0_42 = arith.constant 0 : index
    %30 = vector.load %arg11[%c0_41, %c6, %c0_42] : memref<2x16x128xf32, #tpu.memory_space<vmem>>, vector<1x1x32xf32>
    %31 = vector.shape_cast %30 : vector<1x1x32xf32> to vector<1x32xf32>
    %c0_43 = arith.constant 0 : index
    %c7 = arith.constant 7 : index
    %c0_44 = arith.constant 0 : index
    %32 = vector.load %arg11[%c0_43, %c7, %c0_44] : memref<2x16x128xf32, #tpu.memory_space<vmem>>, vector<1x1x32xf32>
    %33 = vector.shape_cast %32 : vector<1x1x32xf32> to vector<1x32xf32>
    %c0_45 = arith.constant 0 : index
    %c8 = arith.constant 8 : index
    %c0_46 = arith.constant 0 : index
    %34 = vector.load %arg11[%c0_45, %c8, %c0_46] : memref<2x16x128xf32, #tpu.memory_space<vmem>>, vector<1x1x32xf32>
    %35 = vector.shape_cast %34 : vector<1x1x32xf32> to vector<1x32xf32>
    %c0_47 = arith.constant 0 : index
    %c9 = arith.constant 9 : index
    %c0_48 = arith.constant 0 : index
    %36 = vector.load %arg11[%c0_47, %c9, %c0_48] : memref<2x16x128xf32, #tpu.memory_space<vmem>>, vector<1x1x32xf32>
    %37 = vector.shape_cast %36 : vector<1x1x32xf32> to vector<1x32xf32>
    %c0_49 = arith.constant 0 : index
    %c10 = arith.constant 10 : index
    %c0_50 = arith.constant 0 : index
    %38 = vector.load %arg11[%c0_49, %c10, %c0_50] : memref<2x16x128xf32, #tpu.memory_space<vmem>>, vector<1x1x32xf32>
    %39 = vector.shape_cast %38 : vector<1x1x32xf32> to vector<1x32xf32>
    %c0_51 = arith.constant 0 : index
    %c11 = arith.constant 11 : index
    %c0_52 = arith.constant 0 : index
    %40 = vector.load %arg11[%c0_51, %c11, %c0_52] : memref<2x16x128xf32, #tpu.memory_space<vmem>>, vector<1x1x32xf32>
    %41 = vector.shape_cast %40 : vector<1x1x32xf32> to vector<1x32xf32>
    %c0_53 = arith.constant 0 : index
    %c12 = arith.constant 12 : index
    %c0_54 = arith.constant 0 : index
    %42 = vector.load %arg11[%c0_53, %c12, %c0_54] : memref<2x16x128xf32, #tpu.memory_space<vmem>>, vector<1x1x32xf32>
    %43 = vector.shape_cast %42 : vector<1x1x32xf32> to vector<1x32xf32>
    %cst = arith.constant dense<0.000000e+00> : vector<16xf32>
    %44 = vector.multi_reduction <add>, %0, %cst [1] : vector<16x32xf32> to vector<16xf32>
    %45 = vector.shape_cast %44 : vector<16xf32> to vector<16x1xf32>
    %cst_55 = arith.constant 3.200000e+01 : f32
    %46 = vector.broadcast %cst_55 : f32 to vector<16x1xf32>
    %47 = arith.divf %45, %46 : vector<16x1xf32>
    %48 = vector.broadcast %47 : vector<16x1xf32> to vector<16x32xf32>
    %49 = arith.subf %0, %48 : vector<16x32xf32>
    %50 = arith.mulf %49, %49 : vector<16x32xf32>
    %cst_56 = arith.constant dense<0.000000e+00> : vector<16xf32>
    %51 = vector.multi_reduction <add>, %50, %cst_56 [1] : vector<16x32xf32> to vector<16xf32>
    %52 = vector.shape_cast %51 : vector<16xf32> to vector<16x1xf32>
    %cst_57 = arith.constant 3.200000e+01 : f32
    %53 = vector.broadcast %cst_57 : f32 to vector<16x1xf32>
    %54 = arith.divf %52, %53 : vector<16x1xf32>
    %55 = vector.broadcast %47 : vector<16x1xf32> to vector<16x32xf32>
    %56 = arith.subf %0, %55 : vector<16x32xf32>
    %cst_58 = arith.constant 9.99999974E-6 : f32
    %57 = vector.broadcast %cst_58 : f32 to vector<16x1xf32>
    %58 = arith.addf %54, %57 : vector<16x1xf32>
    %59 = math.rsqrt %58 : vector<16x1xf32>
    %60 = vector.broadcast %59 : vector<16x1xf32> to vector<16x32xf32>
    %61 = arith.mulf %56, %60 : vector<16x32xf32>
    %62 = vector.broadcast %33 : vector<1x32xf32> to vector<16x32xf32>
    %63 = arith.mulf %61, %62 : vector<16x32xf32>
    %64 = vector.broadcast %35 : vector<1x32xf32> to vector<16x32xf32>
    %65 = arith.addf %63, %64 : vector<16x32xf32>
    %cst_59 = arith.constant dense<0.000000e+00> : vector<16x96xf32>
    %66 = tpu.matmul %65, %5, %cst_59 {dimension_numbers = #tpu.dot_dimension_numbers<[1], [0], [0], [1], [0, 0, 1, 1], [], []>} : vector<16x32xf32>, vector<32x96xf32>, vector<16x96xf32> -> vector<16x96xf32>
    %67 = vector.broadcast %19 : vector<1x96xf32> to vector<16x96xf32>
    %68 = arith.addf %66, %67 : vector<16x96xf32>
    %69 = vector.extract_strided_slice %68 {offsets = [0, 0], sizes = [16, 32], strides = [1, 1]} : vector<16x96xf32> to vector<16x32xf32>
    %70 = vector.extract_strided_slice %68 {offsets = [0, 32], sizes = [16, 32], strides = [1, 1]} : vector<16x96xf32> to vector<16x32xf32>
    %71 = vector.extract_strided_slice %68 {offsets = [0, 64], sizes = [16, 32], strides = [1, 1]} : vector<16x96xf32> to vector<16x32xf32>
    %cst_60 = arith.constant 0.176776692 : f32
    %72 = vector.broadcast %cst_60 : f32 to vector<16x32xf32>
    %73 = arith.mulf %69, %72 : vector<16x32xf32>
    %74 = vector.shape_cast %73 : vector<16x32xf32> to vector<16x4x8xf32>
    %75 = tpu.transpose %74, [1, 0, 2] : vector<16x4x8xf32> -> vector<4x16x8xf32>
    %76 = vector.shape_cast %70 : vector<16x32xf32> to vector<16x4x8xf32>
    %77 = tpu.transpose %76, [1, 0, 2] : vector<16x4x8xf32> -> vector<4x16x8xf32>
    %78 = vector.shape_cast %71 : vector<16x32xf32> to vector<16x4x8xf32>
    %79 = tpu.transpose %78, [1, 0, 2] : vector<16x4x8xf32> -> vector<4x16x8xf32>
    "tpu.trace_start"() <{level = 10 : i32, message = "hqd,hkd->hqk"}> : () -> ()
    %cst_61 = arith.constant dense<0.000000e+00> : vector<4x16x16xf32>
    %80 = tpu.matmul %75, %77, %cst_61 {dimension_numbers = #tpu.dot_dimension_numbers<[2], [2], [1], [1], [0, 0, 0, 1, 1, 1], [0], [0]>} : vector<4x16x8xf32>, vector<4x16x8xf32>, vector<4x16x16xf32> -> vector<4x16x16xf32>
    "tpu.trace_stop"() : () -> ()
    %81 = vector.shape_cast %2 : vector<16x16xf32> to vector<1x16x16xf32>
    %cst_62 = arith.constant 0.000000e+00 : f32
    %82 = vector.broadcast %cst_62 : f32 to vector<1x16x16xf32>
    %83 = arith.cmpf oeq, %81, %82 : vector<1x16x16xf32>
    %cst_63 = arith.constant -3.40282347E+38 : f32
    %84 = vector.shape_cast %83 : vector<1x16x16xi1> to vector<1x16x16xi1>
    %85 = vector.broadcast %84 : vector<1x16x16xi1> to vector<4x16x16xi1>
    %86 = vector.broadcast %cst_63 : f32 to vector<4x16x16xf32>
    %87 = arith.select %85, %86, %80 : vector<4x16x16xi1>, vector<4x16x16xf32>
    %cst_64 = arith.constant dense<0xFF800000> : vector<4x16xf32>
    %88 = vector.multi_reduction <maximumf>, %87, %cst_64 [2] : vector<4x16x16xf32> to vector<4x16xf32>
    %89 = vector.shape_cast %88 : vector<4x16xf32> to vector<4x16x1xf32>
    %90 = vector.broadcast %89 : vector<4x16x1xf32> to vector<4x16x16xf32>
    %91 = arith.subf %87, %90 : vector<4x16x16xf32>
    %92 = math.exp %91 : vector<4x16x16xf32>
    %cst_65 = arith.constant dense<0.000000e+00> : vector<4x16xf32>
    %93 = vector.multi_reduction <add>, %92, %cst_65 [2] : vector<4x16x16xf32> to vector<4x16xf32>
    %94 = vector.shape_cast %93 : vector<4x16xf32> to vector<4x16x1xf32>
    %95 = vector.broadcast %94 : vector<4x16x1xf32> to vector<4x16x16xf32>
    %96 = arith.divf %92, %95 : vector<4x16x16xf32>
    "tpu.trace_start"() <{level = 10 : i32, message = "hqk,hkd->hqd"}> : () -> ()
    %cst_66 = arith.constant dense<0.000000e+00> : vector<4x16x8xf32>
    %97 = tpu.matmul %96, %79, %cst_66 {dimension_numbers = #tpu.dot_dimension_numbers<[2], [1], [1], [2], [0, 0, 0, 1, 1, 2], [0], [0]>} : vector<4x16x16xf32>, vector<4x16x8xf32>, vector<4x16x8xf32> -> vector<4x16x8xf32>
    "tpu.trace_stop"() : () -> ()
    %98 = tpu.transpose %97, [1, 0, 2] : vector<4x16x8xf32> -> vector<16x4x8xf32>
    %99 = vector.shape_cast %98 : vector<16x4x8xf32> to vector<16x32xf32>
    %cst_67 = arith.constant dense<0.000000e+00> : vector<16x32xf32>
    %100 = tpu.matmul %99, %7, %cst_67 {dimension_numbers = #tpu.dot_dimension_numbers<[1], [0], [0], [1], [0, 0, 1, 1], [], []>} : vector<16x32xf32>, vector<32x32xf32>, vector<16x32xf32> -> vector<16x32xf32>
    %101 = vector.broadcast %21 : vector<1x32xf32> to vector<16x32xf32>
    %102 = arith.addf %100, %101 : vector<16x32xf32>
    %103 = arith.addf %0, %102 : vector<16x32xf32>
    %cst_68 = arith.constant dense<0.000000e+00> : vector<16xf32>
    %104 = vector.multi_reduction <add>, %103, %cst_68 [1] : vector<16x32xf32> to vector<16xf32>
    %105 = vector.shape_cast %104 : vector<16xf32> to vector<16x1xf32>
    %cst_69 = arith.constant 3.200000e+01 : f32
    %106 = vector.broadcast %cst_69 : f32 to vector<16x1xf32>
    %107 = arith.divf %105, %106 : vector<16x1xf32>
    %108 = vector.broadcast %107 : vector<16x1xf32> to vector<16x32xf32>
    %109 = arith.subf %103, %108 : vector<16x32xf32>
    %110 = arith.mulf %109, %109 : vector<16x32xf32>
    %cst_70 = arith.constant dense<0.000000e+00> : vector<16xf32>
    %111 = vector.multi_reduction <add>, %110, %cst_70 [1] : vector<16x32xf32> to vector<16xf32>
    %112 = vector.shape_cast %111 : vector<16xf32> to vector<16x1xf32>
    %cst_71 = arith.constant 3.200000e+01 : f32
    %113 = vector.broadcast %cst_71 : f32 to vector<16x1xf32>
    %114 = arith.divf %112, %113 : vector<16x1xf32>
    %115 = vector.broadcast %107 : vector<16x1xf32> to vector<16x32xf32>
    %116 = arith.subf %103, %115 : vector<16x32xf32>
    %cst_72 = arith.constant 9.99999974E-6 : f32
    %117 = vector.broadcast %cst_72 : f32 to vector<16x1xf32>
    %118 = arith.addf %114, %117 : vector<16x1xf32>
    %119 = math.rsqrt %118 : vector<16x1xf32>
    %120 = vector.broadcast %119 : vector<16x1xf32> to vector<16x32xf32>
    %121 = arith.mulf %116, %120 : vector<16x32xf32>
    %122 = vector.broadcast %37 : vector<1x32xf32> to vector<16x32xf32>
    %123 = arith.mulf %121, %122 : vector<16x32xf32>
    %124 = vector.broadcast %39 : vector<1x32xf32> to vector<16x32xf32>
    %125 = arith.addf %123, %124 : vector<16x32xf32>
    %cst_73 = arith.constant dense<0.000000e+00> : vector<16x32xf32>
    %126 = tpu.matmul %125, %9, %cst_73 {dimension_numbers = #tpu.dot_dimension_numbers<[1], [0], [0], [1], [0, 0, 1, 1], [], []>} : vector<16x32xf32>, vector<32x32xf32>, vector<16x32xf32> -> vector<16x32xf32>
    %127 = vector.broadcast %23 : vector<1x32xf32> to vector<16x32xf32>
    %128 = arith.addf %126, %127 : vector<16x32xf32>
    %cst_74 = arith.constant dense<0.000000e+00> : vector<16x64xf32>
    %129 = tpu.matmul %1, %11, %cst_74 {dimension_numbers = #tpu.dot_dimension_numbers<[1], [0], [0], [1], [0, 0, 1, 1], [], []>} : vector<16x32xf32>, vector<32x64xf32>, vector<16x64xf32> -> vector<16x64xf32>
    %130 = vector.broadcast %25 : vector<1x64xf32> to vector<16x64xf32>
    %131 = arith.addf %129, %130 : vector<16x64xf32>
    %132 = vector.extract_strided_slice %131 {offsets = [0, 0], sizes = [16, 32], strides = [1, 1]} : vector<16x64xf32> to vector<16x32xf32>
    %133 = vector.extract_strided_slice %131 {offsets = [0, 32], sizes = [16, 32], strides = [1, 1]} : vector<16x64xf32> to vector<16x32xf32>
    %cst_75 = arith.constant 0.176776692 : f32
    %134 = vector.broadcast %cst_75 : f32 to vector<16x32xf32>
    %135 = arith.mulf %128, %134 : vector<16x32xf32>
    %136 = vector.shape_cast %135 : vector<16x32xf32> to vector<16x4x8xf32>
    %137 = tpu.transpose %136, [1, 0, 2] : vector<16x4x8xf32> -> vector<4x16x8xf32>
    %138 = vector.shape_cast %132 : vector<16x32xf32> to vector<16x4x8xf32>
    %139 = tpu.transpose %138, [1, 0, 2] : vector<16x4x8xf32> -> vector<4x16x8xf32>
    %140 = vector.shape_cast %133 : vector<16x32xf32> to vector<16x4x8xf32>
    %141 = tpu.transpose %140, [1, 0, 2] : vector<16x4x8xf32> -> vector<4x16x8xf32>
    "tpu.trace_start"() <{level = 10 : i32, message = "hqd,hkd->hqk"}> : () -> ()
    %cst_76 = arith.constant dense<0.000000e+00> : vector<4x16x16xf32>
    %142 = tpu.matmul %137, %139, %cst_76 {dimension_numbers = #tpu.dot_dimension_numbers<[2], [2], [1], [1], [0, 0, 0, 1, 1, 1], [0], [0]>} : vector<4x16x8xf32>, vector<4x16x8xf32>, vector<4x16x16xf32> -> vector<4x16x16xf32>
    "tpu.trace_stop"() : () -> ()
    %143 = vector.shape_cast %3 : vector<16x16xf32> to vector<1x16x16xf32>
    %cst_77 = arith.constant 0.000000e+00 : f32
    %144 = vector.broadcast %cst_77 : f32 to vector<1x16x16xf32>
    %145 = arith.cmpf oeq, %143, %144 : vector<1x16x16xf32>
    %cst_78 = arith.constant -3.40282347E+38 : f32
    %146 = vector.shape_cast %145 : vector<1x16x16xi1> to vector<1x16x16xi1>
    %147 = vector.broadcast %146 : vector<1x16x16xi1> to vector<4x16x16xi1>
    %148 = vector.broadcast %cst_78 : f32 to vector<4x16x16xf32>
    %149 = arith.select %147, %148, %142 : vector<4x16x16xi1>, vector<4x16x16xf32>
    %cst_79 = arith.constant dense<0xFF800000> : vector<4x16xf32>
    %150 = vector.multi_reduction <maximumf>, %149, %cst_79 [2] : vector<4x16x16xf32> to vector<4x16xf32>
    %151 = vector.shape_cast %150 : vector<4x16xf32> to vector<4x16x1xf32>
    %152 = vector.broadcast %151 : vector<4x16x1xf32> to vector<4x16x16xf32>
    %153 = arith.subf %149, %152 : vector<4x16x16xf32>
    %154 = math.exp %153 : vector<4x16x16xf32>
    %cst_80 = arith.constant dense<0.000000e+00> : vector<4x16xf32>
    %155 = vector.multi_reduction <add>, %154, %cst_80 [2] : vector<4x16x16xf32> to vector<4x16xf32>
    %156 = vector.shape_cast %155 : vector<4x16xf32> to vector<4x16x1xf32>
    %157 = vector.broadcast %156 : vector<4x16x1xf32> to vector<4x16x16xf32>
    %158 = arith.divf %154, %157 : vector<4x16x16xf32>
    "tpu.trace_start"() <{level = 10 : i32, message = "hqk,hkd->hqd"}> : () -> ()
    %cst_81 = arith.constant dense<0.000000e+00> : vector<4x16x8xf32>
    %159 = tpu.matmul %158, %141, %cst_81 {dimension_numbers = #tpu.dot_dimension_numbers<[2], [1], [1], [2], [0, 0, 0, 1, 1, 2], [0], [0]>} : vector<4x16x16xf32>, vector<4x16x8xf32>, vector<4x16x8xf32> -> vector<4x16x8xf32>
    "tpu.trace_stop"() : () -> ()
    %160 = tpu.transpose %159, [1, 0, 2] : vector<4x16x8xf32> -> vector<16x4x8xf32>
    %161 = vector.shape_cast %160 : vector<16x4x8xf32> to vector<16x32xf32>
    %cst_82 = arith.constant dense<0.000000e+00> : vector<16x32xf32>
    %162 = tpu.matmul %161, %13, %cst_82 {dimension_numbers = #tpu.dot_dimension_numbers<[1], [0], [0], [1], [0, 0, 1, 1], [], []>} : vector<16x32xf32>, vector<32x32xf32>, vector<16x32xf32> -> vector<16x32xf32>
    %163 = vector.broadcast %27 : vector<1x32xf32> to vector<16x32xf32>
    %164 = arith.addf %162, %163 : vector<16x32xf32>
    %165 = arith.addf %103, %164 : vector<16x32xf32>
    %cst_83 = arith.constant dense<0.000000e+00> : vector<16xf32>
    %166 = vector.multi_reduction <add>, %165, %cst_83 [1] : vector<16x32xf32> to vector<16xf32>
    %167 = vector.shape_cast %166 : vector<16xf32> to vector<16x1xf32>
    %cst_84 = arith.constant 3.200000e+01 : f32
    %168 = vector.broadcast %cst_84 : f32 to vector<16x1xf32>
    %169 = arith.divf %167, %168 : vector<16x1xf32>
    %170 = vector.broadcast %169 : vector<16x1xf32> to vector<16x32xf32>
    %171 = arith.subf %165, %170 : vector<16x32xf32>
    %172 = arith.mulf %171, %171 : vector<16x32xf32>
    %cst_85 = arith.constant dense<0.000000e+00> : vector<16xf32>
    %173 = vector.multi_reduction <add>, %172, %cst_85 [1] : vector<16x32xf32> to vector<16xf32>
    %174 = vector.shape_cast %173 : vector<16xf32> to vector<16x1xf32>
    %cst_86 = arith.constant 3.200000e+01 : f32
    %175 = vector.broadcast %cst_86 : f32 to vector<16x1xf32>
    %176 = arith.divf %174, %175 : vector<16x1xf32>
    %177 = vector.broadcast %169 : vector<16x1xf32> to vector<16x32xf32>
    %178 = arith.subf %165, %177 : vector<16x32xf32>
    %cst_87 = arith.constant 9.99999974E-6 : f32
    %179 = vector.broadcast %cst_87 : f32 to vector<16x1xf32>
    %180 = arith.addf %176, %179 : vector<16x1xf32>
    %181 = math.rsqrt %180 : vector<16x1xf32>
    %182 = vector.broadcast %181 : vector<16x1xf32> to vector<16x32xf32>
    %183 = arith.mulf %178, %182 : vector<16x32xf32>
    %184 = vector.broadcast %41 : vector<1x32xf32> to vector<16x32xf32>
    %185 = arith.mulf %183, %184 : vector<16x32xf32>
    %186 = vector.broadcast %43 : vector<1x32xf32> to vector<16x32xf32>
    %187 = arith.addf %185, %186 : vector<16x32xf32>
    %cst_88 = arith.constant dense<0.000000e+00> : vector<16x64xf32>
    %188 = tpu.matmul %187, %15, %cst_88 {dimension_numbers = #tpu.dot_dimension_numbers<[1], [0], [0], [1], [0, 0, 1, 1], [], []>} : vector<16x32xf32>, vector<32x64xf32>, vector<16x64xf32> -> vector<16x64xf32>
    %189 = vector.broadcast %29 : vector<1x64xf32> to vector<16x64xf32>
    %190 = arith.addf %188, %189 : vector<16x64xf32>
    %cst_89 = arith.constant 0.000000e+00 : f32
    %191 = vector.broadcast %cst_89 : f32 to vector<16x64xf32>
    %192 = arith.maximumf %190, %191 : vector<16x64xf32>
    %cst_90 = arith.constant dense<0.000000e+00> : vector<16x32xf32>
    %193 = tpu.matmul %192, %17, %cst_90 {dimension_numbers = #tpu.dot_dimension_numbers<[1], [0], [0], [1], [0, 0, 1, 1], [], []>} : vector<16x64xf32>, vector<64x32xf32>, vector<16x32xf32> -> vector<16x32xf32>
    %194 = vector.broadcast %31 : vector<1x32xf32> to vector<16x32xf32>
    %195 = arith.addf %193, %194 : vector<16x32xf32>
    %196 = arith.addf %165, %195 : vector<16x32xf32>
    %c1_91 = arith.constant 1 : index
    %c0_92 = arith.constant 0 : index
    %c0_93 = arith.constant 0 : index
    %197 = vector.load %arg4[%c1_91, %c0_92, %c0_93] : memref<2x32x96xf32, #tpu.memory_space<vmem>>, vector<1x32x96xf32>
    %198 = vector.shape_cast %197 : vector<1x32x96xf32> to vector<32x96xf32>
    %c1_94 = arith.constant 1 : index
    %c0_95 = arith.constant 0 : index
    %c0_96 = arith.constant 0 : index
    %199 = vector.load %arg5[%c1_94, %c0_95, %c0_96] : memref<2x32x32xf32, #tpu.memory_space<vmem>>, vector<1x32x32xf32>
    %200 = vector.shape_cast %199 : vector<1x32x32xf32> to vector<32x32xf32>
    %c1_97 = arith.constant 1 : index
    %c0_98 = arith.constant 0 : index
    %c0_99 = arith.constant 0 : index
    %201 = vector.load %arg6[%c1_97, %c0_98, %c0_99] : memref<2x32x32xf32, #tpu.memory_space<vmem>>, vector<1x32x32xf32>
    %202 = vector.shape_cast %201 : vector<1x32x32xf32> to vector<32x32xf32>
    %c1_100 = arith.constant 1 : index
    %c0_101 = arith.constant 0 : index
    %c0_102 = arith.constant 0 : index
    %203 = vector.load %arg7[%c1_100, %c0_101, %c0_102] : memref<2x32x64xf32, #tpu.memory_space<vmem>>, vector<1x32x64xf32>
    %204 = vector.shape_cast %203 : vector<1x32x64xf32> to vector<32x64xf32>
    %c1_103 = arith.constant 1 : index
    %c0_104 = arith.constant 0 : index
    %c0_105 = arith.constant 0 : index
    %205 = vector.load %arg8[%c1_103, %c0_104, %c0_105] : memref<2x32x32xf32, #tpu.memory_space<vmem>>, vector<1x32x32xf32>
    %206 = vector.shape_cast %205 : vector<1x32x32xf32> to vector<32x32xf32>
    %c1_106 = arith.constant 1 : index
    %c0_107 = arith.constant 0 : index
    %c0_108 = arith.constant 0 : index
    %207 = vector.load %arg9[%c1_106, %c0_107, %c0_108] : memref<2x32x64xf32, #tpu.memory_space<vmem>>, vector<1x32x64xf32>
    %208 = vector.shape_cast %207 : vector<1x32x64xf32> to vector<32x64xf32>
    %c1_109 = arith.constant 1 : index
    %c0_110 = arith.constant 0 : index
    %c0_111 = arith.constant 0 : index
    %209 = vector.load %arg10[%c1_109, %c0_110, %c0_111] : memref<2x64x32xf32, #tpu.memory_space<vmem>>, vector<1x64x32xf32>
    %210 = vector.shape_cast %209 : vector<1x64x32xf32> to vector<64x32xf32>
    %c1_112 = arith.constant 1 : index
    %c0_113 = arith.constant 0 : index
    %c0_114 = arith.constant 0 : index
    %211 = vector.load %arg11[%c1_112, %c0_113, %c0_114] : memref<2x16x128xf32, #tpu.memory_space<vmem>>, vector<1x1x96xf32>
    %212 = vector.shape_cast %211 : vector<1x1x96xf32> to vector<1x96xf32>
    %c1_115 = arith.constant 1 : index
    %c1_116 = arith.constant 1 : index
    %c0_117 = arith.constant 0 : index
    %213 = vector.load %arg11[%c1_115, %c1_116, %c0_117] : memref<2x16x128xf32, #tpu.memory_space<vmem>>, vector<1x1x32xf32>
    %214 = vector.shape_cast %213 : vector<1x1x32xf32> to vector<1x32xf32>
    %c1_118 = arith.constant 1 : index
    %c2_119 = arith.constant 2 : index
    %c0_120 = arith.constant 0 : index
    %215 = vector.load %arg11[%c1_118, %c2_119, %c0_120] : memref<2x16x128xf32, #tpu.memory_space<vmem>>, vector<1x1x32xf32>
    %216 = vector.shape_cast %215 : vector<1x1x32xf32> to vector<1x32xf32>
    %c1_121 = arith.constant 1 : index
    %c3_122 = arith.constant 3 : index
    %c0_123 = arith.constant 0 : index
    %217 = vector.load %arg11[%c1_121, %c3_122, %c0_123] : memref<2x16x128xf32, #tpu.memory_space<vmem>>, vector<1x1x64xf32>
    %218 = vector.shape_cast %217 : vector<1x1x64xf32> to vector<1x64xf32>
    %c1_124 = arith.constant 1 : index
    %c4_125 = arith.constant 4 : index
    %c0_126 = arith.constant 0 : index
    %219 = vector.load %arg11[%c1_124, %c4_125, %c0_126] : memref<2x16x128xf32, #tpu.memory_space<vmem>>, vector<1x1x32xf32>
    %220 = vector.shape_cast %219 : vector<1x1x32xf32> to vector<1x32xf32>
    %c1_127 = arith.constant 1 : index
    %c5_128 = arith.constant 5 : index
    %c0_129 = arith.constant 0 : index
    %221 = vector.load %arg11[%c1_127, %c5_128, %c0_129] : memref<2x16x128xf32, #tpu.memory_space<vmem>>, vector<1x1x64xf32>
    %222 = vector.shape_cast %221 : vector<1x1x64xf32> to vector<1x64xf32>
    %c1_130 = arith.constant 1 : index
    %c6_131 = arith.constant 6 : index
    %c0_132 = arith.constant 0 : index
    %223 = vector.load %arg11[%c1_130, %c6_131, %c0_132] : memref<2x16x128xf32, #tpu.memory_space<vmem>>, vector<1x1x32xf32>
    %224 = vector.shape_cast %223 : vector<1x1x32xf32> to vector<1x32xf32>
    %c1_133 = arith.constant 1 : index
    %c7_134 = arith.constant 7 : index
    %c0_135 = arith.constant 0 : index
    %225 = vector.load %arg11[%c1_133, %c7_134, %c0_135] : memref<2x16x128xf32, #tpu.memory_space<vmem>>, vector<1x1x32xf32>
    %226 = vector.shape_cast %225 : vector<1x1x32xf32> to vector<1x32xf32>
    %c1_136 = arith.constant 1 : index
    %c8_137 = arith.constant 8 : index
    %c0_138 = arith.constant 0 : index
    %227 = vector.load %arg11[%c1_136, %c8_137, %c0_138] : memref<2x16x128xf32, #tpu.memory_space<vmem>>, vector<1x1x32xf32>
    %228 = vector.shape_cast %227 : vector<1x1x32xf32> to vector<1x32xf32>
    %c1_139 = arith.constant 1 : index
    %c9_140 = arith.constant 9 : index
    %c0_141 = arith.constant 0 : index
    %229 = vector.load %arg11[%c1_139, %c9_140, %c0_141] : memref<2x16x128xf32, #tpu.memory_space<vmem>>, vector<1x1x32xf32>
    %230 = vector.shape_cast %229 : vector<1x1x32xf32> to vector<1x32xf32>
    %c1_142 = arith.constant 1 : index
    %c10_143 = arith.constant 10 : index
    %c0_144 = arith.constant 0 : index
    %231 = vector.load %arg11[%c1_142, %c10_143, %c0_144] : memref<2x16x128xf32, #tpu.memory_space<vmem>>, vector<1x1x32xf32>
    %232 = vector.shape_cast %231 : vector<1x1x32xf32> to vector<1x32xf32>
    %c1_145 = arith.constant 1 : index
    %c11_146 = arith.constant 11 : index
    %c0_147 = arith.constant 0 : index
    %233 = vector.load %arg11[%c1_145, %c11_146, %c0_147] : memref<2x16x128xf32, #tpu.memory_space<vmem>>, vector<1x1x32xf32>
    %234 = vector.shape_cast %233 : vector<1x1x32xf32> to vector<1x32xf32>
    %c1_148 = arith.constant 1 : index
    %c12_149 = arith.constant 12 : index
    %c0_150 = arith.constant 0 : index
    %235 = vector.load %arg11[%c1_148, %c12_149, %c0_150] : memref<2x16x128xf32, #tpu.memory_space<vmem>>, vector<1x1x32xf32>
    %236 = vector.shape_cast %235 : vector<1x1x32xf32> to vector<1x32xf32>
    %cst_151 = arith.constant dense<0.000000e+00> : vector<16xf32>
    %237 = vector.multi_reduction <add>, %196, %cst_151 [1] : vector<16x32xf32> to vector<16xf32>
    %238 = vector.shape_cast %237 : vector<16xf32> to vector<16x1xf32>
    %cst_152 = arith.constant 3.200000e+01 : f32
    %239 = vector.broadcast %cst_152 : f32 to vector<16x1xf32>
    %240 = arith.divf %238, %239 : vector<16x1xf32>
    %241 = vector.broadcast %240 : vector<16x1xf32> to vector<16x32xf32>
    %242 = arith.subf %196, %241 : vector<16x32xf32>
    %243 = arith.mulf %242, %242 : vector<16x32xf32>
    %cst_153 = arith.constant dense<0.000000e+00> : vector<16xf32>
    %244 = vector.multi_reduction <add>, %243, %cst_153 [1] : vector<16x32xf32> to vector<16xf32>
    %245 = vector.shape_cast %244 : vector<16xf32> to vector<16x1xf32>
    %cst_154 = arith.constant 3.200000e+01 : f32
    %246 = vector.broadcast %cst_154 : f32 to vector<16x1xf32>
    %247 = arith.divf %245, %246 : vector<16x1xf32>
    %248 = vector.broadcast %240 : vector<16x1xf32> to vector<16x32xf32>
    %249 = arith.subf %196, %248 : vector<16x32xf32>
    %cst_155 = arith.constant 9.99999974E-6 : f32
    %250 = vector.broadcast %cst_155 : f32 to vector<16x1xf32>
    %251 = arith.addf %247, %250 : vector<16x1xf32>
    %252 = math.rsqrt %251 : vector<16x1xf32>
    %253 = vector.broadcast %252 : vector<16x1xf32> to vector<16x32xf32>
    %254 = arith.mulf %249, %253 : vector<16x32xf32>
    %255 = vector.broadcast %226 : vector<1x32xf32> to vector<16x32xf32>
    %256 = arith.mulf %254, %255 : vector<16x32xf32>
    %257 = vector.broadcast %228 : vector<1x32xf32> to vector<16x32xf32>
    %258 = arith.addf %256, %257 : vector<16x32xf32>
    %cst_156 = arith.constant dense<0.000000e+00> : vector<16x96xf32>
    %259 = tpu.matmul %258, %198, %cst_156 {dimension_numbers = #tpu.dot_dimension_numbers<[1], [0], [0], [1], [0, 0, 1, 1], [], []>} : vector<16x32xf32>, vector<32x96xf32>, vector<16x96xf32> -> vector<16x96xf32>
    %260 = vector.broadcast %212 : vector<1x96xf32> to vector<16x96xf32>
    %261 = arith.addf %259, %260 : vector<16x96xf32>
    %262 = vector.extract_strided_slice %261 {offsets = [0, 0], sizes = [16, 32], strides = [1, 1]} : vector<16x96xf32> to vector<16x32xf32>
    %263 = vector.extract_strided_slice %261 {offsets = [0, 32], sizes = [16, 32], strides = [1, 1]} : vector<16x96xf32> to vector<16x32xf32>
    %264 = vector.extract_strided_slice %261 {offsets = [0, 64], sizes = [16, 32], strides = [1, 1]} : vector<16x96xf32> to vector<16x32xf32>
    %cst_157 = arith.constant 0.176776692 : f32
    %265 = vector.broadcast %cst_157 : f32 to vector<16x32xf32>
    %266 = arith.mulf %262, %265 : vector<16x32xf32>
    %267 = vector.shape_cast %266 : vector<16x32xf32> to vector<16x4x8xf32>
    %268 = tpu.transpose %267, [1, 0, 2] : vector<16x4x8xf32> -> vector<4x16x8xf32>
    %269 = vector.shape_cast %263 : vector<16x32xf32> to vector<16x4x8xf32>
    %270 = tpu.transpose %269, [1, 0, 2] : vector<16x4x8xf32> -> vector<4x16x8xf32>
    %271 = vector.shape_cast %264 : vector<16x32xf32> to vector<16x4x8xf32>
    %272 = tpu.transpose %271, [1, 0, 2] : vector<16x4x8xf32> -> vector<4x16x8xf32>
    "tpu.trace_start"() <{level = 10 : i32, message = "hqd,hkd->hqk"}> : () -> ()
    %cst_158 = arith.constant dense<0.000000e+00> : vector<4x16x16xf32>
    %273 = tpu.matmul %268, %270, %cst_158 {dimension_numbers = #tpu.dot_dimension_numbers<[2], [2], [1], [1], [0, 0, 0, 1, 1, 1], [0], [0]>} : vector<4x16x8xf32>, vector<4x16x8xf32>, vector<4x16x16xf32> -> vector<4x16x16xf32>
    "tpu.trace_stop"() : () -> ()
    %274 = vector.shape_cast %2 : vector<16x16xf32> to vector<1x16x16xf32>
    %cst_159 = arith.constant 0.000000e+00 : f32
    %275 = vector.broadcast %cst_159 : f32 to vector<1x16x16xf32>
    %276 = arith.cmpf oeq, %274, %275 : vector<1x16x16xf32>
    %cst_160 = arith.constant -3.40282347E+38 : f32
    %277 = vector.shape_cast %276 : vector<1x16x16xi1> to vector<1x16x16xi1>
    %278 = vector.broadcast %277 : vector<1x16x16xi1> to vector<4x16x16xi1>
    %279 = vector.broadcast %cst_160 : f32 to vector<4x16x16xf32>
    %280 = arith.select %278, %279, %273 : vector<4x16x16xi1>, vector<4x16x16xf32>
    %cst_161 = arith.constant dense<0xFF800000> : vector<4x16xf32>
    %281 = vector.multi_reduction <maximumf>, %280, %cst_161 [2] : vector<4x16x16xf32> to vector<4x16xf32>
    %282 = vector.shape_cast %281 : vector<4x16xf32> to vector<4x16x1xf32>
    %283 = vector.broadcast %282 : vector<4x16x1xf32> to vector<4x16x16xf32>
    %284 = arith.subf %280, %283 : vector<4x16x16xf32>
    %285 = math.exp %284 : vector<4x16x16xf32>
    %cst_162 = arith.constant dense<0.000000e+00> : vector<4x16xf32>
    %286 = vector.multi_reduction <add>, %285, %cst_162 [2] : vector<4x16x16xf32> to vector<4x16xf32>
    %287 = vector.shape_cast %286 : vector<4x16xf32> to vector<4x16x1xf32>
    %288 = vector.broadcast %287 : vector<4x16x1xf32> to vector<4x16x16xf32>
    %289 = arith.divf %285, %288 : vector<4x16x16xf32>
    "tpu.trace_start"() <{level = 10 : i32, message = "hqk,hkd->hqd"}> : () -> ()
    %cst_163 = arith.constant dense<0.000000e+00> : vector<4x16x8xf32>
    %290 = tpu.matmul %289, %272, %cst_163 {dimension_numbers = #tpu.dot_dimension_numbers<[2], [1], [1], [2], [0, 0, 0, 1, 1, 2], [0], [0]>} : vector<4x16x16xf32>, vector<4x16x8xf32>, vector<4x16x8xf32> -> vector<4x16x8xf32>
    "tpu.trace_stop"() : () -> ()
    %291 = tpu.transpose %290, [1, 0, 2] : vector<4x16x8xf32> -> vector<16x4x8xf32>
    %292 = vector.shape_cast %291 : vector<16x4x8xf32> to vector<16x32xf32>
    %cst_164 = arith.constant dense<0.000000e+00> : vector<16x32xf32>
    %293 = tpu.matmul %292, %200, %cst_164 {dimension_numbers = #tpu.dot_dimension_numbers<[1], [0], [0], [1], [0, 0, 1, 1], [], []>} : vector<16x32xf32>, vector<32x32xf32>, vector<16x32xf32> -> vector<16x32xf32>
    %294 = vector.broadcast %214 : vector<1x32xf32> to vector<16x32xf32>
    %295 = arith.addf %293, %294 : vector<16x32xf32>
    %296 = arith.addf %196, %295 : vector<16x32xf32>
    %cst_165 = arith.constant dense<0.000000e+00> : vector<16xf32>
    %297 = vector.multi_reduction <add>, %296, %cst_165 [1] : vector<16x32xf32> to vector<16xf32>
    %298 = vector.shape_cast %297 : vector<16xf32> to vector<16x1xf32>
    %cst_166 = arith.constant 3.200000e+01 : f32
    %299 = vector.broadcast %cst_166 : f32 to vector<16x1xf32>
    %300 = arith.divf %298, %299 : vector<16x1xf32>
    %301 = vector.broadcast %300 : vector<16x1xf32> to vector<16x32xf32>
    %302 = arith.subf %296, %301 : vector<16x32xf32>
    %303 = arith.mulf %302, %302 : vector<16x32xf32>
    %cst_167 = arith.constant dense<0.000000e+00> : vector<16xf32>
    %304 = vector.multi_reduction <add>, %303, %cst_167 [1] : vector<16x32xf32> to vector<16xf32>
    %305 = vector.shape_cast %304 : vector<16xf32> to vector<16x1xf32>
    %cst_168 = arith.constant 3.200000e+01 : f32
    %306 = vector.broadcast %cst_168 : f32 to vector<16x1xf32>
    %307 = arith.divf %305, %306 : vector<16x1xf32>
    %308 = vector.broadcast %300 : vector<16x1xf32> to vector<16x32xf32>
    %309 = arith.subf %296, %308 : vector<16x32xf32>
    %cst_169 = arith.constant 9.99999974E-6 : f32
    %310 = vector.broadcast %cst_169 : f32 to vector<16x1xf32>
    %311 = arith.addf %307, %310 : vector<16x1xf32>
    %312 = math.rsqrt %311 : vector<16x1xf32>
    %313 = vector.broadcast %312 : vector<16x1xf32> to vector<16x32xf32>
    %314 = arith.mulf %309, %313 : vector<16x32xf32>
    %315 = vector.broadcast %230 : vector<1x32xf32> to vector<16x32xf32>
    %316 = arith.mulf %314, %315 : vector<16x32xf32>
    %317 = vector.broadcast %232 : vector<1x32xf32> to vector<16x32xf32>
    %318 = arith.addf %316, %317 : vector<16x32xf32>
    %cst_170 = arith.constant dense<0.000000e+00> : vector<16x32xf32>
    %319 = tpu.matmul %318, %202, %cst_170 {dimension_numbers = #tpu.dot_dimension_numbers<[1], [0], [0], [1], [0, 0, 1, 1], [], []>} : vector<16x32xf32>, vector<32x32xf32>, vector<16x32xf32> -> vector<16x32xf32>
    %320 = vector.broadcast %216 : vector<1x32xf32> to vector<16x32xf32>
    %321 = arith.addf %319, %320 : vector<16x32xf32>
    %cst_171 = arith.constant dense<0.000000e+00> : vector<16x64xf32>
    %322 = tpu.matmul %1, %204, %cst_171 {dimension_numbers = #tpu.dot_dimension_numbers<[1], [0], [0], [1], [0, 0, 1, 1], [], []>} : vector<16x32xf32>, vector<32x64xf32>, vector<16x64xf32> -> vector<16x64xf32>
    %323 = vector.broadcast %218 : vector<1x64xf32> to vector<16x64xf32>
    %324 = arith.addf %322, %323 : vector<16x64xf32>
    %325 = vector.extract_strided_slice %324 {offsets = [0, 0], sizes = [16, 32], strides = [1, 1]} : vector<16x64xf32> to vector<16x32xf32>
    %326 = vector.extract_strided_slice %324 {offsets = [0, 32], sizes = [16, 32], strides = [1, 1]} : vector<16x64xf32> to vector<16x32xf32>
    %cst_172 = arith.constant 0.176776692 : f32
    %327 = vector.broadcast %cst_172 : f32 to vector<16x32xf32>
    %328 = arith.mulf %321, %327 : vector<16x32xf32>
    %329 = vector.shape_cast %328 : vector<16x32xf32> to vector<16x4x8xf32>
    %330 = tpu.transpose %329, [1, 0, 2] : vector<16x4x8xf32> -> vector<4x16x8xf32>
    %331 = vector.shape_cast %325 : vector<16x32xf32> to vector<16x4x8xf32>
    %332 = tpu.transpose %331, [1, 0, 2] : vector<16x4x8xf32> -> vector<4x16x8xf32>
    %333 = vector.shape_cast %326 : vector<16x32xf32> to vector<16x4x8xf32>
    %334 = tpu.transpose %333, [1, 0, 2] : vector<16x4x8xf32> -> vector<4x16x8xf32>
    "tpu.trace_start"() <{level = 10 : i32, message = "hqd,hkd->hqk"}> : () -> ()
    %cst_173 = arith.constant dense<0.000000e+00> : vector<4x16x16xf32>
    %335 = tpu.matmul %330, %332, %cst_173 {dimension_numbers = #tpu.dot_dimension_numbers<[2], [2], [1], [1], [0, 0, 0, 1, 1, 1], [0], [0]>} : vector<4x16x8xf32>, vector<4x16x8xf32>, vector<4x16x16xf32> -> vector<4x16x16xf32>
    "tpu.trace_stop"() : () -> ()
    %336 = vector.shape_cast %3 : vector<16x16xf32> to vector<1x16x16xf32>
    %cst_174 = arith.constant 0.000000e+00 : f32
    %337 = vector.broadcast %cst_174 : f32 to vector<1x16x16xf32>
    %338 = arith.cmpf oeq, %336, %337 : vector<1x16x16xf32>
    %cst_175 = arith.constant -3.40282347E+38 : f32
    %339 = vector.shape_cast %338 : vector<1x16x16xi1> to vector<1x16x16xi1>
    %340 = vector.broadcast %339 : vector<1x16x16xi1> to vector<4x16x16xi1>
    %341 = vector.broadcast %cst_175 : f32 to vector<4x16x16xf32>
    %342 = arith.select %340, %341, %335 : vector<4x16x16xi1>, vector<4x16x16xf32>
    %cst_176 = arith.constant dense<0xFF800000> : vector<4x16xf32>
    %343 = vector.multi_reduction <maximumf>, %342, %cst_176 [2] : vector<4x16x16xf32> to vector<4x16xf32>
    %344 = vector.shape_cast %343 : vector<4x16xf32> to vector<4x16x1xf32>
    %345 = vector.broadcast %344 : vector<4x16x1xf32> to vector<4x16x16xf32>
    %346 = arith.subf %342, %345 : vector<4x16x16xf32>
    %347 = math.exp %346 : vector<4x16x16xf32>
    %cst_177 = arith.constant dense<0.000000e+00> : vector<4x16xf32>
    %348 = vector.multi_reduction <add>, %347, %cst_177 [2] : vector<4x16x16xf32> to vector<4x16xf32>
    %349 = vector.shape_cast %348 : vector<4x16xf32> to vector<4x16x1xf32>
    %350 = vector.broadcast %349 : vector<4x16x1xf32> to vector<4x16x16xf32>
    %351 = arith.divf %347, %350 : vector<4x16x16xf32>
    "tpu.trace_start"() <{level = 10 : i32, message = "hqk,hkd->hqd"}> : () -> ()
    %cst_178 = arith.constant dense<0.000000e+00> : vector<4x16x8xf32>
    %352 = tpu.matmul %351, %334, %cst_178 {dimension_numbers = #tpu.dot_dimension_numbers<[2], [1], [1], [2], [0, 0, 0, 1, 1, 2], [0], [0]>} : vector<4x16x16xf32>, vector<4x16x8xf32>, vector<4x16x8xf32> -> vector<4x16x8xf32>
    "tpu.trace_stop"() : () -> ()
    %353 = tpu.transpose %352, [1, 0, 2] : vector<4x16x8xf32> -> vector<16x4x8xf32>
    %354 = vector.shape_cast %353 : vector<16x4x8xf32> to vector<16x32xf32>
    %cst_179 = arith.constant dense<0.000000e+00> : vector<16x32xf32>
    %355 = tpu.matmul %354, %206, %cst_179 {dimension_numbers = #tpu.dot_dimension_numbers<[1], [0], [0], [1], [0, 0, 1, 1], [], []>} : vector<16x32xf32>, vector<32x32xf32>, vector<16x32xf32> -> vector<16x32xf32>
    %356 = vector.broadcast %220 : vector<1x32xf32> to vector<16x32xf32>
    %357 = arith.addf %355, %356 : vector<16x32xf32>
    %358 = arith.addf %296, %357 : vector<16x32xf32>
    %cst_180 = arith.constant dense<0.000000e+00> : vector<16xf32>
    %359 = vector.multi_reduction <add>, %358, %cst_180 [1] : vector<16x32xf32> to vector<16xf32>
    %360 = vector.shape_cast %359 : vector<16xf32> to vector<16x1xf32>
    %cst_181 = arith.constant 3.200000e+01 : f32
    %361 = vector.broadcast %cst_181 : f32 to vector<16x1xf32>
    %362 = arith.divf %360, %361 : vector<16x1xf32>
    %363 = vector.broadcast %362 : vector<16x1xf32> to vector<16x32xf32>
    %364 = arith.subf %358, %363 : vector<16x32xf32>
    %365 = arith.mulf %364, %364 : vector<16x32xf32>
    %cst_182 = arith.constant dense<0.000000e+00> : vector<16xf32>
    %366 = vector.multi_reduction <add>, %365, %cst_182 [1] : vector<16x32xf32> to vector<16xf32>
    %367 = vector.shape_cast %366 : vector<16xf32> to vector<16x1xf32>
    %cst_183 = arith.constant 3.200000e+01 : f32
    %368 = vector.broadcast %cst_183 : f32 to vector<16x1xf32>
    %369 = arith.divf %367, %368 : vector<16x1xf32>
    %370 = vector.broadcast %362 : vector<16x1xf32> to vector<16x32xf32>
    %371 = arith.subf %358, %370 : vector<16x32xf32>
    %cst_184 = arith.constant 9.99999974E-6 : f32
    %372 = vector.broadcast %cst_184 : f32 to vector<16x1xf32>
    %373 = arith.addf %369, %372 : vector<16x1xf32>
    %374 = math.rsqrt %373 : vector<16x1xf32>
    %375 = vector.broadcast %374 : vector<16x1xf32> to vector<16x32xf32>
    %376 = arith.mulf %371, %375 : vector<16x32xf32>
    %377 = vector.broadcast %234 : vector<1x32xf32> to vector<16x32xf32>
    %378 = arith.mulf %376, %377 : vector<16x32xf32>
    %379 = vector.broadcast %236 : vector<1x32xf32> to vector<16x32xf32>
    %380 = arith.addf %378, %379 : vector<16x32xf32>
    %cst_185 = arith.constant dense<0.000000e+00> : vector<16x64xf32>
    %381 = tpu.matmul %380, %208, %cst_185 {dimension_numbers = #tpu.dot_dimension_numbers<[1], [0], [0], [1], [0, 0, 1, 1], [], []>} : vector<16x32xf32>, vector<32x64xf32>, vector<16x64xf32> -> vector<16x64xf32>
    %382 = vector.broadcast %222 : vector<1x64xf32> to vector<16x64xf32>
    %383 = arith.addf %381, %382 : vector<16x64xf32>
    %cst_186 = arith.constant 0.000000e+00 : f32
    %384 = vector.broadcast %cst_186 : f32 to vector<16x64xf32>
    %385 = arith.maximumf %383, %384 : vector<16x64xf32>
    %cst_187 = arith.constant dense<0.000000e+00> : vector<16x32xf32>
    %386 = tpu.matmul %385, %210, %cst_187 {dimension_numbers = #tpu.dot_dimension_numbers<[1], [0], [0], [1], [0, 0, 1, 1], [], []>} : vector<16x64xf32>, vector<64x32xf32>, vector<16x32xf32> -> vector<16x32xf32>
    %387 = vector.broadcast %224 : vector<1x32xf32> to vector<16x32xf32>
    %388 = arith.addf %386, %387 : vector<16x32xf32>
    %389 = arith.addf %358, %388 : vector<16x32xf32>
    %c0_188 = arith.constant 0 : index
    %c0_189 = arith.constant 0 : index
    %390 = vector.load %arg12[%c0_188, %c0_189] : memref<16x32xf32, #tpu.memory_space<vmem>>, vector<16x32xf32>
    tpu.vector_store %arg12[%c0_188, %c0_189], %389 {strides = array<i32>} : memref<16x32xf32, #tpu.memory_space<vmem>>, vector<16x32xf32>,
    return
  }
}

</mosaic_0001>

<bundles_post_ra>
// kernel: tpu_custom_call.1
= control target key start
LH: loop header
LB: loop body
LE: loop exit
PB: predicated region body
PF: predicated region fallthrough
CT: control target
= control target key end

     0   :  { %17 = vsyncpa [#allocation3], 0  ;;  %s12515_s0 = inlined_call_operand.hbm [shape: f32[16,32], index: 0, kind: input, shape index: {}]   ;;  %s12516_s1 = inlined_call_operand.hbm [shape: f32[16,32], index: 1, kind: input, shape index: {}]   ;;  %s12517_s2 = inlined_call_operand.hbm [shape: f32[16,16], index: 2, kind: input, shape index: {}]   ;;  %s12518_s3 = inlined_call_operand.hbm [shape: f32[16,16], index: 3, kind: input, shape index: {}]   ;;  %s12519_s4 = inlined_call_operand.vmem [shape: f32[2,32,96], index: 4, kind: input, shape index: {}]   ;;  %s12520_s5 = inlined_call_operand.vmem [shape: f32[2,32,32], index: 5, kind: input, shape index: {}]   ;;  %s12521_s6 = inlined_call_operand.vmem [shape: f32[2,32,32], index: 6, kind: input, shape index: {}]   ;;  %s12522_s7 = inlined_call_operand.hbm [shape: f32[2,32,64], index: 7, kind: input, shape index: {}]   ;;  %s12523_s8 = inlined_call_operand.hbm [shape: f32[2,32,32], index: 8, kind: input, shape index: {}]   ;;  %s12524_s9 = inlined_call_operand.hbm [shape: f32[2,32,64], index: 9, kind: input, shape index: {}]   ;;  %s12525_s10 = inlined_call_operand.vmem [shape: f32[2,64,32], index: 10, kind: input, shape index: {}]   ;;  %s12526_s11 = inlined_call_operand.hbm [shape: f32[2,16,128], index: 11, kind: input, shape index: {}]   ;;  %s12527_s12 = inlined_call_operand.hbm [shape: f32[16,32], index: 12, kind: output, shape index: {}]  }
   0x1   :  { %18 = vsyncpa [#allocation6], 0 }
   0x2   :  { %19 = vsyncpa [#allocation9], 0 }
   0x3   :  { %20 = vsyncpa [#allocation12], 0 }
   0x4   :  { %21 = vsyncpa [#allocation15], 0 }
   0x5   :  { %22 = vsyncpa [#allocation4], 0  ;;  %s10786_s21 = smov [#allocation5]   ;;  %s10787_s23 = smov [#allocation8]  }
   0x6   :  { %s40_s22 = sshll.u32 %s10786_s21, 4  ;;  %s64_s24 = sshll.u32 %s10787_s23, 4  ;;  %s41_s22 = int_to_ptr.vmem [resolvable:$true] %s40_s22  ;;  %s65_s24 = int_to_ptr.vmem [resolvable:$true] %s64_s24 }
   0x7   :  { %s10602_s25 = scalar_lea.vmem %s41_s22, 256  ;;  %p10607_p1 = scmp.lt.s32.totalorder %s41_s22, %s41_s22 }
   0x8   :  { %p10603_p0 = scmp.ne.s32.totalorder %s41_s22, %s10602_s25  ;;  %p10608_p2 = scmp.lt.s32.totalorder %s10602_s25, %s10602_s25 }
   0xa   :  { %p10609_p3 = por %p10608_p2, %p10607_p1 }
   0xc   :  { %p10610_p4 = pnand %p10609_p3, %p10603_p0 }
   0xe   :  { %10613 = shalt.err (!%p10610_p4)
}
   0xf   :  { %s10788_s26 = smov 128   ;;  %s10789_s27 = smov 8  }
  0x10   :  { %46 = dma.hbm_to_vmem [thread:$0]  %s12516_s1, 256, %s41_s22, [#allocation6], %s10788_s26, %s10788_s26, %s10789_s27  }
  0x11   :  { %s10622_s30 = scalar_lea.vmem %s65_s24, 256  ;;  %p10627_p6 = scmp.lt.s32.totalorder %s65_s24, %s65_s24 }
  0x12   :  { %p10623_p5 = scmp.ne.s32.totalorder %s65_s24, %s10622_s30  ;;  %p10628_p7 = scmp.lt.s32.totalorder %s10622_s30, %s10622_s30 }
  0x14   :  { %p10629_p8 = por %p10628_p7, %p10627_p6 }
  0x16   :  { %p10630_p9 = pnand %p10629_p8, %p10623_p5 }
  0x18   :  { %10633 = shalt.err (!%p10630_p9)
}
  0x19   :  { %70 = dma.hbm_to_vmem [thread:$0]  %s12518_s3, 256, %s65_s24, [#allocation9], %s10788_s26, %s10788_s26, %s10789_s27  }
  0x1a   :  { %s10790_s15 = smov [#allocation11]   ;;  %s10791_s17 = smov [#allocation2]  }
  0x1b   :  { %s94_s16 = sshll.u32 %s10790_s15, 4  ;;  %s28_s18 = sshll.u32 %s10791_s17, 4  ;;  %s95_s16 = int_to_ptr.vmem [resolvable:$true] %s94_s16  ;;  %s29_s18 = int_to_ptr.vmem [resolvable:$true] %s28_s18 }
  0x1c   :  { %s10642_s1 = scalar_lea.vmem %s95_s16, 1024  ;;  %p10647_p11 = scmp.lt.s32.totalorder %s95_s16, %s95_s16 }
  0x1d   :  { %p10643_p10 = scmp.ne.s32.totalorder %s95_s16, %s10642_s1  ;;  %p10648_p12 = scmp.lt.s32.totalorder %s10642_s1, %s10642_s1 }
  0x1f   :  { %p10649_p13 = por %p10648_p12, %p10647_p11 }
  0x21   :  { %p10650_p0 = pnand %p10649_p13, %p10643_p10 }
  0x23   :  { %10653 = shalt.err (!%p10650_p0)
}
  0x24   :  { %100 = dma.hbm_to_vmem [thread:$0]  %s12523_s8, 1024, %s95_s16, [#allocation12], %s10788_s26, %s10788_s26, %s10789_s27  }
  0x25   :  { %s10662_s3 = scalar_lea.vmem %s29_s18, 256  ;;  %p10667_p2 = scmp.lt.s32.totalorder %s29_s18, %s29_s18 }
  0x26   :  { %p10663_p1 = scmp.ne.s32.totalorder %s29_s18, %s10662_s3  ;;  %p10668_p3 = scmp.lt.s32.totalorder %s10662_s3, %s10662_s3 }
  0x28   :  { %p10669_p4 = por %p10668_p3, %p10667_p2 }
  0x2a   :  { %p10670_p5 = pnand %p10669_p4, %p10663_p1 }
  0x2c   :  { %10673 = shalt.err (!%p10670_p5)
}
  0x2d   :  { %34 = dma.hbm_to_vmem [thread:$0]  %s12515_s0, 256, %s29_s18, [#allocation3], %s10788_s26, %s10788_s26, %s10789_s27  }
  0x2e   :  { %s10792_s23 = smov [#allocation7]   ;;  %s10793_s25 = smov [#allocation10]  }
  0x2f   :  { %s52_s24 = sshll.u32 %s10792_s23, 4  ;;  %s82_s28 = sshll.u32 %s10793_s25, 4  ;;  %s53_s24 = int_to_ptr.vmem [resolvable:$true] %s52_s24  ;;  %s83_s28 = int_to_ptr.vmem [resolvable:$true] %s82_s28 }
  0x30   :  { %s10682_s8 = scalar_lea.vmem %s53_s24, 256  ;;  %p10687_p7 = scmp.lt.s32.totalorder %s53_s24, %s53_s24 }
  0x31   :  { %p10683_p6 = scmp.ne.s32.totalorder %s53_s24, %s10682_s8  ;;  %p10688_p8 = scmp.lt.s32.totalorder %s10682_s8, %s10682_s8 }
  0x33   :  { %p10689_p9 = por %p10688_p8, %p10687_p7 }
  0x35   :  { %p10690_p10 = pnand %p10689_p9, %p10683_p6 }
  0x37   :  { %10693 = shalt.err (!%p10690_p10)
}
  0x38   :  { %58 = dma.hbm_to_vmem [thread:$0]  %s12517_s2, 256, %s53_s24, [#allocation6], %s10788_s26, %s10788_s26, %s10789_s27  }
  0x39   :  { %s10702_s0 = scalar_lea.vmem %s83_s28, 1024  ;;  %p10707_p12 = scmp.lt.s32.totalorder %s83_s28, %s83_s28 }
  0x3a   :  { %p10703_p11 = scmp.ne.s32.totalorder %s83_s28, %s10702_s0  ;;  %p10708_p13 = scmp.lt.s32.totalorder %s10702_s0, %s10702_s0 }
  0x3c   :  { %p10709_p0 = por %p10708_p13, %p10707_p12 }
  0x3e   :  { %p10710_p1 = pnand %p10709_p0, %p10703_p11 }
  0x40   :  { %10713 = shalt.err (!%p10710_p1)
}
  0x41   :  { %88 = dma.hbm_to_vmem [thread:$0]  %s12522_s7, 1024, %s83_s28, [#allocation9], %s10788_s26, %s10788_s26, %s10789_s27  }
  0x42   :  { %s10794_s15 = smov [#allocation13]   ;;  %s10795_s17 = smov [#allocation14]  }
  0x43   :  { %s106_s16 = sshll.u32 %s10794_s15, 4  ;;  %s120_s18 = sshll.u32 %s10795_s17, 4  ;;  %s107_s16 = int_to_ptr.vmem [resolvable:$true] %s106_s16  ;;  %s121_s18 = int_to_ptr.vmem [resolvable:$true] %s120_s18 }
  0x44   :  { %s10722_s2 = scalar_lea.vmem %s107_s16, 1024  ;;  %p10727_p3 = scmp.lt.s32.totalorder %s107_s16, %s107_s16 }
  0x45   :  { %p10723_p2 = scmp.ne.s32.totalorder %s107_s16, %s10722_s2  ;;  %p10728_p4 = scmp.lt.s32.totalorder %s10722_s2, %s10722_s2 }
  0x47   :  { %p10729_p5 = por %p10728_p4, %p10727_p3 }
  0x49   :  { %p10730_p6 = pnand %p10729_p5, %p10723_p2 }
  0x4b   :  { %10733 = shalt.err (!%p10730_p6)
}
  0x4c   :  { %112 = dma.hbm_to_vmem [thread:$0]  %s12524_s9, 1024, %s107_s16, [#allocation12], %s10788_s26, %s10788_s26, %s10789_s27  }
  0x4d   :  { %s10742_s7 = scalar_lea.vmem %s121_s18, 512  ;;  %p10747_p8 = scmp.lt.s32.totalorder %s121_s18, %s121_s18 }
  0x4e   :  { %p10743_p7 = scmp.ne.s32.totalorder %s121_s18, %s10742_s7  ;;  %p10748_p9 = scmp.lt.s32.totalorder %s10742_s7, %s10742_s7 }
  0x50   :  { %p10749_p10 = por %p10748_p9, %p10747_p8 }
  0x52   :  { %p10750_p11 = pnand %p10749_p10, %p10743_p7 }
  0x54   :  { %10753 = shalt.err (!%p10750_p11)
}
  0x55   :  { %126 = dma.hbm_to_vmem [thread:$0]  %s12526_s11, 512, %s121_s18, [#allocation15], %s10788_s26, %s10788_s26, %s10789_s27  }
  0x56   :  { %10774 = dma.done.wait [#allocation3], 256  }
  0x57   :  { %10775 = vsyncadd [#allocation3], 4294967040 }
  0x58   :  { %10776 = dma.done.wait [#allocation6], 512  }
  0x59   :  { %10777 = vsyncadd [#allocation6], 4294966784 }
  0x5a   :  { %10778 = dma.done.wait [#allocation9], 1280  }
  0x5b   :  { %10779 = vsyncadd [#allocation9], 4294966016 }
  0x5c   :  { %10780 = dma.done.wait [#allocation12], 2048  }
  0x5d   :  { %10781 = vsyncadd [#allocation12], 4294965248 }
  0x5e   :  { %10782 = dma.done.wait [#allocation15], 512  }
  0x5f   :  { %10783 = vsyncadd [#allocation15], 4294966784  ;;  %vm204_vm0 = vcmask 261120   ;;  %v151_v0 = vld [vmem:[#allocation2] sm:$0xff]  ;;  %v152_v1 = vld [vmem:[#allocation2 + $0x8] sm:$0xff]  ;;  %s10796_s8 = smov 112   ;;  %v356_v49 = vlaneseq }
  0x60   :  { %v205_v2 = vsel %vm204_vm0, %v151_v0, 0.0  ;;  %v208_v3 = vsel %vm204_vm0, %v152_v1, 0.0  ;;  %v162_v14 = vld [vmem:[%s12519_s4 + $0x18] sm:$0xff]  ;;  %v161_v15 = vld [vmem:[%s12519_s4 + $0x10] sm:$0xff]  ;;  %v160_v16 = vld [vmem:[%s12519_s4 + $0x8] sm:$0xff]  ;;  %s10797_s29 = smov 120  }
  0x61   :  { %206 = vadd.xlane.f32.xlu0 %v205_v2  ;;  %10024 = vmatprep.subr.mxu1 %v162_v14  ;;  %v159_v17 = vld [vmem:[%s12519_s4] sm:$0xff]  ;;  %v9571_v27 = vld [vmem:[#allocation14 + $0x8] ss:$0 sm:$0xff]  ;;  %s10798_s30 = smov 104   ;;  %s10799_s0 = smov 96   ;;  %v357_v55 = vshrl.u32 %v356_v49, 7 }
  0x62   :  { %10025 = vmatpush3.msra.mxu1 %v162_v14  ;;  %v9570_v25 = vld [vmem:[#allocation14 + $0x7] ss:$0 sm:$0xff]  ;;  %v9572_v34 = vld [vmem:[#allocation14] ss:$0 sm:$0xff]  ;;  %v10800_v47 = vmov 1983009808  }
  0x63   :  { %10026 = vmatprep.subr.mxu1 %v161_v15  ;;  %v354_v48 = vunpack.c.l.s4 %v10800_v47  ;;  %v10801_v52 = vmov 1934713408   ;;  %vm1229_vm1 = vcmask 64512   ;;  %vm1592_vm3 = vcmask 130048   ;;  %s10802_s13 = smov 64   ;;  %s10803_s7 = smov 16  }
  0x64   :  { %10027 = vmatpush3.msra.mxu1 %v161_v15  ;;  %v386_v53 = vunpack.c.l.s4 %v10801_v52  ;;  %s10804_s20 = smov 24   ;;  %vm2305_vm5 = vcmask 195584   ;;  %vm4777_vm8 = vcmask 523264  }
  0x65   :  { %209 = vadd.xlane.f32.xlu0 %v208_v3  ;;  %10028 = vmatprep.subr.mxu1 %v160_v16  ;;  %v355_v54 = vunpack.c.0.s8 %v354_v48 }
  0x66   :  { %10029 = vmatpush3.msra.mxu1 %v160_v16  ;;  %v387_v58 = vunpack.c.0.s8 %v386_v53 }
  0x67   :  { %10030 = vmatprep.subr.mxu1 %v159_v17  ;;  %v11000_v59 = vsub.s32 %v355_v54, %v357_v55 }
  0x68   :  { %10031 = vmatpush3.msra.mxu1 %v159_v17  ;;  %v11002_v2 = vsub.s32 %v387_v58, %v357_v55 }
  0xea   :  { %v207_v4 = vpop.xlane.xlu0 %206 }
  0xeb   :  { %v212_v5 = vmul.f32 0.03125, %v207_v4 }
  0xed   :  { %v214_v6 = vsub.f32 %v151_v0, %v212_v5 }
  0xee   :  { %v210_v7 = vpop.xlane.xlu0 %209 }
  0xef   :  { %v213_v8 = vmul.f32 0.03125, %v210_v7  ;;  %v216_v9 = vmul.f32 %v214_v6, %v214_v6 }
  0xf1   :  { %v215_v10 = vsub.f32 %v152_v1, %v213_v8  ;;  %v218_v11 = vsel %vm204_vm0, %v216_v9, 0.0 }
  0xf2   :  { %219 = vadd.xlane.f32.xlu1 %v218_v11 }
  0xf3   :  { %v217_v12 = vmul.f32 %v215_v10, %v215_v10 }
  0xf5   :  { %v221_v13 = vsel %vm204_vm0, %v217_v12, 0.0 }
  0xf6   :  { %222 = vadd.xlane.f32.xlu1 %v221_v13 }
 0x17b   :  { %v220_v18 = vpop.xlane.xlu1 %219 }
 0x17c   :  { %v224_v19 = vmul.f32 0.03125, %v220_v18 }
 0x17e   :  { %v226_v20 = vadd.f32 1e-05, %v224_v19 }
 0x17f   :  { %v223_v21 = vpop.xlane.xlu1 %222 }
 0x180   :  { %10438 = vrsqrt.f32 %v226_v20  ;;  %v225_v22 = vmul.f32 0.03125, %v223_v21 }
 0x182   :  { %v227_v23 = vadd.f32 1e-05, %v225_v22 }
 0x184   :  { %10440 = vrsqrt.f32 %v227_v23 }
 0x18d   :  { %v10439_v24 = vpop.eup %10438 }
 0x18e   :  { %v230_v26 = vmul.f32 %v10439_v24, %v214_v6 }
 0x190   :  { %v236_v28 = vmul.f32 %v9570_v25, %v230_v26 }
 0x191   :  { %v10441_v29 = vpop.eup %10440 }
 0x192   :  { %v231_v30 = vmul.f32 %v10441_v29, %v215_v10  ;;  %v242_v31 = vadd.f32 %v9571_v27, %v236_v28 }
 0x194   :  { %v237_v32 = vmul.f32 %v9570_v25, %v231_v30  ;;  %10032 = vmatprep.mubr.msk.f32.mxu1 %vm204_vm0, %v242_v31 }
 0x196   :  { %v243_v33 = vadd.f32 %v9571_v27, %v237_v32 }
 0x198   :  { %10033 = vmatmul.mubr.msk.f32.vlgmr.msra.gmra.mxu1 %vm204_vm0, %v243_v33 }
 0x258   :  { %v10034_v35 = vpop.f32.mrf.mxu1 }
 0x259   :  { %v10937_v36 = vadd.f32 %v10034_v35, %v9572_v34 }
 0x25a   :  { %v320_v37 = vpop.f32.mrf.mxu1 }
 0x25b   :  { %631 = vrot.lane.b32.xlu1 %v10937_v36, %s10796_s8  ;;  %627 = vrot.lane.b32.xlu0 %v10937_v36, %s10797_s29  ;;  %v10943_v38 = vadd.f32 %v9572_v34, %v320_v37  ;;  %v10958_v39 = vmul.f32 0.17677669, %v10937_v36 }
 0x25d   :  { %v329_v40 = vmul.f32 0.17677669, %v10943_v38 }
 0x25f   :  { %635 = vrot.lane.b32.xlu1 %v10937_v36, %s10798_s30  ;;  %629 = vrot.lane.b32.xlu0 %v10943_v38, %s10796_s8 }
 0x263   :  { %639 = vrot.lane.b32.xlu0 %v10937_v36, %s10799_s0  ;;  %625 = vrot.lane.b32.xlu1 %v10943_v38, %s10797_s29 }
 0x267   :  { %637 = vrot.lane.b32.xlu0 %v10943_v38, %s10799_s0  ;;  %633 = vrot.lane.b32.xlu1 %v10943_v38, %s10798_s30 }
 0x26b   :  { %335 = vrot.lane.b32.xlu1 %v10958_v39, %s10797_s29  ;;  %333 = vrot.lane.b32.xlu0 %v329_v40, %s10797_s29 }
 0x26f   :  { %339 = vrot.lane.b32.xlu1 %v329_v40, %s10796_s8  ;;  %345 = vrot.lane.b32.xlu0 %v329_v40, %s10798_s30 }
 0x2cd   :  { %v10966_v41 = vpop.permute.xlu1 %631  ;;  %v10968_v42 = vpop.permute.xlu0 %627 }
 0x2ce   :  { %643 = vrot.lane.b32.xlu1 %v10968_v42, %s10799_s0  ;;  %647 = vrot.lane.b32.xlu0 %v10966_v41, %s10799_s0 }
 0x2d1   :  { %v10974_v43 = vpop.permute.xlu1 %635  ;;  %v10976_v44 = vpop.permute.xlu0 %629 }
 0x2d2   :  { %651 = vrot.lane.b32.xlu1 %v10974_v43, %s10799_s0  ;;  %645 = vrot.lane.b32.xlu0 %v10976_v44, %s10799_s0 }
 0x2d5   :  { %v10982_v45 = vpop.permute.xlu0 %639  ;;  %v10984_v46 = vpop.permute.xlu1 %625 }
 0x2d6   :  { %641 = vrot.lane.b32.xlu1 %v10984_v46, %s10799_s0  ;;  %341 = vrot.lane.b32.xlu0 %v10958_v39, %s10796_s8 }
 0x2d9   :  { %v10990_v50 = vpop.permute.xlu0 %637  ;;  %v10992_v51 = vpop.permute.xlu1 %633 }
 0x2da   :  { %649 = vrot.lane.b32.xlu1 %v10992_v51, %s10799_s0 }
 0x2dd   :  { %v10996_v56 = vpop.permute.xlu1 %335  ;;  %v334_v57 = vpop.permute.xlu0 %333 }
 0x2de   :  { %347 = vrot.lane.b32.xlu1 %v10958_v39, %s10798_s30 }
 0x2e1   :  { %v340_v60 = vpop.permute.xlu1 %339  ;;  %v346_v61 = vpop.permute.xlu0 %345 }
 0x2e2   :  { %v351_v62 = vcombine.low %v329_v40, %v340_v60  ;;  %v352_v63 = vcombine.high %v329_v40, %v340_v60  ;;  %v367_v0 = vcombine.low %v334_v57, %v346_v61  ;;  %v368_v1 = vcombine.high %v334_v57, %v346_v61 }
 0x2e4   :  { %v359_v3 = vrot.slane %v351_v62, %v11000_v59  ;;  %v366_v4 = vrot.slane %v352_v63, %v11000_v59  ;;  %v375_v5 = vrot.slane %v367_v0, %v11000_v59  ;;  %v382_v6 = vrot.slane %v368_v1, %v11000_v59 }
 0x2e6   :  { %v383_v7 = vcombine.low %v359_v3, %v375_v5  ;;  %v384_v8 = vcombine.high %v359_v3, %v375_v5  ;;  %v399_v9 = vcombine.low %v366_v4, %v382_v6  ;;  %v400_v10 = vcombine.high %v366_v4, %v382_v6 }
 0x2e8   :  { %v391_v11 = vrot.slane %v383_v7, %v11002_v2  ;;  %v398_v12 = vrot.slane %v384_v8, %v11002_v2  ;;  %v407_v13 = vrot.slane %v399_v9, %v11002_v2  ;;  %v414_v14 = vrot.slane %v400_v10, %v11002_v2 }
 0x2ea   :  { %v487_v15 = vcombine.low %v391_v11, %v398_v12  ;;  %v9575_v16 = vcombine.high %v391_v11, %v398_v12  ;;  %v503_v17 = vcombine.low %v407_v13, %v414_v14  ;;  %v9576_v18 = vcombine.high %v407_v13, %v414_v14 }
 0x2ec   :  { %v494_v19 = vrot.slane %v487_v15, %v11000_v59  ;;  %v502_v20 = vrot.slane %v9575_v16, %v11000_v59  ;;  %v510_v21 = vrot.slane %v503_v17, %v11000_v59  ;;  %v518_v22 = vrot.slane %v9576_v18, %v11000_v59 }
 0x2ee   :  { %v519_v23 = vcombine.low %v494_v19, %v502_v20  ;;  %v535_v24 = vcombine.low %v510_v21, %v518_v22  ;;  %v520_v25 = vcombine.high %v494_v19, %v502_v20  ;;  %v536_v26 = vcombine.high %v510_v21, %v518_v22 }
 0x2f0   :  { %v527_v27 = vrot.slane %v519_v23, %v11002_v2  ;;  %v543_v28 = vrot.slane %v535_v24, %v11002_v2  ;;  %v11019_v29 = vrot.slane %v520_v25, %v11002_v2  ;;  %v11022_v30 = vrot.slane %v536_v26, %v11002_v2 }
 0x2f2   :  { %v551_v31 = vcombine.low %v527_v27, %v543_v28  ;;  %v552_v32 = vcombine.high %v527_v27, %v543_v28  ;;  %v553_v33 = vcombine.low %v11019_v29, %v11022_v30  ;;  %v554_v34 = vcombine.high %v11019_v29, %v11022_v30  ;;  %v11126_v29 = vld [vmem:[#allocation7 + $0x8] sm:$0xff]  ;;  %v11128_v30 = vld [vmem:[#allocation7] sm:$0xff] }
 0x2f3   :  { %vm1579_vm2 = vcmp.eq.f32.partialorder %v11126_v29, 0.0  ;;  %vm1578_vm4 = vcmp.eq.f32.partialorder %v11128_v30, 0.0 }
 0x2f4   :  { %10039 = vmatprep.mubr.msk.f32.mxu1 %vm1229_vm1, %v551_v31  ;;  %10046 = vmatprep.mubr.msk.f32.mxu0 %vm1229_vm1, %v552_v32 }
 0x340   :  { %v644_v35 = vpop.permute.xlu1 %643  ;;  %v648_v37 = vpop.permute.xlu0 %647 }
 0x341   :  { %v729_v40 = vcombine.low %v10982_v45, %v648_v37  ;;  %v730_v47 = vcombine.high %v10982_v45, %v648_v37 }
 0x343   :  { %v737_v54 = vrot.slane %v729_v40, %v11000_v59  ;;  %v744_v55 = vrot.slane %v730_v47, %v11000_v59 }
 0x344   :  { %v652_v48 = vpop.permute.xlu1 %651  ;;  %v646_v49 = vpop.permute.xlu0 %645 }
 0x345   :  { %v745_v52 = vcombine.low %v644_v35, %v652_v48  ;;  %v746_v53 = vcombine.high %v644_v35, %v652_v48  ;;  %v661_v45 = vcombine.low %v10990_v50, %v646_v49  ;;  %v662_v3 = vcombine.high %v10990_v50, %v646_v49 }
 0x347   :  { %v753_v57 = vrot.slane %v745_v52, %v11000_v59  ;;  %v760_v58 = vrot.slane %v746_v53, %v11000_v59  ;;  %v669_v15 = vrot.slane %v661_v45, %v11000_v59  ;;  %v676_v50 = vrot.slane %v662_v3, %v11000_v59 }
 0x348   :  { %v642_v60 = vpop.permute.xlu1 %641  ;;  %v342_v1 = vpop.permute.xlu0 %341 }
 0x349   :  { %v761_v61 = vcombine.low %v737_v54, %v753_v57  ;;  %v762_v62 = vcombine.high %v737_v54, %v753_v57  ;;  %v777_v63 = vcombine.low %v744_v55, %v760_v58  ;;  %v778_v0 = vcombine.high %v744_v55, %v760_v58 }
 0x34a   :  { %v419_v8 = vcombine.low %v10958_v39, %v342_v1  ;;  %v420_v9 = vcombine.high %v10958_v39, %v342_v1 }
 0x34b   :  { %v769_v4 = vrot.slane %v761_v61, %v11002_v2  ;;  %v776_v5 = vrot.slane %v762_v62, %v11002_v2  ;;  %v785_v6 = vrot.slane %v777_v63, %v11002_v2  ;;  %v792_v7 = vrot.slane %v778_v0, %v11002_v2 }
 0x34c   :  { %v650_v10 = vpop.permute.xlu1 %649  ;;  %v427_v21 = vrot.slane %v419_v8, %v11000_v59  ;;  %v434_v22 = vrot.slane %v420_v9, %v11000_v59 }
 0x34d   :  { %v865_v11 = vcombine.low %v769_v4, %v776_v5  ;;  %v9581_v12 = vcombine.high %v769_v4, %v776_v5  ;;  %v881_v13 = vcombine.low %v785_v6, %v792_v7  ;;  %v9582_v14 = vcombine.high %v785_v6, %v792_v7 }
 0x34e   :  { %v677_v16 = vcombine.low %v642_v60, %v650_v10  ;;  %v678_v17 = vcombine.high %v642_v60, %v650_v10 }
 0x34f   :  { %v11047_v18 = vrot.slane %v865_v11, %v11000_v59  ;;  %v11050_v19 = vrot.slane %v9581_v12, %v11000_v59  ;;  %v11053_v20 = vrot.slane %v881_v13, %v11000_v59  ;;  %v896_v39 = vrot.slane %v9582_v14, %v11000_v59 }
 0x350   :  { %v685_v23 = vrot.slane %v677_v16, %v11000_v59  ;;  %v692_v24 = vrot.slane %v678_v17, %v11000_v59  ;;  %v348_v25 = vpop.permute.xlu1 %347 }
 0x351   :  { %v435_v26 = vcombine.low %v10996_v56, %v348_v25  ;;  %v436_v27 = vcombine.high %v10996_v56, %v348_v25  ;;  %v897_v28 = vcombine.low %v11047_v18, %v11050_v19  ;;  %v913_v31 = vcombine.low %v11053_v20, %v896_v39 }
 0x352   :  { %v693_v32 = vcombine.low %v669_v15, %v685_v23  ;;  %v694_v35 = vcombine.high %v669_v15, %v685_v23  ;;  %v709_v37 = vcombine.low %v676_v50, %v692_v24  ;;  %v710_v40 = vcombine.high %v676_v50, %v692_v24 }
 0x353   :  { %v443_v47 = vrot.slane %v435_v26, %v11000_v59  ;;  %v450_v48 = vrot.slane %v436_v27, %v11000_v59  ;;  %v905_v49 = vrot.slane %v897_v28, %v11002_v2  ;;  %v921_v52 = vrot.slane %v913_v31, %v11002_v2 }
 0x354   :  { %v701_v53 = vrot.slane %v693_v32, %v11002_v2  ;;  %v708_v56 = vrot.slane %v694_v35, %v11002_v2  ;;  %v717_v54 = vrot.slane %v709_v37, %v11002_v2  ;;  %v724_v55 = vrot.slane %v710_v40, %v11002_v2 }
 0x355   :  { %v451_v57 = vcombine.low %v427_v21, %v443_v47  ;;  %v452_v58 = vcombine.high %v427_v21, %v443_v47  ;;  %v467_v60 = vcombine.low %v434_v22, %v450_v48  ;;  %v468_v61 = vcombine.high %v434_v22, %v450_v48 }
 0x356   :  { %v797_v62 = vcombine.low %v701_v53, %v708_v56  ;;  %v9579_v63 = vcombine.high %v701_v53, %v708_v56  ;;  %v813_v0 = vcombine.low %v717_v54, %v724_v55  ;;  %v9580_v1 = vcombine.high %v717_v54, %v724_v55 }
 0x357   :  { %v459_v45 = vrot.slane %v451_v57, %v11002_v2  ;;  %v466_v3 = vrot.slane %v452_v58, %v11002_v2  ;;  %v475_v4 = vrot.slane %v467_v60, %v11002_v2  ;;  %v482_v5 = vrot.slane %v468_v61, %v11002_v2 }
 0x358   :  { %v929_v6 = vcombine.low %v905_v49, %v921_v52  ;;  %v930_v7 = vcombine.high %v905_v49, %v921_v52  ;;  %v804_v8 = vrot.slane %v797_v62, %v11000_v59  ;;  %v812_v9 = vrot.slane %v9579_v63, %v11000_v59 }
 0x359   :  { %v555_v10 = vcombine.low %v459_v45, %v466_v3  ;;  %v9577_v11 = vcombine.high %v459_v45, %v466_v3  ;;  %v571_v12 = vcombine.low %v475_v4, %v482_v5  ;;  %v9578_v13 = vcombine.high %v475_v4, %v482_v5 }
 0x35a   :  { %10035 = vmatprep.subr.msk.mxu1 %vm1229_vm1, %v929_v6  ;;  %10042 = vmatprep.subr.msk.mxu0 %vm1229_vm1, %v930_v7  ;;  %v820_v14 = vrot.slane %v813_v0, %v11000_v59  ;;  %v828_v15 = vrot.slane %v9580_v1, %v11000_v59  ;;  %v829_v50 = vcombine.low %v804_v8, %v812_v9 }
 0x35b   :  { %v562_v16 = vrot.slane %v555_v10, %v11000_v59  ;;  %v570_v17 = vrot.slane %v9577_v11, %v11000_v59  ;;  %v578_v21 = vrot.slane %v571_v12, %v11000_v59  ;;  %v586_v22 = vrot.slane %v9578_v13, %v11000_v59  ;;  %10036 = vmatpush3.xpose.msk.msra.mxu1 %vm1229_vm1, %v929_v6 }
 0x35c   :  { %10043 = vmatpush3.xpose.msk.msra.mxu0 %vm1229_vm1, %v930_v7  ;;  %v837_v23 = vrot.slane %v829_v50, %v11002_v2  ;;  %v845_v24 = vcombine.low %v820_v14, %v828_v15  ;;  %v898_v25 = vcombine.high %v11047_v18, %v11050_v19  ;;  %v914_v26 = vcombine.high %v11053_v20, %v896_v39 }
 0x35d   :  { %v587_v27 = vcombine.low %v562_v16, %v570_v17  ;;  %v603_v28 = vcombine.low %v578_v21, %v586_v22  ;;  %v830_v47 = vcombine.high %v804_v8, %v812_v9  ;;  %v846_v48 = vcombine.high %v820_v14, %v828_v15 }
 0x35e   :  { %v853_v31 = vrot.slane %v845_v24, %v11002_v2  ;;  %v912_v32 = vrot.slane %v898_v25, %v11002_v2  ;;  %v928_v35 = vrot.slane %v914_v26, %v11002_v2  ;;  %v588_v54 = vcombine.high %v562_v16, %v570_v17 }
 0x35f   :  { %v595_v37 = vrot.slane %v587_v27, %v11002_v2  ;;  %v611_v40 = vrot.slane %v603_v28, %v11002_v2  ;;  %v844_v39 = vrot.slane %v830_v47, %v11002_v2  ;;  %v860_v56 = vrot.slane %v846_v48, %v11002_v2 }
 0x360   :  { %v861_v49 = vcombine.low %v837_v23, %v853_v31  ;;  %v862_v52 = vcombine.high %v837_v23, %v853_v31  ;;  %v931_v53 = vcombine.low %v912_v32, %v928_v35  ;;  %v932_v18 = vcombine.high %v912_v32, %v928_v35 }
 0x361   :  { %v619_v19 = vcombine.low %v595_v37, %v611_v40  ;;  %v620_v20 = vcombine.high %v595_v37, %v611_v40  ;;  %v604_v55 = vcombine.high %v578_v21, %v586_v22  ;;  %v863_v57 = vcombine.low %v844_v39, %v860_v56 }
 0x362   :  { %10037 = vmatprep.subr.msk.mxu1 %vm1229_vm1, %v861_v49  ;;  %10044 = vmatprep.subr.msk.mxu0 %vm1229_vm1, %v862_v52  ;;  %v864_v58 = vcombine.high %v844_v39, %v860_v56  ;;  %v602_v60 = vrot.slane %v588_v54, %v11002_v2 }
 0x363   :  { %10038 = vmatpush3.xpose.msk.msra.mxu1 %vm1229_vm1, %v861_v49  ;;  %10045 = vmatpush3.xpose.msk.msra.mxu0 %vm1229_vm1, %v862_v52  ;;  %v618_v61 = vrot.slane %v604_v55, %v11002_v2 }
 0x364   :  { %10049 = vmatprep.subr.msk.mxu1 %vm1229_vm1, %v931_v53  ;;  %10056 = vmatprep.subr.msk.mxu0 %vm1229_vm1, %v932_v18 }
 0x365   :  { %v622_v62 = vcombine.high %v602_v60, %v618_v61 }
 0x366   :  { %10040 = vmatmul.mubr.msk.f32.vlgmr.msra.gmra.mxu1 %vm1229_vm1, %v619_v19  ;;  %10047 = vmatmul.mubr.msk.f32.vlgmr.msra.gmra.mxu0 %vm1229_vm1, %v620_v20 }
 0x367   :  { %10050 = vmatpush3.xpose.msk.msra.mxu1 %vm1229_vm1, %v931_v53  ;;  %10053 = vmatprep.mubr.msk.f32.mxu1 %vm1229_vm1, %v553_v33  ;;  %v621_v33 = vcombine.low %v602_v60, %v618_v61 }
 0x368   :  { %10057 = vmatpush3.xpose.msk.msra.mxu0 %vm1229_vm1, %v932_v18  ;;  %10060 = vmatprep.mubr.msk.f32.mxu0 %vm1229_vm1, %v554_v34 }
 0x369   :  { %10051 = vmatprep.subr.msk.mxu1 %vm1229_vm1, %v863_v57  ;;  %10058 = vmatprep.subr.msk.mxu0 %vm1229_vm1, %v864_v58 }
 0x36b   :  { %10052 = vmatpush3.xpose.msk.msra.mxu1 %vm1229_vm1, %v863_v57 }
 0x36c   :  { %10059 = vmatpush3.xpose.msk.msra.mxu0 %vm1229_vm1, %v864_v58 }
 0x36e   :  { %10054 = vmatmul.mubr.msk.f32.vlgmr.msra.gmra.mxu1 %vm1229_vm1, %v621_v33 }
 0x36f   :  { %10061 = vmatmul.mubr.msk.f32.vlgmr.msra.gmra.mxu0 %vm1229_vm1, %v622_v62 }
 0x426   :  { %v10041_v34 = vpop.f32.mrf.mxu1  ;;  %v10048_v63 = vpop.f32.mrf.mxu0 }
 0x427   :  { %v1585_v0 = vsel %vm1579_vm2, -3.4028235e+38, %v10041_v34  ;;  %v1587_v1 = vsel %vm1579_vm2, -3.4028235e+38, %v10048_v63 }
 0x428   :  { %v1308_v45 = vpop.f32.mrf.mxu1  ;;  %v1602_v3 = vsel %vm1592_vm3, %v1587_v1, -inf  ;;  %v1596_v4 = vsel %vm1592_vm3, %v1585_v0, -inf  ;;  %v1395_v6 = vpop.f32.mrf.mxu0 }
 0x429   :  { %v1584_v5 = vsel %vm1578_vm4, -3.4028235e+38, %v1308_v45  ;;  %1603 = vmax.xlane.f32.xlu0 %v1602_v3  ;;  %1597 = vmax.xlane.f32.xlu1 %v1596_v4  ;;  %v1586_v8 = vsel %vm1578_vm4, -3.4028235e+38, %v1395_v6 }
 0x42a   :  { %v1593_v7 = vsel %vm1592_vm3, %v1584_v5, -inf  ;;  %v1599_v12 = vsel %vm1592_vm3, %v1586_v8, -inf }
 0x42d   :  { %1594 = vmax.xlane.f32.xlu0 %v1593_v7 }
 0x42e   :  { %v10055_v9 = vpop.f32.mrf.mxu1 }
 0x42f   :  { %v10062_v10 = vpop.f32.mrf.mxu0  ;;  %v1589_v21 = vsel %vm1579_vm2, -3.4028235e+38, %v10055_v9 }
 0x430   :  { %v1482_v11 = vpop.f32.mrf.mxu1  ;;  %v1591_v16 = vsel %vm1579_vm2, -3.4028235e+38, %v10062_v10  ;;  %v1608_v23 = vsel %vm1592_vm3, %v1589_v21, -inf }
 0x431   :  { %v1588_v13 = vsel %vm1578_vm4, -3.4028235e+38, %v1482_v11  ;;  %v1569_v14 = vpop.f32.mrf.mxu0  ;;  %1600 = vmax.xlane.f32.xlu0 %v1599_v12  ;;  %v1614_v22 = vsel %vm1592_vm3, %v1591_v16, -inf }
 0x432   :  { %v1590_v15 = vsel %vm1578_vm4, -3.4028235e+38, %v1569_v14  ;;  %v1605_v17 = vsel %vm1592_vm3, %v1588_v13, -inf }
 0x433   :  { %v1611_v50 = vsel %vm1592_vm3, %v1590_v15, -inf }
 0x434   :  { %1612 = vmax.xlane.f32.xlu1 %v1611_v50 }
 0x435   :  { %1606 = vmax.xlane.f32.xlu0 %v1605_v17 }
 0x438   :  { %1615 = vmax.xlane.f32.xlu1 %v1614_v22 }
 0x439   :  { %1609 = vmax.xlane.f32.xlu0 %v1608_v23 }
 0x449   :  { %939 = vrot.lane.b32.xlu1 %v10968_v42, %s10802_s13 }
 0x44d   :  { %943 = vrot.lane.b32.xlu1 %v10966_v41, %s10802_s13 }
 0x44f   :  { %935 = vrot.lane.b32.xlu0 %v10937_v36, %s10802_s13 }
 0x451   :  { %947 = vrot.lane.b32.xlu1 %v10974_v43, %s10802_s13 }
 0x453   :  { %933 = vrot.lane.b32.xlu0 %v10943_v38, %s10802_s13 }
 0x455   :  { %937 = vrot.lane.b32.xlu1 %v10984_v46, %s10802_s13 }
 0x457   :  { %941 = vrot.lane.b32.xlu0 %v10976_v44, %s10802_s13 }
 0x459   :  { %945 = vrot.lane.b32.xlu1 %v10992_v51, %s10802_s13 }
 0x4b2   :  { %v1604_v42 = vpop.xlane.xlu0 %1603  ;;  %v1598_v41 = vpop.xlane.xlu1 %1597 }
 0x4b3   :  { %v1620_v24 = vsub.f32 %v1587_v1, %v1604_v42  ;;  %v1618_v25 = vsub.f32 %v1585_v0, %v1598_v41 }
 0x4b5   :  { %v1627_v36 = vmul.f32 1.442695, %v1618_v25  ;;  %v1631_v26 = vmul.f32 1.442695, %v1620_v24 }
 0x4b6   :  { %v1595_v27 = vpop.xlane.xlu0 %1594 }
 0x4b7   :  { %v1617_v43 = vsub.f32 %v1584_v5, %v1595_v27  ;;  %10442 = vpow2.f32 %v1627_v36 }
 0x4b8   :  { %10444 = vpow2.f32 %v1631_v26 }
 0x4b9   :  { %v1625_v28 = vmul.f32 1.442695, %v1617_v43 }
 0x4ba   :  { %v1601_v38 = vpop.xlane.xlu0 %1600 }
 0x4bb   :  { %10446 = vpow2.f32 %v1625_v28  ;;  %v1619_v46 = vsub.f32 %v1586_v8, %v1601_v38 }
 0x4bd   :  { %v1629_v31 = vmul.f32 1.442695, %v1619_v46  ;;  %v1613_v32 = vpop.xlane.xlu1 %1612 }
 0x4be   :  { %v1623_v44 = vsub.f32 %v1590_v15, %v1613_v32  ;;  %v1607_v35 = vpop.xlane.xlu0 %1606 }
 0x4bf   :  { %10448 = vpow2.f32 %v1629_v31  ;;  %v1621_v51 = vsub.f32 %v1588_v13, %v1607_v35 }
 0x4c0   :  { %v1637_v37 = vmul.f32 1.442695, %v1623_v44 }
 0x4c1   :  { %v1633_v40 = vmul.f32 1.442695, %v1621_v51  ;;  %v1616_v47 = vpop.xlane.xlu1 %1615 }
 0x4c2   :  { %10450 = vpow2.f32 %v1637_v37  ;;  %v1624_v48 = vsub.f32 %v1591_v16, %v1616_v47  ;;  %v1610_v49 = vpop.xlane.xlu0 %1609 }
 0x4c3   :  { %10452 = vpow2.f32 %v1633_v40  ;;  %v1622_v52 = vsub.f32 %v1589_v21, %v1610_v49 }
 0x4c4   :  { %v1639_v53 = vmul.f32 1.442695, %v1624_v48  ;;  %v11172_v18 = vpop.eup %10442 }
 0x4c5   :  { %v1635_v19 = vmul.f32 1.442695, %v1622_v52  ;;  %v940_v20 = vpop.permute.xlu1 %939  ;;  %v1644_v39 = vsel %vm1592_vm3, %v11172_v18, 0.0  ;;  %v11176_v54 = vpop.eup %10444 }
 0x4c6   :  { %10454 = vpow2.f32 %v1639_v53  ;;  %v936_v56 = vpop.permute.xlu0 %935  ;;  %1645 = vadd.xlane.f32.xlu1 %v1644_v39  ;;  %v1650_v60 = vsel %vm1592_vm3, %v11176_v54, 0.0 }
 0x4c7   :  { %10456 = vpow2.f32 %v1635_v19 }
 0x4c8   :  { %v11178_v55 = vpop.eup %10446 }
 0x4c9   :  { %v944_v57 = vpop.permute.xlu1 %943  ;;  %v1641_v58 = vsel %vm1592_vm3, %v11178_v55, 0.0 }
 0x4ca   :  { %1642 = vadd.xlane.f32.xlu0 %v1641_v58  ;;  %v1025_v61 = vcombine.low %v936_v56, %v944_v57  ;;  %1651 = vadd.xlane.f32.xlu1 %v1650_v60  ;;  %v1026_v62 = vcombine.high %v936_v56, %v944_v57  ;;  %v934_v34 = vpop.permute.xlu0 %933 }
 0x4cc   :  { %v11184_v33 = vpop.eup %10448  ;;  %v1033_v4 = vrot.slane %v1025_v61, %v11000_v59  ;;  %v1040_v6 = vrot.slane %v1026_v62, %v11000_v59 }
 0x4cd   :  { %v948_v63 = vpop.permute.xlu1 %947  ;;  %v1647_v0 = vsel %vm1592_vm3, %v11184_v33, 0.0 }
 0x4ce   :  { %v1041_v1 = vcombine.low %v940_v20, %v948_v63  ;;  %v1042_v45 = vcombine.high %v940_v20, %v948_v63  ;;  %1648 = vadd.xlane.f32.xlu0 %v1647_v0  ;;  %v942_v50 = vpop.permute.xlu0 %941 }
 0x4cf   :  { %v11188_v3 = vpop.eup %10450  ;;  %v957_v41 = vcombine.low %v934_v34, %v942_v50  ;;  %v958_v24 = vcombine.high %v934_v34, %v942_v50 }
 0x4d0   :  { %v11191_v5 = vpop.eup %10452  ;;  %v1049_v7 = vrot.slane %v1041_v1, %v11000_v59  ;;  %v1056_v8 = vrot.slane %v1042_v45, %v11000_v59  ;;  %v1659_v9 = vsel %vm1592_vm3, %v11188_v3, 0.0 }
 0x4d1   :  { %1660 = vadd.xlane.f32.xlu1 %v1659_v9  ;;  %v938_v10 = vpop.permute.xlu1 %937  ;;  %v1653_v11 = vsel %vm1592_vm3, %v11191_v5, 0.0  ;;  %v965_v37 = vrot.slane %v957_v41, %v11000_v59  ;;  %v972_v40 = vrot.slane %v958_v24, %v11000_v59 }
 0x4d2   :  { %v1057_v12 = vcombine.low %v1033_v4, %v1049_v7  ;;  %v1058_v13 = vcombine.high %v1033_v4, %v1049_v7  ;;  %v1073_v14 = vcombine.low %v1040_v6, %v1056_v8  ;;  %v1074_v15 = vcombine.high %v1040_v6, %v1056_v8  ;;  %1654 = vadd.xlane.f32.xlu0 %v1653_v11 }
 0x4d3   :  { %v11200_v16 = vpop.eup %10454 }
 0x4d4   :  { %v11202_v17 = vpop.eup %10456  ;;  %v1065_v21 = vrot.slane %v1057_v12, %v11002_v2  ;;  %v1072_v22 = vrot.slane %v1058_v13, %v11002_v2  ;;  %v1081_v23 = vrot.slane %v1073_v14, %v11002_v2  ;;  %v1088_v42 = vrot.slane %v1074_v15, %v11002_v2 }
 0x4d5   :  { %v1662_v25 = vsel %vm1592_vm3, %v11200_v16, 0.0  ;;  %v946_v36 = vpop.permute.xlu1 %945  ;;  %v1656_v26 = vsel %vm1592_vm3, %v11202_v17, 0.0 }
 0x4d6   :  { %v1161_v27 = vcombine.low %v1065_v21, %v1072_v22  ;;  %v9585_v43 = vcombine.high %v1065_v21, %v1072_v22  ;;  %v1177_v28 = vcombine.low %v1081_v23, %v1088_v42  ;;  %v9586_v38 = vcombine.high %v1081_v23, %v1088_v42  ;;  %1663 = vadd.xlane.f32.xlu1 %v1662_v25 }
 0x4d7   :  { %v973_v46 = vcombine.low %v938_v10, %v946_v36  ;;  %v974_v31 = vcombine.high %v938_v10, %v946_v36  ;;  %1657 = vadd.xlane.f32.xlu0 %v1656_v26 }
 0x4d8   :  { %v1168_v32 = vrot.slane %v1161_v27, %v11000_v59  ;;  %v1176_v44 = vrot.slane %v9585_v43, %v11000_v59  ;;  %v1184_v35 = vrot.slane %v1177_v28, %v11000_v59  ;;  %v1192_v51 = vrot.slane %v9586_v38, %v11000_v59 }
 0x4d9   :  { %v981_v47 = vrot.slane %v973_v46, %v11000_v59  ;;  %v988_v48 = vrot.slane %v974_v31, %v11000_v59 }
 0x4da   :  { %v1193_v49 = vcombine.low %v1168_v32, %v1176_v44  ;;  %v1209_v52 = vcombine.low %v1184_v35, %v1192_v51  ;;  %v1194_v53 = vcombine.high %v1168_v32, %v1176_v44  ;;  %v1210_v19 = vcombine.high %v1184_v35, %v1192_v51 }
 0x4db   :  { %v989_v20 = vcombine.low %v965_v37, %v981_v47  ;;  %v990_v39 = vcombine.high %v965_v37, %v981_v47  ;;  %v1005_v56 = vcombine.low %v972_v40, %v988_v48  ;;  %v1006_v57 = vcombine.high %v972_v40, %v988_v48 }
 0x4dc   :  { %v1201_v58 = vrot.slane %v1193_v49, %v11002_v2  ;;  %v1217_v60 = vrot.slane %v1209_v52, %v11002_v2  ;;  %v1208_v61 = vrot.slane %v1194_v53, %v11002_v2  ;;  %v1224_v62 = vrot.slane %v1210_v19, %v11002_v2 }
 0x4dd   :  { %v997_v34 = vrot.slane %v989_v20, %v11002_v2  ;;  %v1004_v63 = vrot.slane %v990_v39, %v11002_v2  ;;  %v1013_v0 = vrot.slane %v1005_v56, %v11002_v2  ;;  %v1020_v1 = vrot.slane %v1006_v57, %v11002_v2 }
 0x4de   :  { %v1225_v45 = vcombine.low %v1201_v58, %v1217_v60  ;;  %v1227_v4 = vcombine.low %v1208_v61, %v1224_v62  ;;  %v11228_v6 = vcombine.high %v1208_v61, %v1224_v62  ;;  %v1226_v43 = vcombine.high %v1201_v58, %v1217_v60 }
 0x4df   :  { %v1093_v7 = vcombine.low %v997_v34, %v1004_v63  ;;  %v9583_v8 = vcombine.high %v997_v34, %v1004_v63  ;;  %v1109_v9 = vcombine.low %v1013_v0, %v1020_v1  ;;  %v9584_v10 = vcombine.high %v1013_v0, %v1020_v1 }
 0x4e0   :  { %10063 = vmatprep.subr.mxu1 %v1225_v45  ;;  %10077 = vmatprep.subr.mxu0 %v1227_v4 }
 0x4e1   :  { %10064 = vmatpush3.msra.mxu1 %v1225_v45  ;;  %10078 = vmatpush3.msra.mxu0 %v1227_v4  ;;  %v1100_v11 = vrot.slane %v1093_v7, %v11000_v59  ;;  %v1108_v12 = vrot.slane %v9583_v8, %v11000_v59  ;;  %v1116_v13 = vrot.slane %v1109_v9, %v11000_v59 }
 0x4e2   :  { %v1124_v14 = vrot.slane %v9584_v10, %v11000_v59 }
 0x4e3   :  { %v1125_v15 = vcombine.low %v1100_v11, %v1108_v12  ;;  %v1126_v50 = vcombine.high %v1100_v11, %v1108_v12 }
 0x4e4   :  { %v1141_v21 = vcombine.low %v1116_v13, %v1124_v14  ;;  %v1142_v22 = vcombine.high %v1116_v13, %v1124_v14 }
 0x4e5   :  { %v1133_v23 = vrot.slane %v1125_v15, %v11002_v2  ;;  %v1140_v42 = vrot.slane %v1126_v50, %v11002_v2 }
 0x4e6   :  { %v1149_v41 = vrot.slane %v1141_v21, %v11002_v2  ;;  %v1156_v24 = vrot.slane %v1142_v22, %v11002_v2 }
 0x4e8   :  { %v1157_v25 = vcombine.low %v1133_v23, %v1149_v41  ;;  %v1159_v36 = vcombine.low %v1140_v42, %v1156_v24  ;;  %v1158_v26 = vcombine.high %v1133_v23, %v1149_v41  ;;  %v1160_v27 = vcombine.high %v1140_v42, %v1156_v24 }
 0x4ea   :  { %10065 = vmatprep.subr.mxu1 %v1157_v25  ;;  %10079 = vmatprep.subr.mxu0 %v1159_v36 }
 0x4eb   :  { %10066 = vmatpush3.msra.mxu1 %v1157_v25  ;;  %10080 = vmatpush3.msra.mxu0 %v1159_v36 }
 0x4ec   :  { %10070 = vmatprep.subr.mxu1 %v1226_v43 }
 0x54f   :  { %v1646_v28 = vpop.xlane.xlu1 %1645 }
 0x550   :  { %10458 = vrcp.f32 %v1646_v28 }
 0x553   :  { %v1643_v38 = vpop.xlane.xlu0 %1642  ;;  %v1652_v46 = vpop.xlane.xlu1 %1651 }
 0x554   :  { %10460 = vrcp.f32 %v1643_v38 }
 0x555   :  { %10462 = vrcp.f32 %v1652_v46 }
 0x557   :  { %v1649_v31 = vpop.xlane.xlu0 %1648 }
 0x558   :  { %10464 = vrcp.f32 %v1649_v31 }
 0x55a   :  { %v1661_v32 = vpop.xlane.xlu1 %1660 }
 0x55b   :  { %10466 = vrcp.f32 %v1661_v32  ;;  %v1655_v44 = vpop.xlane.xlu0 %1654 }
 0x55c   :  { %10468 = vrcp.f32 %v1655_v44 }
 0x55d   :  { %v10459_v51 = vpop.eup %10458 }
 0x55e   :  { %v1668_v48 = vmul.f32 %v10459_v51, %v11172_v18 }
 0x55f   :  { %v1664_v35 = vpop.xlane.xlu1 %1663 }
 0x560   :  { %10470 = vrcp.f32 %v1664_v35  ;;  %v1658_v37 = vpop.xlane.xlu0 %1657 }
 0x561   :  { %v10461_v40 = vpop.eup %10460  ;;  %10472 = vrcp.f32 %v1658_v37  ;;  %v166_v37 = vld [vmem:[%s12520_s5 + $0x18] sm:$0xff] }
 0x562   :  { %v1666_v47 = vmul.f32 %v10461_v40, %v11178_v55  ;;  %v10463_v49 = vpop.eup %10462  ;;  %10091 = vmatprep.subr.mxu0 %v166_v37 }
 0x563   :  { %v1672_v19 = vmul.f32 %v10463_v49, %v11176_v54 }
 0x564   :  { %10067 = vmatprep.mubr.msk.f32.mxu1 %vm1592_vm3, %v1666_v47 }
 0x565   :  { %v10465_v52 = vpop.eup %10464  ;;  %10068 = vmatmul.mubr.msk.f32.vlgmr.msra.gmra.mxu1 %vm1592_vm3, %v1668_v48 }
 0x566   :  { %10071 = vmatpush3.msra.mxu1 %v1226_v43  ;;  %v1670_v53 = vmul.f32 %v10465_v52, %v11184_v33 }
 0x567   :  { %10072 = vmatprep.subr.mxu1 %v1158_v26 }
 0x568   :  { %v10467_v20 = vpop.eup %10466  ;;  %10073 = vmatpush3.msra.mxu1 %v1158_v26  ;;  %10074 = vmatprep.mubr.msk.f32.mxu1 %vm1592_vm3, %v1670_v53 }
 0x569   :  { %v10469_v39 = vpop.eup %10468  ;;  %10084 = vmatprep.subr.mxu1 %v11228_v6  ;;  %10075 = vmatmul.mubr.msk.f32.vlgmr.msra.gmra.mxu1 %vm1592_vm3, %v1672_v19  ;;  %v1678_v18 = vmul.f32 %v10467_v20, %v11188_v3 }
 0x56a   :  { %10085 = vmatpush3.msra.mxu1 %v11228_v6  ;;  %v1674_v55 = vmul.f32 %v10469_v39, %v11191_v5 }
 0x56b   :  { %10086 = vmatprep.subr.mxu1 %v1160_v27  ;;  %10088 = vmatprep.mubr.msk.f32.mxu1 %vm1592_vm3, %v1678_v18 }
 0x56c   :  { %10087 = vmatpush3.msra.mxu1 %v1160_v27  ;;  %10081 = vmatprep.mubr.msk.f32.mxu0 %vm1592_vm3, %v1674_v55 }
 0x56d   :  { %v10471_v54 = vpop.eup %10470 }
 0x56e   :  { %v10473_v33 = vpop.eup %10472  ;;  %v1680_v56 = vmul.f32 %v10471_v54, %v11200_v16 }
 0x56f   :  { %v1676_v57 = vmul.f32 %v10473_v33, %v11202_v17  ;;  %v165_v33 = vld [vmem:[%s12520_s5 + $0x10] sm:$0xff] }
 0x570   :  { %10089 = vmatmul.mubr.msk.f32.vlgmr.msra.gmra.mxu1 %vm1592_vm3, %v1680_v56 }
 0x571   :  { %10082 = vmatmul.mubr.msk.f32.vlgmr.msra.gmra.mxu0 %vm1592_vm3, %v1676_v57 }
 0x572   :  { %10092 = vmatpush3.msra.mxu0 %v166_v37 }
 0x573   :  { %10093 = vmatprep.subr.mxu0 %v165_v33 }
 0x574   :  { %10094 = vmatpush3.msra.mxu0 %v165_v33 }
 0x625   :  { %v10069_v3 = vpop.f32.mrf.mxu1 }
 0x627   :  { %v1753_v58 = vpop.f32.mrf.mxu1 }
 0x629   :  { %v10076_v60 = vpop.f32.mrf.mxu1 }
 0x62b   :  { %v1834_v5 = vpop.f32.mrf.mxu1 }
 0x630   :  { %v10090_v61 = vpop.f32.mrf.mxu1 }
 0x631   :  { %v2089_v62 = vcombine.low %v10076_v60, %v10090_v61  ;;  %v2090_v34 = vcombine.high %v10076_v60, %v10090_v61  ;;  %v10083_v63 = vpop.f32.mrf.mxu0  ;;  %v164_v60 = vld [vmem:[%s12520_s5 + $0x8] sm:$0xff] }
 0x632   :  { %v2073_v0 = vcombine.low %v10069_v3, %v10083_v63  ;;  %v2074_v1 = vcombine.high %v10069_v3, %v10083_v63  ;;  %v1996_v45 = vpop.f32.mrf.mxu1  ;;  %10095 = vmatprep.subr.mxu0 %v164_v60 }
 0x633   :  { %v2097_v4 = vrot.slane %v2089_v62, %v11000_v59  ;;  %v2104_v16 = vrot.slane %v2090_v34, %v11000_v59  ;;  %v2021_v17 = vcombine.low %v1834_v5, %v1996_v45  ;;  %v2022_v6 = vcombine.high %v1834_v5, %v1996_v45  ;;  %v1915_v7 = vpop.f32.mrf.mxu0  ;;  %10096 = vmatpush3.msra.mxu0 %v164_v60 }
 0x634   :  { %v2081_v8 = vrot.slane %v2073_v0, %v11000_v59  ;;  %v2088_v9 = vrot.slane %v2074_v1, %v11000_v59  ;;  %v2005_v10 = vcombine.low %v1753_v58, %v1915_v7  ;;  %v2006_v11 = vcombine.high %v1753_v58, %v1915_v7 }
 0x635   :  { %v2029_v50 = vrot.slane %v2021_v17, %v11000_v59  ;;  %v2036_v21 = vrot.slane %v2022_v6, %v11000_v59  ;;  %v163_v17 = vld [vmem:[%s12520_s5] sm:$0xff] }
 0x636   :  { %v2105_v12 = vcombine.low %v2081_v8, %v2097_v4  ;;  %v2106_v13 = vcombine.high %v2081_v8, %v2097_v4  ;;  %v2121_v14 = vcombine.low %v2088_v9, %v2104_v16  ;;  %v2122_v15 = vcombine.high %v2088_v9, %v2104_v16  ;;  %10097 = vmatprep.subr.mxu0 %v163_v17 }
 0x637   :  { %v2013_v22 = vrot.slane %v2005_v10, %v11000_v59  ;;  %v2020_v23 = vrot.slane %v2006_v11, %v11000_v59  ;;  %10098 = vmatpush3.msra.mxu0 %v163_v17 }
 0x638   :  { %v2113_v42 = vrot.slane %v2105_v12, %v11002_v2  ;;  %v2120_v41 = vrot.slane %v2106_v13, %v11002_v2  ;;  %v2129_v24 = vrot.slane %v2121_v14, %v11002_v2  ;;  %v2136_v25 = vrot.slane %v2122_v15, %v11002_v2 }
 0x639   :  { %v2037_v36 = vcombine.low %v2013_v22, %v2029_v50  ;;  %v2038_v26 = vcombine.high %v2013_v22, %v2029_v50  ;;  %v2053_v27 = vcombine.low %v2020_v23, %v2036_v21  ;;  %v2054_v43 = vcombine.high %v2020_v23, %v2036_v21 }
 0x63a   :  { %v2209_v28 = vcombine.low %v2113_v42, %v2120_v41  ;;  %v9613_v38 = vcombine.high %v2113_v42, %v2120_v41  ;;  %v2225_v46 = vcombine.low %v2129_v24, %v2136_v25  ;;  %v9614_v31 = vcombine.high %v2129_v24, %v2136_v25 }
 0x63b   :  { %v2045_v32 = vrot.slane %v2037_v36, %v11002_v2  ;;  %v2052_v44 = vrot.slane %v2038_v26, %v11002_v2  ;;  %v2061_v35 = vrot.slane %v2053_v27, %v11002_v2  ;;  %v2068_v51 = vrot.slane %v2054_v43, %v11002_v2 }
 0x63c   :  { %v2216_v40 = vrot.slane %v2209_v28, %v11000_v59  ;;  %v2224_v47 = vrot.slane %v9613_v38, %v11000_v59  ;;  %v2232_v48 = vrot.slane %v2225_v46, %v11000_v59  ;;  %v2240_v49 = vrot.slane %v9614_v31, %v11000_v59  ;;  %v9615_v28 = vld [vmem:[#allocation14 + $0x1] ss:$0 sm:$0xff] }
 0x63d   :  { %v2141_v52 = vcombine.low %v2045_v32, %v2052_v44  ;;  %v9611_v53 = vcombine.high %v2045_v32, %v2052_v44  ;;  %v2157_v19 = vcombine.low %v2061_v35, %v2068_v51  ;;  %v9612_v20 = vcombine.high %v2061_v35, %v2068_v51  ;;  %v10590_v32 = vld [vmem:[#allocation2 + $0x8] sm:$0xff]  ;;  %v10591_v51 = vld [vmem:[#allocation2] sm:$0xff] }
 0x63e   :  { %v2241_v39 = vcombine.low %v2216_v40, %v2224_v47  ;;  %v2257_v18 = vcombine.low %v2232_v48, %v2240_v49  ;;  %v2242_v55 = vcombine.high %v2216_v40, %v2224_v47  ;;  %v2258_v54 = vcombine.high %v2232_v48, %v2240_v49  ;;  %v174_v48 = vld [vmem:[#allocation10 + $0x18] sm:$0xff]  ;;  %v173_v49 = vld [vmem:[#allocation10 + $0x10] sm:$0xff] }
 0x63f   :  { %v2148_v56 = vrot.slane %v2141_v52, %v11000_v59  ;;  %v2156_v57 = vrot.slane %v9611_v53, %v11000_v59  ;;  %v2164_v3 = vrot.slane %v2157_v19, %v11000_v59  ;;  %v2172_v58 = vrot.slane %v9612_v20, %v11000_v59  ;;  %10113 = vmatprep.subr.mxu0 %v174_v48  ;;  %v153_v52 = vld [vmem:[#allocation5] sm:$0xff]  ;;  %v172_v53 = vld [vmem:[#allocation10 + $0x8] sm:$0xff]  ;;  %v171_v19 = vld [vmem:[#allocation10] sm:$0xff] }
 0x640   :  { %v2249_v5 = vrot.slane %v2241_v39, %v11002_v2  ;;  %v2265_v61 = vrot.slane %v2257_v18, %v11002_v2  ;;  %v2256_v4 = vrot.slane %v2242_v55, %v11002_v2  ;;  %v2272_v16 = vrot.slane %v2258_v54, %v11002_v2  ;;  %v154_v20 = vld [vmem:[#allocation5 + $0x8] sm:$0xff] }
 0x641   :  { %v2173_v62 = vcombine.low %v2148_v56, %v2156_v57  ;;  %v2189_v34 = vcombine.low %v2164_v3, %v2172_v58  ;;  %v2174_v63 = vcombine.high %v2148_v56, %v2156_v57  ;;  %v2190_v0 = vcombine.high %v2164_v3, %v2172_v58 }
 0x642   :  { %v2274_v1 = vcombine.high %v2249_v5, %v2265_v61  ;;  %v2273_v45 = vcombine.low %v2249_v5, %v2265_v61  ;;  %v2275_v12 = vcombine.low %v2256_v4, %v2272_v16  ;;  %v2276_v14 = vcombine.high %v2256_v4, %v2272_v16  ;;  %v170_v5 = vld [vmem:[%s12521_s6 + $0x18] sm:$0xff]  ;;  %v169_v61 = vld [vmem:[%s12521_s6 + $0x10] sm:$0xff] }
 0x643   :  { %v2181_v6 = vrot.slane %v2173_v62, %v11002_v2  ;;  %v2197_v7 = vrot.slane %v2189_v34, %v11002_v2  ;;  %v2188_v10 = vrot.slane %v2174_v63, %v11002_v2  ;;  %v2204_v11 = vrot.slane %v2190_v0, %v11002_v2  ;;  %10102 = vmatprep.subr.mxu1 %v170_v5  ;;  %v168_v62 = vld [vmem:[%s12521_s6 + $0x8] sm:$0xff]  ;;  %v167_v34 = vld [vmem:[%s12521_s6] sm:$0xff] }
 0x644   :  { %2281 = vrot.lane.b32.xlu1 %v2274_v1, %s10789_s27  ;;  %10103 = vmatpush3.msra.mxu1 %v170_v5  ;;  %v9623_v63 = vld [vmem:[#allocation14 + $0x3] ss:$0 sm:$0xff] }
 0x645   :  { %v2206_v8 = vcombine.high %v2181_v6, %v2197_v7  ;;  %v2205_v9 = vcombine.low %v2181_v6, %v2197_v7  ;;  %v2207_v13 = vcombine.low %v2188_v10, %v2204_v11  ;;  %v2208_v15 = vcombine.high %v2188_v10, %v2204_v11  ;;  %10104 = vmatprep.subr.mxu1 %v169_v61  ;;  %v9618_v11 = vld [vmem:[#allocation14 + $0x9] ss:$0 sm:$0xff] }
 0x646   :  { %10105 = vmatpush3.msra.mxu1 %v169_v61 }
 0x647   :  { %2279 = vrot.lane.b32.xlu0 %v2206_v8, %s10789_s27  ;;  %10106 = vmatprep.subr.mxu1 %v168_v62 }
 0x648   :  { %2289 = vrot.lane.b32.xlu1 %v2275_v12, %s10803_s7  ;;  %10107 = vmatpush3.msra.mxu1 %v168_v62 }
 0x649   :  { %10108 = vmatprep.subr.mxu1 %v167_v34 }
 0x64a   :  { %10109 = vmatpush3.msra.mxu1 %v167_v34 }
 0x64b   :  { %2287 = vrot.lane.b32.xlu0 %v2207_v13, %s10803_s7  ;;  %v9619_v13 = vld [vmem:[#allocation14 + $0xa] ss:$0 sm:$0xff] }
 0x64c   :  { %2297 = vrot.lane.b32.xlu1 %v2276_v14, %s10804_s20 }
 0x64f   :  { %2295 = vrot.lane.b32.xlu0 %v2208_v15, %s10804_s20 }
 0x6b6   :  { %v2282_v50 = vpop.permute.xlu1 %2281 }
 0x6b7   :  { %v2302_v24 = vsel %vm1229_vm1, %v2273_v45, %v2282_v50 }
 0x6b9   :  { %v2280_v21 = vpop.permute.xlu0 %2279 }
 0x6ba   :  { %v2290_v22 = vpop.permute.xlu1 %2289  ;;  %v2301_v42 = vsel %vm1229_vm1, %v2205_v9, %v2280_v21 }
 0x6bb   :  { %v2304_v26 = vsel %vm1592_vm3, %v2302_v24, %v2290_v22 }
 0x6bd   :  { %v2288_v23 = vpop.permute.xlu0 %2287 }
 0x6be   :  { %v2298_v41 = vpop.permute.xlu1 %2297  ;;  %v2303_v25 = vsel %vm1592_vm3, %v2301_v42, %v2288_v23 }
 0x6bf   :  { %v2307_v43 = vsel %vm2305_vm5, %v2304_v26, %v2298_v41 }
 0x6c1   :  { %v2296_v36 = vpop.permute.xlu0 %2295 }
 0x6c2   :  { %v2306_v27 = vsel %vm2305_vm5, %v2303_v25, %v2296_v36 }
 0x6c3   :  { %10099 = vmatprep.mubr.msk.f32.mxu0 %vm204_vm0, %v2306_v27 }
 0x6c4   :  { %10100 = vmatmul.mubr.msk.f32.vlgmr.msra.gmra.mxu0 %vm204_vm0, %v2307_v43 }
 0x6c5   :  { %10114 = vmatpush3.msra.mxu0 %v174_v48  ;;  %10121 = vmatprep.mubr.msk.f32.mxu0 %vm204_vm0, %v153_v52 }
 0x6c6   :  { %10115 = vmatprep.subr.mxu0 %v173_v49 }
 0x6c7   :  { %10116 = vmatpush3.msra.mxu0 %v173_v49 }
 0x6c8   :  { %10117 = vmatprep.subr.mxu0 %v172_v53 }
 0x6c9   :  { %10118 = vmatpush3.msra.mxu0 %v172_v53 }
 0x6ca   :  { %10119 = vmatprep.subr.mxu0 %v171_v19 }
 0x6cb   :  { %10120 = vmatpush3.msra.mxu0 %v171_v19 }
 0x6cc   :  { %10122 = vmatmul.mubr.msk.f32.vlgmr.msra.gmra.mxu0 %vm204_vm0, %v154_v20 }
 0x784   :  { %v10101_v38 = vpop.f32.mrf.mxu0 }
 0x785   :  { %v2390_v46 = vadd.f32 %v10101_v38, %v9615_v28 }
 0x786   :  { %v2384_v31 = vpop.f32.mrf.mxu0 }
 0x787   :  { %v11314_v44 = vadd.f32 %v10590_v32, %v2390_v46  ;;  %v2385_v35 = vadd.f32 %v9615_v28, %v2384_v31 }
 0x789   :  { %v11316_v37 = vadd.f32 %v10591_v51, %v2385_v35  ;;  %v2398_v40 = vsel %vm204_vm0, %v11314_v44, 0.0 }
 0x78a   :  { %2399 = vadd.xlane.f32.xlu1 %v2398_v40 }
 0x78b   :  { %v2395_v47 = vsel %vm204_vm0, %v11316_v37, 0.0 }
 0x78c   :  { %2396 = vadd.xlane.f32.xlu0 %v2395_v47  ;;  %v10123_v0 = vpop.f32.mrf.mxu0 }
 0x78d   :  { %v11340_v1 = vadd.f32 %v10123_v0, %v9623_v63 }
 0x78e   :  { %v2594_v45 = vpop.f32.mrf.mxu0 }
 0x78f   :  { %v11346_v4 = vadd.f32 %v9623_v63, %v2594_v45 }
 0x79b   :  { %2907 = vrot.lane.b32.xlu1 %v11340_v1, %s10796_s8 }
 0x79f   :  { %2913 = vrot.lane.b32.xlu1 %v11340_v1, %s10798_s30 }
 0x7a3   :  { %2899 = vrot.lane.b32.xlu1 %v11346_v4, %s10797_s29 }
 0x7a7   :  { %2911 = vrot.lane.b32.xlu1 %v11346_v4, %s10798_s30 }
 0x813   :  { %v2400_v39 = vpop.xlane.xlu1 %2399 }
 0x814   :  { %v2402_v18 = vmul.f32 0.03125, %v2400_v39 }
 0x815   :  { %v2397_v55 = vpop.xlane.xlu0 %2396 }
 0x816   :  { %v2401_v54 = vmul.f32 0.03125, %v2397_v55  ;;  %v2404_v33 = vsub.f32 %v11314_v44, %v2402_v18 }
 0x817   :  { %v11358_v42 = vpop.permute.xlu1 %2907 }
 0x818   :  { %v2403_v56 = vsub.f32 %v11316_v37, %v2401_v54  ;;  %v2406_v58 = vmul.f32 %v2404_v33, %v2404_v33  ;;  %v2985_v36 = vcombine.low %v11340_v1, %v11358_v42  ;;  %v2986_v26 = vcombine.high %v11340_v1, %v11358_v42 }
 0x81a   :  { %v2405_v57 = vmul.f32 %v2403_v56, %v2403_v56  ;;  %v2410_v60 = vsel %vm204_vm0, %v2406_v58, 0.0  ;;  %v2993_v32 = vrot.slane %v2985_v36, %v11000_v59  ;;  %v3000_v35 = vrot.slane %v2986_v26, %v11000_v59 }
 0x81b   :  { %v11360_v41 = vpop.permute.xlu1 %2913 }
 0x81c   :  { %v2407_v3 = vsel %vm204_vm0, %v2405_v57, 0.0 }
 0x81d   :  { %2408 = vadd.xlane.f32.xlu0 %v2407_v3 }
 0x81f   :  { %v11362_v24 = vpop.permute.xlu1 %2899 }
 0x821   :  { %2411 = vadd.xlane.f32.xlu0 %v2410_v60 }
 0x823   :  { %v11374_v28 = vpop.permute.xlu1 %2911 }
 0x824   :  { %v2933_v46 = vcombine.low %v11362_v24, %v11374_v28  ;;  %v2934_v47 = vcombine.high %v11362_v24, %v11374_v28 }
 0x826   :  { %v2941_v49 = vrot.slane %v2933_v46, %v11000_v59  ;;  %v2948_v18 = vrot.slane %v2934_v47, %v11000_v59 }
 0x837   :  { %2901 = vrot.lane.b32.xlu0 %v11340_v1, %s10797_s29 }
 0x83b   :  { %2905 = vrot.lane.b32.xlu0 %v11346_v4, %s10796_s8 }
 0x8a6   :  { %v2409_v16 = vpop.xlane.xlu0 %2408 }
 0x8a7   :  { %v2413_v17 = vmul.f32 0.03125, %v2409_v16 }
 0x8a9   :  { %v2415_v6 = vadd.f32 1e-05, %v2413_v17 }
 0x8aa   :  { %v2412_v7 = vpop.xlane.xlu0 %2411 }
 0x8ab   :  { %10474 = vrsqrt.f32 %v2415_v6  ;;  %v2414_v8 = vmul.f32 0.03125, %v2412_v7 }
 0x8ad   :  { %v2416_v9 = vadd.f32 1e-05, %v2414_v8 }
 0x8ae   :  { %v11364_v25 = vpop.permute.xlu0 %2901 }
 0x8af   :  { %10476 = vrsqrt.f32 %v2416_v9  ;;  %v3001_v27 = vcombine.low %v11364_v25, %v11360_v41  ;;  %v3002_v43 = vcombine.high %v11364_v25, %v11360_v41 }
 0x8b1   :  { %v3009_v51 = vrot.slane %v3001_v27, %v11000_v59  ;;  %v3016_v40 = vrot.slane %v3002_v43, %v11000_v59 }
 0x8b2   :  { %v11376_v38 = vpop.permute.xlu0 %2905 }
 0x8b3   :  { %v2917_v31 = vcombine.low %v11346_v4, %v11376_v38  ;;  %v2918_v48 = vcombine.high %v11346_v4, %v11376_v38  ;;  %v3017_v53 = vcombine.low %v2993_v32, %v3009_v51  ;;  %v3018_v19 = vcombine.high %v2993_v32, %v3009_v51 }
 0x8b4   :  { %v3033_v20 = vcombine.low %v3000_v35, %v3016_v40  ;;  %v3034_v39 = vcombine.high %v3000_v35, %v3016_v40 }
 0x8b5   :  { %v2925_v52 = vrot.slane %v2917_v31, %v11000_v59  ;;  %v2932_v55 = vrot.slane %v2918_v48, %v11000_v59  ;;  %v3032_v57 = vrot.slane %v3018_v19, %v11002_v2 }
 0x8b6   :  { %v3041_v3 = vrot.slane %v3033_v20, %v11002_v2  ;;  %v3048_v58 = vrot.slane %v3034_v39, %v11002_v2 }
 0x8b7   :  { %v2949_v54 = vcombine.low %v2925_v52, %v2941_v49  ;;  %v2965_v60 = vcombine.low %v2932_v55, %v2948_v18  ;;  %v2966_v5 = vcombine.high %v2932_v55, %v2948_v18 }
 0x8b8   :  { %v10475_v10 = vpop.eup %10474  ;;  %v3137_v0 = vcombine.low %v3041_v3, %v3048_v58  ;;  %v9633_v45 = vcombine.high %v3041_v3, %v3048_v58 }
 0x8b9   :  { %v2419_v12 = vmul.f32 %v10475_v10, %v2403_v56  ;;  %v3025_v56 = vrot.slane %v3017_v53, %v11002_v2  ;;  %v2957_v61 = vrot.slane %v2949_v54, %v11002_v2  ;;  %v2973_v16 = vrot.slane %v2965_v60, %v11002_v2 }
 0x8ba   :  { %v2980_v17 = vrot.slane %v2966_v5, %v11002_v2  ;;  %v3144_v10 = vrot.slane %v3137_v0, %v11000_v59 }
 0x8bb   :  { %v2425_v14 = vmul.f32 %v9618_v11, %v2419_v12  ;;  %v3121_v34 = vcombine.low %v3025_v56, %v3032_v57  ;;  %v9632_v63 = vcombine.high %v3025_v56, %v3032_v57  ;;  %v9620_v56 = vld [vmem:[#allocation14 + $0x2] ss:$0 sm:$0xff] }
 0x8bc   :  { %v10477_v15 = vpop.eup %10476  ;;  %v3069_v12 = vcombine.low %v2973_v16, %v2980_v17 }
 0x8bd   :  { %v2420_v50 = vmul.f32 %v10477_v15, %v2404_v33  ;;  %v2431_v21 = vadd.f32 %v9619_v13, %v2425_v14  ;;  %v2950_v33 = vcombine.high %v2925_v52, %v2941_v49  ;;  %v3128_v8 = vrot.slane %v3121_v34, %v11000_v59 }
 0x8be   :  { %v3136_v9 = vrot.slane %v9632_v63, %v11000_v59  ;;  %v3076_v36 = vrot.slane %v3069_v12, %v11000_v59 }
 0x8bf   :  { %v2426_v22 = vmul.f32 %v9618_v11, %v2420_v50  ;;  %10110 = vmatprep.mubr.msk.f32.mxu1 %vm204_vm0, %v2431_v21  ;;  %v2964_v62 = vrot.slane %v2950_v33, %v11002_v2  ;;  %v3152_v11 = vrot.slane %v9633_v45, %v11000_v59 }
 0x8c0   :  { %v3153_v14 = vcombine.low %v3128_v8, %v3136_v9  ;;  %v3154_v35 = vcombine.high %v3128_v8, %v3136_v9 }
 0x8c1   :  { %v2432_v23 = vadd.f32 %v9619_v13, %v2426_v22  ;;  %v3053_v6 = vcombine.low %v2957_v61, %v2964_v62  ;;  %v9630_v7 = vcombine.high %v2957_v61, %v2964_v62  ;;  %v9631_v13 = vcombine.high %v2973_v16, %v2980_v17 }
 0x8c2   :  { %v3169_v15 = vcombine.low %v3144_v10, %v3152_v11  ;;  %v3161_v50 = vrot.slane %v3153_v14, %v11002_v2  ;;  %v3170_v51 = vcombine.high %v3144_v10, %v3152_v11  ;;  %v3168_v49 = vrot.slane %v3154_v35, %v11002_v2 }
 0x8c3   :  { %10111 = vmatmul.mubr.msk.f32.vlgmr.msra.gmra.mxu1 %vm204_vm0, %v2432_v23  ;;  %v3060_v22 = vrot.slane %v3053_v6, %v11000_v59  ;;  %v3068_v23 = vrot.slane %v9630_v7, %v11000_v59  ;;  %v3084_v26 = vrot.slane %v9631_v13, %v11000_v59 }
 0x8c4   :  { %v3177_v21 = vrot.slane %v3169_v15, %v11002_v2  ;;  %v3184_v52 = vrot.slane %v3170_v51, %v11002_v2 }
 0x8c5   :  { %v3085_v46 = vcombine.low %v3060_v22, %v3068_v23  ;;  %v3101_v31 = vcombine.low %v3076_v36, %v3084_v26  ;;  %v3086_v47 = vcombine.high %v3060_v22, %v3068_v23  ;;  %v3102_v48 = vcombine.high %v3076_v36, %v3084_v26 }
 0x8c6   :  { %v3185_v27 = vcombine.low %v3161_v50, %v3177_v21  ;;  %v3186_v43 = vcombine.high %v3161_v50, %v3177_v21  ;;  %v11422_v18 = vcombine.low %v3168_v49, %v3184_v52  ;;  %v11424_v55 = vcombine.high %v3168_v49, %v3184_v52 }
 0x8c7   :  { %v3093_v32 = vrot.slane %v3085_v46, %v11002_v2  ;;  %v3109_v40 = vrot.slane %v3101_v31, %v11002_v2  ;;  %v3100_v20 = vrot.slane %v3086_v47, %v11002_v2  ;;  %v3116_v39 = vrot.slane %v3102_v48, %v11002_v2 }
 0x8c8   :  { %10124 = vmatprep.subr.msk.mxu1 %vm1229_vm1, %v3185_v27  ;;  %10131 = vmatprep.subr.msk.mxu0 %vm1229_vm1, %v3186_v43 }
 0x8c9   :  { %10125 = vmatpush3.xpose.msk.msra.mxu1 %vm1229_vm1, %v3185_v27  ;;  %10132 = vmatpush3.xpose.msk.msra.mxu0 %vm1229_vm1, %v3186_v43  ;;  %v3117_v53 = vcombine.low %v3093_v32, %v3109_v40  ;;  %v3118_v19 = vcombine.high %v3093_v32, %v3109_v40  ;;  %v11428_v54 = vcombine.low %v3100_v20, %v3116_v39 }
 0x8ca   :  { %v11430_v33 = vcombine.high %v3100_v20, %v3116_v39 }
 0x8cb   :  { %10126 = vmatprep.subr.msk.mxu1 %vm1229_vm1, %v3117_v53  ;;  %10133 = vmatprep.subr.msk.mxu0 %vm1229_vm1, %v3118_v19 }
 0x8cd   :  { %10127 = vmatpush3.xpose.msk.msra.mxu1 %vm1229_vm1, %v3117_v53  ;;  %10134 = vmatpush3.xpose.msk.msra.mxu0 %vm1229_vm1, %v3118_v19 }
 0x8ce   :  { %10138 = vmatprep.subr.msk.mxu1 %vm1229_vm1, %v11422_v18  ;;  %10145 = vmatprep.subr.msk.mxu0 %vm1229_vm1, %v11424_v55 }
 0x983   :  { %v10112_v57 = vpop.f32.mrf.mxu1 }
 0x984   :  { %v2515_v3 = vadd.f32 %v10112_v57, %v9620_v56 }
 0x985   :  { %v2509_v58 = vpop.f32.mrf.mxu1 }
 0x986   :  { %v2604_v60 = vmul.f32 0.17677669, %v2515_v3  ;;  %v2510_v5 = vadd.f32 %v9620_v56, %v2509_v58 }
 0x988   :  { %v2603_v61 = vmul.f32 0.17677669, %v2510_v5  ;;  %2609 = vrot.lane.b32.xlu1 %v2604_v60, %s10797_s29 }
 0x98a   :  { %2607 = vrot.lane.b32.xlu0 %v2603_v61, %s10797_s29 }
 0x98c   :  { %2613 = vrot.lane.b32.xlu1 %v2603_v61, %s10796_s8 }
 0x98e   :  { %2619 = vrot.lane.b32.xlu0 %v2603_v61, %s10798_s30 }
 0x990   :  { %2621 = vrot.lane.b32.xlu1 %v2604_v60, %s10798_s30 }
 0x992   :  { %2615 = vrot.lane.b32.xlu0 %v2604_v60, %s10796_s8 }
 0x9fa   :  { %v2610_v62 = vpop.permute.xlu1 %2609 }
 0x9fc   :  { %v2608_v34 = vpop.permute.xlu0 %2607 }
 0x9fe   :  { %v2614_v63 = vpop.permute.xlu1 %2613 }
 0x9ff   :  { %v2625_v0 = vcombine.low %v2603_v61, %v2614_v63  ;;  %v2626_v45 = vcombine.high %v2603_v61, %v2614_v63 }
 0xa00   :  { %v2620_v16 = vpop.permute.xlu0 %2619 }
 0xa01   :  { %v2641_v17 = vcombine.low %v2608_v34, %v2620_v16  ;;  %v2642_v6 = vcombine.high %v2608_v34, %v2620_v16  ;;  %v2633_v8 = vrot.slane %v2625_v0, %v11000_v59  ;;  %v2640_v9 = vrot.slane %v2626_v45, %v11000_v59 }
 0xa02   :  { %v2622_v7 = vpop.permute.xlu1 %2621 }
 0xa03   :  { %v2649_v10 = vrot.slane %v2641_v17, %v11000_v59  ;;  %v2656_v11 = vrot.slane %v2642_v6, %v11000_v59  ;;  %v2709_v12 = vcombine.low %v2610_v62, %v2622_v7  ;;  %v2710_v13 = vcombine.high %v2610_v62, %v2622_v7 }
 0xa04   :  { %v2616_v14 = vpop.permute.xlu0 %2615 }
 0xa05   :  { %v2657_v15 = vcombine.low %v2633_v8, %v2649_v10  ;;  %v2658_v50 = vcombine.high %v2633_v8, %v2649_v10  ;;  %v2673_v21 = vcombine.low %v2640_v9, %v2656_v11  ;;  %v2674_v22 = vcombine.high %v2640_v9, %v2656_v11 }
 0xa06   :  { %v2693_v23 = vcombine.low %v2604_v60, %v2616_v14  ;;  %v2694_v36 = vcombine.high %v2604_v60, %v2616_v14  ;;  %v2717_v31 = vrot.slane %v2709_v12, %v11000_v59  ;;  %v2724_v32 = vrot.slane %v2710_v13, %v11000_v59 }
 0xa07   :  { %v2665_v26 = vrot.slane %v2657_v15, %v11002_v2  ;;  %v2672_v27 = vrot.slane %v2658_v50, %v11002_v2  ;;  %v2681_v43 = vrot.slane %v2673_v21, %v11002_v2  ;;  %v2688_v46 = vrot.slane %v2674_v22, %v11002_v2 }
 0xa08   :  { %v2701_v35 = vrot.slane %v2693_v23, %v11000_v59  ;;  %v2708_v51 = vrot.slane %v2694_v36, %v11000_v59 }
 0xa09   :  { %v2761_v40 = vcombine.low %v2665_v26, %v2672_v27  ;;  %v9626_v47 = vcombine.high %v2665_v26, %v2672_v27  ;;  %v2777_v48 = vcombine.low %v2681_v43, %v2688_v46  ;;  %v9627_v49 = vcombine.high %v2681_v43, %v2688_v46 }
 0xa0a   :  { %v2725_v52 = vcombine.low %v2701_v35, %v2717_v31  ;;  %v2726_v53 = vcombine.high %v2701_v35, %v2717_v31  ;;  %v2741_v19 = vcombine.low %v2708_v51, %v2724_v32  ;;  %v2742_v20 = vcombine.high %v2708_v51, %v2724_v32 }
 0xa0b   :  { %v2768_v39 = vrot.slane %v2761_v40, %v11000_v59  ;;  %v2776_v56 = vrot.slane %v9626_v47, %v11000_v59  ;;  %v2784_v57 = vrot.slane %v2777_v48, %v11000_v59  ;;  %v2792_v3 = vrot.slane %v9627_v49, %v11000_v59  ;;  %v11496_v40 = vld [vmem:[#allocation8 + $0x8] sm:$0xff]  ;;  %v11498_v47 = vld [vmem:[#allocation8] sm:$0xff] }
 0xa0c   :  { %v2733_v58 = vrot.slane %v2725_v52, %v11002_v2  ;;  %v2740_v60 = vrot.slane %v2726_v53, %v11002_v2  ;;  %v2749_v5 = vrot.slane %v2741_v19, %v11002_v2  ;;  %v2756_v61 = vrot.slane %v2742_v20, %v11002_v2 }
 0xa0d   :  { %v2793_v62 = vcombine.low %v2768_v39, %v2776_v56  ;;  %v2809_v34 = vcombine.low %v2784_v57, %v2792_v3  ;;  %v2794_v7 = vcombine.high %v2768_v39, %v2776_v56  ;;  %v2810_v8 = vcombine.high %v2784_v57, %v2792_v3 }
 0xa0e   :  { %v2829_v63 = vcombine.low %v2733_v58, %v2740_v60  ;;  %v9628_v0 = vcombine.high %v2733_v58, %v2740_v60  ;;  %v2845_v45 = vcombine.low %v2749_v5, %v2756_v61  ;;  %v9629_v16 = vcombine.high %v2749_v5, %v2756_v61 }
 0xa0f   :  { %v2801_v17 = vrot.slane %v2793_v62, %v11002_v2  ;;  %v2817_v6 = vrot.slane %v2809_v34, %v11002_v2  ;;  %v2808_v23 = vrot.slane %v2794_v7, %v11002_v2  ;;  %v2824_v36 = vrot.slane %v2810_v8, %v11002_v2 }
 0xa10   :  { %v2836_v9 = vrot.slane %v2829_v63, %v11000_v59  ;;  %v2844_v10 = vrot.slane %v9628_v0, %v11000_v59  ;;  %v2852_v11 = vrot.slane %v2845_v45, %v11000_v59  ;;  %v2860_v12 = vrot.slane %v9629_v16, %v11000_v59 }
 0xa11   :  { %v2825_v13 = vcombine.low %v2801_v17, %v2817_v6  ;;  %v2826_v14 = vcombine.high %v2801_v17, %v2817_v6  ;;  %v2827_v31 = vcombine.low %v2808_v23, %v2824_v36  ;;  %v2828_v32 = vcombine.high %v2808_v23, %v2824_v36 }
 0xa12   :  { %v2861_v15 = vcombine.low %v2836_v9, %v2844_v10  ;;  %v2877_v50 = vcombine.low %v2852_v11, %v2860_v12  ;;  %v2862_v26 = vcombine.high %v2836_v9, %v2844_v10  ;;  %v2878_v27 = vcombine.high %v2852_v11, %v2860_v12 }
 0xa13   :  { %10128 = vmatprep.mubr.msk.f32.mxu1 %vm1229_vm1, %v2825_v13  ;;  %10135 = vmatprep.mubr.msk.f32.mxu0 %vm1229_vm1, %v2826_v14  ;;  %vm3834_vm6 = vcmp.eq.f32.partialorder %v11496_v40, 0.0  ;;  %vm3833_vm7 = vcmp.eq.f32.partialorder %v11498_v47, 0.0 }
 0xa14   :  { %v2869_v21 = vrot.slane %v2861_v15, %v11002_v2  ;;  %v2885_v22 = vrot.slane %v2877_v50, %v11002_v2  ;;  %v2876_v35 = vrot.slane %v2862_v26, %v11002_v2  ;;  %v2892_v51 = vrot.slane %v2878_v27, %v11002_v2 }
 0xa16   :  { %v2893_v43 = vcombine.low %v2869_v21, %v2885_v22  ;;  %v2894_v46 = vcombine.high %v2869_v21, %v2885_v22 }
 0xa18   :  { %10129 = vmatmul.mubr.msk.f32.vlgmr.msra.gmra.mxu1 %vm1229_vm1, %v2893_v43  ;;  %10136 = vmatmul.mubr.msk.f32.vlgmr.msra.gmra.mxu0 %vm1229_vm1, %v2894_v46 }
 0xa19   :  { %10139 = vmatpush3.xpose.msk.msra.mxu1 %vm1229_vm1, %v11422_v18  ;;  %10146 = vmatpush3.xpose.msk.msra.mxu0 %vm1229_vm1, %v11424_v55  ;;  %v2895_v18 = vcombine.low %v2876_v35, %v2892_v51  ;;  %v2896_v55 = vcombine.high %v2876_v35, %v2892_v51 }
 0xa1a   :  { %10140 = vmatprep.subr.msk.mxu1 %vm1229_vm1, %v11428_v54  ;;  %10142 = vmatprep.mubr.msk.f32.mxu1 %vm1229_vm1, %v2827_v31 }
 0xa1b   :  { %10147 = vmatprep.subr.msk.mxu0 %vm1229_vm1, %v11430_v33  ;;  %10149 = vmatprep.mubr.msk.f32.mxu0 %vm1229_vm1, %v2828_v32 }
 0xa1d   :  { %10141 = vmatpush3.xpose.msk.msra.mxu1 %vm1229_vm1, %v11428_v54  ;;  %10148 = vmatpush3.xpose.msk.msra.mxu0 %vm1229_vm1, %v11430_v33 }
 0xa20   :  { %10143 = vmatmul.mubr.msk.f32.vlgmr.msra.gmra.mxu1 %vm1229_vm1, %v2895_v18  ;;  %10150 = vmatmul.mubr.msk.f32.vlgmr.msra.gmra.mxu0 %vm1229_vm1, %v2896_v55 }
 0xad8   :  { %v10130_v48 = vpop.f32.mrf.mxu1  ;;  %v10137_v49 = vpop.f32.mrf.mxu0 }
 0xad9   :  { %v3840_v54 = vsel %vm3834_vm6, -3.4028235e+38, %v10130_v48  ;;  %v3842_v33 = vsel %vm3834_vm6, -3.4028235e+38, %v10137_v49 }
 0xada   :  { %v3563_v52 = vpop.f32.mrf.mxu1  ;;  %v3856_v53 = vsel %vm1592_vm3, %v3842_v33, -inf  ;;  %v3850_v19 = vsel %vm1592_vm3, %v3840_v54, -inf  ;;  %v3650_v39 = vpop.f32.mrf.mxu0 }
 0xadb   :  { %v3839_v20 = vsel %vm3833_vm7, -3.4028235e+38, %v3563_v52  ;;  %3857 = vmax.xlane.f32.xlu0 %v3856_v53  ;;  %3851 = vmax.xlane.f32.xlu1 %v3850_v19  ;;  %v3841_v57 = vsel %vm3833_vm7, -3.4028235e+38, %v3650_v39 }
 0xadc   :  { %v3847_v56 = vsel %vm1592_vm3, %v3839_v20, -inf  ;;  %v3853_v61 = vsel %vm1592_vm3, %v3841_v57, -inf }
 0xadf   :  { %3848 = vmax.xlane.f32.xlu0 %v3847_v56 }
 0xae0   :  { %v10151_v3 = vpop.f32.mrf.mxu0  ;;  %v10144_v58 = vpop.f32.mrf.mxu1 }
 0xae1   :  { %v3846_v0 = vsel %vm3834_vm6, -3.4028235e+38, %v10151_v3  ;;  %v3844_v16 = vsel %vm3834_vm6, -3.4028235e+38, %v10144_v58 }
 0xae2   :  { %v3737_v60 = vpop.f32.mrf.mxu1  ;;  %v3824_v5 = vpop.f32.mrf.mxu0  ;;  %v3868_v17 = vsel %vm1592_vm3, %v3846_v0, -inf  ;;  %v3862_v6 = vsel %vm1592_vm3, %v3844_v16, -inf }
 0xae3   :  { %v3843_v62 = vsel %vm3833_vm7, -3.4028235e+38, %v3737_v60  ;;  %v3845_v34 = vsel %vm3833_vm7, -3.4028235e+38, %v3824_v5  ;;  %3854 = vmax.xlane.f32.xlu0 %v3853_v61 }
 0xae4   :  { %v3865_v63 = vsel %vm1592_vm3, %v3845_v34, -inf  ;;  %v3859_v45 = vsel %vm1592_vm3, %v3843_v62, -inf }
 0xae5   :  { %3866 = vmax.xlane.f32.xlu1 %v3865_v63 }
 0xae7   :  { %3860 = vmax.xlane.f32.xlu0 %v3859_v45 }
 0xae9   :  { %3869 = vmax.xlane.f32.xlu1 %v3868_v17 }
 0xaeb   :  { %3863 = vmax.xlane.f32.xlu0 %v3862_v6 }
 0xafa   :  { %3195 = vrot.lane.b32.xlu1 %v11364_v25, %s10799_s0 }
 0xafe   :  { %3199 = vrot.lane.b32.xlu1 %v11358_v42, %s10799_s0 }
 0xb01   :  { %3191 = vrot.lane.b32.xlu0 %v11340_v1, %s10799_s0 }
 0xb02   :  { %3203 = vrot.lane.b32.xlu1 %v11360_v41, %s10799_s0 }
 0xb05   :  { %3189 = vrot.lane.b32.xlu0 %v11346_v4, %s10799_s0 }
 0xb06   :  { %3193 = vrot.lane.b32.xlu1 %v11362_v24, %s10799_s0 }
 0xb09   :  { %3197 = vrot.lane.b32.xlu0 %v11376_v38, %s10799_s0 }
 0xb0a   :  { %3201 = vrot.lane.b32.xlu1 %v11374_v28, %s10799_s0 }
 0xb64   :  { %v3858_v25 = vpop.xlane.xlu0 %3857  ;;  %v3852_v42 = vpop.xlane.xlu1 %3851 }
 0xb65   :  { %v3874_v7 = vsub.f32 %v3842_v33, %v3858_v25  ;;  %v3872_v8 = vsub.f32 %v3840_v54, %v3852_v42 }
 0xb67   :  { %v3881_v1 = vmul.f32 1.442695, %v3872_v8  ;;  %v3885_v9 = vmul.f32 1.442695, %v3874_v7 }
 0xb68   :  { %v3849_v10 = vpop.xlane.xlu0 %3848 }
 0xb69   :  { %v3871_v41 = vsub.f32 %v3839_v20, %v3849_v10  ;;  %10478 = vpow2.f32 %v3881_v1 }
 0xb6a   :  { %10480 = vpow2.f32 %v3885_v9 }
 0xb6b   :  { %v3879_v11 = vmul.f32 1.442695, %v3871_v41 }
 0xb6c   :  { %v3855_v4 = vpop.xlane.xlu0 %3854 }
 0xb6d   :  { %10482 = vpow2.f32 %v3879_v11  ;;  %v3873_v24 = vsub.f32 %v3841_v57, %v3855_v4 }
 0xb6e   :  { %v3867_v12 = vpop.xlane.xlu1 %3866 }
 0xb6f   :  { %v3883_v13 = vmul.f32 1.442695, %v3873_v24  ;;  %v3877_v38 = vsub.f32 %v3845_v34, %v3867_v12 }
 0xb70   :  { %v3861_v14 = vpop.xlane.xlu0 %3860 }
 0xb71   :  { %10484 = vpow2.f32 %v3883_v13  ;;  %v3891_v28 = vmul.f32 1.442695, %v3877_v38  ;;  %v3875_v15 = vsub.f32 %v3843_v62, %v3861_v14 }
 0xb72   :  { %v3870_v50 = vpop.xlane.xlu1 %3869 }
 0xb73   :  { %10486 = vpow2.f32 %v3891_v28  ;;  %v3887_v21 = vmul.f32 1.442695, %v3875_v15  ;;  %v3878_v22 = vsub.f32 %v3846_v0, %v3870_v50 }
 0xb74   :  { %v3864_v23 = vpop.xlane.xlu0 %3863 }
 0xb75   :  { %10488 = vpow2.f32 %v3887_v21  ;;  %v3893_v36 = vmul.f32 1.442695, %v3878_v22  ;;  %v3876_v26 = vsub.f32 %v3844_v16, %v3864_v23 }
 0xb76   :  { %v3196_v27 = vpop.permute.xlu1 %3195  ;;  %v11542_v43 = vpop.eup %10478 }
 0xb77   :  { %10490 = vpow2.f32 %v3893_v36  ;;  %v3889_v46 = vmul.f32 1.442695, %v3876_v26  ;;  %v3898_v31 = vsel %vm1592_vm3, %v11542_v43, 0.0  ;;  %v11546_v35 = vpop.eup %10480 }
 0xb78   :  { %v3192_v32 = vpop.permute.xlu0 %3191  ;;  %3899 = vadd.xlane.f32.xlu1 %v3898_v31  ;;  %v3904_v48 = vsel %vm1592_vm3, %v11546_v35, 0.0 }
 0xb79   :  { %10492 = vpow2.f32 %v3889_v46 }
 0xb7a   :  { %v11548_v51 = vpop.eup %10482  ;;  %v3200_v18 = vpop.permute.xlu1 %3199 }
 0xb7b   :  { %v3895_v55 = vsel %vm1592_vm3, %v11548_v51, 0.0  ;;  %v3281_v49 = vcombine.low %v3192_v32, %v3200_v18  ;;  %v3282_v54 = vcombine.high %v3192_v32, %v3200_v18 }
 0xb7c   :  { %3896 = vadd.xlane.f32.xlu0 %v3895_v55  ;;  %3905 = vadd.xlane.f32.xlu1 %v3904_v48  ;;  %v3190_v33 = vpop.permute.xlu0 %3189 }
 0xb7d   :  { %v3289_v57 = vrot.slane %v3281_v49, %v11000_v59  ;;  %v3296_v3 = vrot.slane %v3282_v54, %v11000_v59 }
 0xb7e   :  { %v11554_v52 = vpop.eup %10484  ;;  %v3204_v53 = vpop.permute.xlu1 %3203 }
 0xb7f   :  { %v3297_v19 = vcombine.low %v3196_v27, %v3204_v53  ;;  %v3298_v20 = vcombine.high %v3196_v27, %v3204_v53  ;;  %v3901_v39 = vsel %vm1592_vm3, %v11554_v52, 0.0 }
 0xb80   :  { %v11558_v56 = vpop.eup %10486  ;;  %3902 = vadd.xlane.f32.xlu0 %v3901_v39  ;;  %v3198_v16 = vpop.permute.xlu0 %3197 }
 0xb81   :  { %v3305_v58 = vrot.slane %v3297_v19, %v11000_v59  ;;  %v3312_v60 = vrot.slane %v3298_v20, %v11000_v59  ;;  %v3913_v61 = vsel %vm1592_vm3, %v11558_v56, 0.0  ;;  %v3213_v9 = vcombine.low %v3190_v33, %v3198_v16 }
 0xb82   :  { %v11564_v5 = vpop.eup %10488  ;;  %v3194_v62 = vpop.permute.xlu1 %3193  ;;  %3914 = vadd.xlane.f32.xlu1 %v3913_v61  ;;  %v3214_v10 = vcombine.high %v3190_v33, %v3198_v16 }
 0xb83   :  { %v3313_v34 = vcombine.low %v3289_v57, %v3305_v58  ;;  %v3314_v63 = vcombine.high %v3289_v57, %v3305_v58  ;;  %v3329_v0 = vcombine.low %v3296_v3, %v3312_v60  ;;  %v3330_v45 = vcombine.high %v3296_v3, %v3312_v60 }
 0xb84   :  { %v11568_v17 = vpop.eup %10490  ;;  %v3907_v6 = vsel %vm1592_vm3, %v11564_v5, 0.0  ;;  %v3221_v23 = vrot.slane %v3213_v9, %v11000_v59  ;;  %v3228_v36 = vrot.slane %v3214_v10, %v11000_v59 }
 0xb85   :  { %v3321_v25 = vrot.slane %v3313_v34, %v11002_v2  ;;  %v3328_v42 = vrot.slane %v3314_v63, %v11002_v2  ;;  %v3337_v7 = vrot.slane %v3329_v0, %v11002_v2  ;;  %v3344_v8 = vrot.slane %v3330_v45, %v11002_v2  ;;  %3908 = vadd.xlane.f32.xlu0 %v3907_v6 }
 0xb86   :  { %v11576_v1 = vpop.eup %10492  ;;  %v3916_v41 = vsel %vm1592_vm3, %v11568_v17, 0.0  ;;  %v3202_v11 = vpop.permute.xlu1 %3201 }
 0xb87   :  { %v3417_v4 = vcombine.low %v3321_v25, %v3328_v42  ;;  %v9636_v24 = vcombine.high %v3321_v25, %v3328_v42  ;;  %v3433_v12 = vcombine.low %v3337_v7, %v3344_v8  ;;  %v9637_v13 = vcombine.high %v3337_v7, %v3344_v8  ;;  %3917 = vadd.xlane.f32.xlu1 %v3916_v41 }
 0xb88   :  { %v3229_v38 = vcombine.low %v3194_v62, %v3202_v11  ;;  %v3230_v14 = vcombine.high %v3194_v62, %v3202_v11  ;;  %v3910_v28 = vsel %vm1592_vm3, %v11576_v1, 0.0 }
 0xb89   :  { %3911 = vadd.xlane.f32.xlu0 %v3910_v28  ;;  %v3424_v15 = vrot.slane %v3417_v4, %v11000_v59  ;;  %v3432_v50 = vrot.slane %v9636_v24, %v11000_v59  ;;  %v3440_v21 = vrot.slane %v3433_v12, %v11000_v59  ;;  %v3448_v22 = vrot.slane %v9637_v13, %v11000_v59 }
 0xb8a   :  { %v3237_v26 = vrot.slane %v3229_v38, %v11000_v59  ;;  %v3244_v27 = vrot.slane %v3230_v14, %v11000_v59 }
 0xb8b   :  { %v3449_v46 = vcombine.low %v3424_v15, %v3432_v50  ;;  %v3465_v31 = vcombine.low %v3440_v21, %v3448_v22  ;;  %v3450_v32 = vcombine.high %v3424_v15, %v3432_v50  ;;  %v3466_v18 = vcombine.high %v3440_v21, %v3448_v22 }
 0xb8c   :  { %v3245_v55 = vcombine.low %v3221_v23, %v3237_v26  ;;  %v3246_v48 = vcombine.high %v3221_v23, %v3237_v26  ;;  %v3261_v49 = vcombine.low %v3228_v36, %v3244_v27  ;;  %v3262_v54 = vcombine.high %v3228_v36, %v3244_v27 }
 0xb8d   :  { %v3457_v33 = vrot.slane %v3449_v46, %v11002_v2  ;;  %v3473_v53 = vrot.slane %v3465_v31, %v11002_v2  ;;  %v3464_v19 = vrot.slane %v3450_v32, %v11002_v2  ;;  %v3480_v20 = vrot.slane %v3466_v18, %v11002_v2 }
 0xb8e   :  { %v3253_v39 = vrot.slane %v3245_v55, %v11002_v2  ;;  %v3260_v57 = vrot.slane %v3246_v48, %v11002_v2  ;;  %v3269_v3 = vrot.slane %v3261_v49, %v11002_v2  ;;  %v3276_v58 = vrot.slane %v3262_v54, %v11002_v2 }
 0xb8f   :  { %v3481_v60 = vcombine.low %v3457_v33, %v3473_v53  ;;  %v3483_v61 = vcombine.low %v3464_v19, %v3480_v20  ;;  %v11598_v62 = vcombine.high %v3464_v19, %v3480_v20  ;;  %v3482_v28 = vcombine.high %v3457_v33, %v3473_v53 }
 0xb90   :  { %v3349_v34 = vcombine.low %v3253_v39, %v3260_v57  ;;  %v9634_v63 = vcombine.high %v3253_v39, %v3260_v57  ;;  %v3365_v0 = vcombine.low %v3269_v3, %v3276_v58  ;;  %v9635_v45 = vcombine.high %v3269_v3, %v3276_v58 }
 0xb91   :  { %10152 = vmatprep.subr.mxu1 %v3481_v60  ;;  %10166 = vmatprep.subr.mxu0 %v3483_v61 }
 0xb92   :  { %10153 = vmatpush3.msra.mxu1 %v3481_v60  ;;  %10167 = vmatpush3.msra.mxu0 %v3483_v61  ;;  %v3356_v16 = vrot.slane %v3349_v34, %v11000_v59  ;;  %v3364_v6 = vrot.slane %v9634_v63, %v11000_v59  ;;  %v3372_v25 = vrot.slane %v3365_v0, %v11000_v59 }
 0xb93   :  { %v3380_v42 = vrot.slane %v9635_v45, %v11000_v59 }
 0xb94   :  { %v3381_v7 = vcombine.low %v3356_v16, %v3364_v6  ;;  %v3382_v8 = vcombine.high %v3356_v16, %v3364_v6 }
 0xb95   :  { %v3397_v9 = vcombine.low %v3372_v25, %v3380_v42  ;;  %v3398_v10 = vcombine.high %v3372_v25, %v3380_v42 }
 0xb96   :  { %v3389_v41 = vrot.slane %v3381_v7, %v11002_v2  ;;  %v3396_v11 = vrot.slane %v3382_v8, %v11002_v2 }
 0xb97   :  { %v3405_v4 = vrot.slane %v3397_v9, %v11002_v2  ;;  %v3412_v24 = vrot.slane %v3398_v10, %v11002_v2 }
 0xb99   :  { %v3413_v12 = vcombine.low %v3389_v41, %v3405_v4  ;;  %v3415_v13 = vcombine.low %v3396_v11, %v3412_v24  ;;  %v3414_v38 = vcombine.high %v3389_v41, %v3405_v4  ;;  %v3416_v14 = vcombine.high %v3396_v11, %v3412_v24 }
 0xb9b   :  { %10154 = vmatprep.subr.mxu1 %v3413_v12  ;;  %10168 = vmatprep.subr.mxu0 %v3415_v13 }
 0xb9c   :  { %10155 = vmatpush3.msra.mxu1 %v3413_v12  ;;  %10169 = vmatpush3.msra.mxu0 %v3415_v13 }
 0xb9d   :  { %10159 = vmatprep.subr.mxu1 %v3482_v28 }
 0xc01   :  { %v3900_v15 = vpop.xlane.xlu1 %3899 }
 0xc02   :  { %10494 = vrcp.f32 %v3900_v15 }
 0xc05   :  { %v3897_v50 = vpop.xlane.xlu0 %3896  ;;  %v3906_v21 = vpop.xlane.xlu1 %3905 }
 0xc06   :  { %10496 = vrcp.f32 %v3897_v50 }
 0xc07   :  { %10498 = vrcp.f32 %v3906_v21 }
 0xc09   :  { %v3903_v22 = vpop.xlane.xlu0 %3902 }
 0xc0a   :  { %10500 = vrcp.f32 %v3903_v22 }
 0xc0b   :  { %v3915_v23 = vpop.xlane.xlu1 %3914 }
 0xc0c   :  { %10502 = vrcp.f32 %v3915_v23 }
 0xc0e   :  { %v3909_v36 = vpop.xlane.xlu0 %3908 }
 0xc0f   :  { %10504 = vrcp.f32 %v3909_v36  ;;  %v10495_v27 = vpop.eup %10494 }
 0xc10   :  { %v3918_v26 = vpop.xlane.xlu1 %3917  ;;  %v3922_v18 = vmul.f32 %v10495_v27, %v11542_v43 }
 0xc11   :  { %10506 = vrcp.f32 %v3918_v26 }
 0xc12   :  { %v3912_v46 = vpop.xlane.xlu0 %3911 }
 0xc13   :  { %v10497_v31 = vpop.eup %10496  ;;  %10508 = vrcp.f32 %v3912_v46 }
 0xc14   :  { %v3920_v32 = vmul.f32 %v10497_v31, %v11548_v51  ;;  %v10499_v55 = vpop.eup %10498 }
 0xc15   :  { %v3926_v54 = vmul.f32 %v10499_v55, %v11546_v35 }
 0xc16   :  { %10156 = vmatprep.mubr.msk.f32.mxu1 %vm1592_vm3, %v3920_v32 }
 0xc17   :  { %v10501_v48 = vpop.eup %10500  ;;  %10157 = vmatmul.mubr.msk.f32.vlgmr.msra.gmra.mxu1 %vm1592_vm3, %v3922_v18 }
 0xc18   :  { %10160 = vmatpush3.msra.mxu1 %v3482_v28  ;;  %v3924_v49 = vmul.f32 %v10501_v48, %v11554_v52 }
 0xc19   :  { %10161 = vmatprep.subr.mxu1 %v3414_v38  ;;  %v10503_v33 = vpop.eup %10502 }
 0xc1a   :  { %10162 = vmatpush3.msra.mxu1 %v3414_v38  ;;  %10163 = vmatprep.mubr.msk.f32.mxu1 %vm1592_vm3, %v3924_v49  ;;  %v3932_v43 = vmul.f32 %v10503_v33, %v11558_v56  ;;  %v178_v33 = vld [vmem:[#allocation11 + $0x18] sm:$0xff] }
 0xc1b   :  { %10173 = vmatprep.subr.mxu1 %v11598_v62  ;;  %10164 = vmatmul.mubr.msk.f32.vlgmr.msra.gmra.mxu1 %vm1592_vm3, %v3926_v54 }
 0xc1c   :  { %v10505_v51 = vpop.eup %10504  ;;  %10174 = vmatpush3.msra.mxu1 %v11598_v62  ;;  %10177 = vmatprep.mubr.msk.f32.mxu1 %vm1592_vm3, %v3932_v43 }
 0xc1d   :  { %10175 = vmatprep.subr.mxu1 %v3416_v14  ;;  %v3928_v52 = vmul.f32 %v10505_v51, %v11564_v5  ;;  %10180 = vmatprep.subr.mxu0 %v178_v33 }
 0xc1e   :  { %v10507_v53 = vpop.eup %10506  ;;  %10176 = vmatpush3.msra.mxu1 %v3416_v14 }
 0xc1f   :  { %10170 = vmatprep.mubr.msk.f32.mxu0 %vm1592_vm3, %v3928_v52  ;;  %v3934_v35 = vmul.f32 %v10507_v53, %v11568_v17 }
 0xc20   :  { %v10509_v19 = vpop.eup %10508 }
 0xc21   :  { %10178 = vmatmul.mubr.msk.f32.vlgmr.msra.gmra.mxu1 %vm1592_vm3, %v3934_v35  ;;  %v3930_v20 = vmul.f32 %v10509_v19, %v11576_v1  ;;  %v177_v35 = vld [vmem:[#allocation11 + $0x10] sm:$0xff] }
 0xc23   :  { %10171 = vmatmul.mubr.msk.f32.vlgmr.msra.gmra.mxu0 %vm1592_vm3, %v3930_v20 }
 0xc24   :  { %10181 = vmatpush3.msra.mxu0 %v178_v33 }
 0xc25   :  { %10182 = vmatprep.subr.mxu0 %v177_v35 }
 0xc26   :  { %10183 = vmatpush3.msra.mxu0 %v177_v35 }
 0xcd7   :  { %v10158_v56 = vpop.f32.mrf.mxu1 }
 0xcd9   :  { %v4007_v39 = vpop.f32.mrf.mxu1 }
 0xcdb   :  { %v10165_v57 = vpop.f32.mrf.mxu1 }
 0xcdd   :  { %v4088_v3 = vpop.f32.mrf.mxu1 }
 0xce1   :  { %v10179_v58 = vpop.f32.mrf.mxu1 }
 0xce2   :  { %v4343_v60 = vcombine.low %v10165_v57, %v10179_v58  ;;  %v4344_v5 = vcombine.high %v10165_v57, %v10179_v58 }
 0xce3   :  { %v4250_v61 = vpop.f32.mrf.mxu1  ;;  %v10172_v62 = vpop.f32.mrf.mxu0 }
 0xce4   :  { %v4275_v34 = vcombine.low %v4088_v3, %v4250_v61  ;;  %v4276_v63 = vcombine.high %v4088_v3, %v4250_v61  ;;  %v4327_v0 = vcombine.low %v10158_v56, %v10172_v62  ;;  %v4328_v17 = vcombine.high %v10158_v56, %v10172_v62 }
 0xce5   :  { %v4169_v45 = vpop.f32.mrf.mxu0  ;;  %v4351_v1 = vrot.slane %v4343_v60, %v11000_v59  ;;  %v4358_v25 = vrot.slane %v4344_v5, %v11000_v59 }
 0xce6   :  { %v4259_v16 = vcombine.low %v4007_v39, %v4169_v45  ;;  %v4260_v6 = vcombine.high %v4007_v39, %v4169_v45  ;;  %v4335_v42 = vrot.slane %v4327_v0, %v11000_v59  ;;  %v4342_v7 = vrot.slane %v4328_v17, %v11000_v59  ;;  %v175_v45 = vld [vmem:[#allocation11] sm:$0xff] }
 0xce7   :  { %v4283_v8 = vrot.slane %v4275_v34, %v11000_v59  ;;  %v4290_v9 = vrot.slane %v4276_v63, %v11000_v59  ;;  %v176_v63 = vld [vmem:[#allocation11 + $0x8] sm:$0xff] }
 0xce8   :  { %v4267_v10 = vrot.slane %v4259_v16, %v11000_v59  ;;  %v4274_v41 = vrot.slane %v4260_v6, %v11000_v59  ;;  %v4359_v11 = vcombine.low %v4335_v42, %v4351_v1  ;;  %v4360_v4 = vcombine.high %v4335_v42, %v4351_v1  ;;  %10184 = vmatprep.subr.mxu0 %v176_v63 }
 0xce9   :  { %v4375_v24 = vcombine.low %v4342_v7, %v4358_v25  ;;  %v4376_v12 = vcombine.high %v4342_v7, %v4358_v25  ;;  %10185 = vmatpush3.msra.mxu0 %v176_v63 }
 0xcea   :  { %v4291_v13 = vcombine.low %v4267_v10, %v4283_v8  ;;  %v4292_v38 = vcombine.high %v4267_v10, %v4283_v8  ;;  %v4307_v14 = vcombine.low %v4274_v41, %v4290_v9  ;;  %v4308_v28 = vcombine.high %v4274_v41, %v4290_v9  ;;  %10186 = vmatprep.subr.mxu0 %v175_v45 }
 0xceb   :  { %v4367_v15 = vrot.slane %v4359_v11, %v11002_v2  ;;  %v4374_v50 = vrot.slane %v4360_v4, %v11002_v2  ;;  %v4383_v21 = vrot.slane %v4375_v24, %v11002_v2  ;;  %v4390_v22 = vrot.slane %v4376_v12, %v11002_v2  ;;  %10187 = vmatpush3.msra.mxu0 %v175_v45 }
 0xcec   :  { %v4299_v23 = vrot.slane %v4291_v13, %v11002_v2  ;;  %v4306_v36 = vrot.slane %v4292_v38, %v11002_v2  ;;  %v4315_v26 = vrot.slane %v4307_v14, %v11002_v2  ;;  %v4322_v27 = vrot.slane %v4308_v28, %v11002_v2 }
 0xced   :  { %v4463_v46 = vcombine.low %v4367_v15, %v4374_v50  ;;  %v9664_v31 = vcombine.high %v4367_v15, %v4374_v50  ;;  %v4479_v32 = vcombine.low %v4383_v21, %v4390_v22  ;;  %v9665_v18 = vcombine.high %v4383_v21, %v4390_v22 }
 0xcee   :  { %v4395_v55 = vcombine.low %v4299_v23, %v4306_v36  ;;  %v9662_v48 = vcombine.high %v4299_v23, %v4306_v36  ;;  %v4411_v49 = vcombine.low %v4315_v26, %v4322_v27  ;;  %v9663_v54 = vcombine.high %v4315_v26, %v4322_v27 }
 0xcef   :  { %v4470_v43 = vrot.slane %v4463_v46, %v11000_v59  ;;  %v4478_v51 = vrot.slane %v9664_v31, %v11000_v59  ;;  %v4486_v52 = vrot.slane %v4479_v32, %v11000_v59  ;;  %v4494_v53 = vrot.slane %v9665_v18, %v11000_v59  ;;  %v9666_v46 = vld [vmem:[#allocation14 + $0x4] ss:$0 sm:$0xff] }
 0xcf0   :  { %v4402_v19 = vrot.slane %v4395_v55, %v11000_v59  ;;  %v4410_v20 = vrot.slane %v9662_v48, %v11000_v59  ;;  %v4418_v56 = vrot.slane %v4411_v49, %v11000_v59  ;;  %v4426_v39 = vrot.slane %v9663_v54, %v11000_v59 }
 0xcf1   :  { %v4495_v57 = vcombine.low %v4470_v43, %v4478_v51  ;;  %v4496_v3 = vcombine.high %v4470_v43, %v4478_v51  ;;  %v4511_v58 = vcombine.low %v4486_v52, %v4494_v53  ;;  %v4512_v60 = vcombine.high %v4486_v52, %v4494_v53 }
 0xcf2   :  { %v4427_v5 = vcombine.low %v4402_v19, %v4410_v20  ;;  %v4443_v61 = vcombine.low %v4418_v56, %v4426_v39  ;;  %v4428_v62 = vcombine.high %v4402_v19, %v4410_v20  ;;  %v4444_v34 = vcombine.high %v4418_v56, %v4426_v39  ;;  %v182_v39 = vld [vmem:[#allocation13 + $0x18] sm:$0xff] }
 0xcf3   :  { %v4503_v0 = vrot.slane %v4495_v57, %v11002_v2  ;;  %v4519_v17 = vrot.slane %v4511_v58, %v11002_v2  ;;  %v4510_v42 = vrot.slane %v4496_v3, %v11002_v2  ;;  %v4526_v7 = vrot.slane %v4512_v60, %v11002_v2  ;;  %v181_v57 = vld [vmem:[#allocation13 + $0x10] sm:$0xff]  ;;  %10191 = vmatprep.subr.mxu1 %v182_v39  ;;  %v180_v3 = vld [vmem:[#allocation13 + $0x8] sm:$0xff]  ;;  %v179_v58 = vld [vmem:[#allocation13] sm:$0xff] }
 0xcf4   :  { %v4435_v16 = vrot.slane %v4427_v5, %v11002_v2  ;;  %v4451_v6 = vrot.slane %v4443_v61, %v11002_v2  ;;  %v4442_v10 = vrot.slane %v4428_v62, %v11002_v2  ;;  %v4458_v41 = vrot.slane %v4444_v34, %v11002_v2  ;;  %10192 = vmatpush3.msra.mxu1 %v182_v39  ;;  %v190_v60 = vld [vmem:[%s12525_s10 + $0x38] sm:$0xff]  ;;  %v189_v5 = vld [vmem:[%s12525_s10 + $0x30] sm:$0xff]  ;;  %v188_v61 = vld [vmem:[%s12525_s10 + $0x28] sm:$0xff] }
 0xcf5   :  { %v4528_v1 = vcombine.high %v4503_v0, %v4519_v17  ;;  %v4527_v25 = vcombine.low %v4503_v0, %v4519_v17  ;;  %v4529_v11 = vcombine.low %v4510_v42, %v4526_v7  ;;  %v4530_v24 = vcombine.high %v4510_v42, %v4526_v7  ;;  %10193 = vmatprep.subr.mxu1 %v181_v57  ;;  %v187_v62 = vld [vmem:[%s12525_s10 + $0x20] sm:$0xff]  ;;  %v9670_v42 = vld [vmem:[#allocation14 + $0xc] ss:$0 sm:$0xff] }
 0xcf6   :  { %v4460_v8 = vcombine.high %v4435_v16, %v4451_v6  ;;  %v4459_v9 = vcombine.low %v4435_v16, %v4451_v6  ;;  %v4461_v4 = vcombine.low %v4442_v10, %v4458_v41  ;;  %v4462_v12 = vcombine.high %v4442_v10, %v4458_v41  ;;  %10194 = vmatpush3.msra.mxu1 %v181_v57 }
 0xcf7   :  { %4535 = vrot.lane.b32.xlu1 %v4528_v1, %s10789_s27  ;;  %10195 = vmatprep.subr.mxu1 %v180_v3  ;;  %v9669_v1 = vld [vmem:[#allocation14 + $0xb] ss:$0 sm:$0xff] }
 0xcf8   :  { %4533 = vrot.lane.b32.xlu0 %v4460_v8, %s10789_s27  ;;  %10196 = vmatpush3.msra.mxu1 %v180_v3 }
 0xcf9   :  { %10197 = vmatprep.subr.mxu1 %v179_v58  ;;  %10202 = vmatprep.subr.mxu0 %v190_v60 }
 0xcfa   :  { %10198 = vmatpush3.msra.mxu1 %v179_v58 }
 0xcfb   :  { %4543 = vrot.lane.b32.xlu1 %v4529_v11, %s10803_s7 }
 0xcfc   :  { %4541 = vrot.lane.b32.xlu0 %v4461_v4, %s10803_s7  ;;  %v186_v4 = vld [vmem:[%s12525_s10 + $0x18] sm:$0xff] }
 0xcff   :  { %4551 = vrot.lane.b32.xlu1 %v4530_v24, %s10804_s20  ;;  %v185_v24 = vld [vmem:[%s12525_s10 + $0x10] sm:$0xff] }
 0xd00   :  { %4549 = vrot.lane.b32.xlu0 %v4462_v12, %s10804_s20  ;;  %v184_v12 = vld [vmem:[%s12525_s10 + $0x8] sm:$0xff] }
 0xd69   :  { %v4536_v13 = vpop.permute.xlu1 %4535 }
 0xd6a   :  { %v4534_v38 = vpop.permute.xlu0 %4533  ;;  %v4556_v21 = vsel %vm1229_vm1, %v4527_v25, %v4536_v13  ;;  %v183_v13 = vld [vmem:[%s12525_s10] sm:$0xff] }
 0xd6b   :  { %v4555_v15 = vsel %vm1229_vm1, %v4459_v9, %v4534_v38  ;;  %v9671_v38 = vld [vmem:[#allocation14 + $0x5] ss:$0 sm:$0xff] }
 0xd6d   :  { %v4544_v14 = vpop.permute.xlu1 %4543 }
 0xd6e   :  { %v4542_v28 = vpop.permute.xlu0 %4541  ;;  %v4558_v36 = vsel %vm1592_vm3, %v4556_v21, %v4544_v14 }
 0xd6f   :  { %v4557_v22 = vsel %vm1592_vm3, %v4555_v15, %v4542_v28 }
 0xd71   :  { %v4552_v50 = vpop.permute.xlu1 %4551 }
 0xd72   :  { %v4550_v23 = vpop.permute.xlu0 %4549  ;;  %v4560_v27 = vsel %vm2305_vm5, %v4558_v36, %v4552_v50 }
 0xd73   :  { %v4559_v26 = vsel %vm2305_vm5, %v4557_v22, %v4550_v23  ;;  %v9674_v23 = vld [vmem:[#allocation14 + $0x6] ss:$0 sm:$0xff] }
 0xd74   :  { %10188 = vmatprep.mubr.msk.f32.mxu0 %vm204_vm0, %v4559_v26 }
 0xd75   :  { %10189 = vmatmul.mubr.msk.f32.vlgmr.msra.gmra.mxu0 %vm204_vm0, %v4560_v27 }
 0xd76   :  { %10203 = vmatpush3.msra.mxu0 %v190_v60 }
 0xd77   :  { %10204 = vmatprep.subr.mxu0 %v189_v5 }
 0xd78   :  { %10205 = vmatpush3.msra.mxu0 %v189_v5 }
 0xd79   :  { %10206 = vmatprep.subr.mxu0 %v188_v61 }
 0xd7a   :  { %10207 = vmatpush3.msra.mxu0 %v188_v61 }
 0xd7b   :  { %10208 = vmatprep.subr.mxu0 %v187_v62 }
 0xd7c   :  { %10209 = vmatpush3.msra.mxu0 %v187_v62  ;;  %v9697_v62 = vld [vmem:[#allocation14 + $0x17] ss:$0 sm:$0xff] }
 0xd7d   :  { %10210 = vmatprep.subr.mxu0 %v186_v4 }
 0xd7e   :  { %10211 = vmatpush3.msra.mxu0 %v186_v4 }
 0xd7f   :  { %10212 = vmatprep.subr.mxu0 %v185_v24 }
 0xd80   :  { %10213 = vmatpush3.msra.mxu0 %v185_v24 }
 0xd81   :  { %10214 = vmatprep.subr.mxu0 %v184_v12 }
 0xd82   :  { %10215 = vmatpush3.msra.mxu0 %v184_v12 }
 0xd83   :  { %10216 = vmatprep.subr.mxu0 %v183_v13 }
 0xd84   :  { %10217 = vmatpush3.msra.mxu0 %v183_v13 }
 0xe35   :  { %v10190_v31 = vpop.f32.mrf.mxu0 }
 0xe36   :  { %v4643_v32 = vadd.f32 %v10190_v31, %v9666_v46 }
 0xe37   :  { %v4637_v18 = vpop.f32.mrf.mxu0 }
 0xe38   :  { %v11673_v55 = vadd.f32 %v4643_v32, %v11314_v44  ;;  %v4638_v48 = vadd.f32 %v9666_v46, %v4637_v18 }
 0xe3a   :  { %v11676_v49 = vadd.f32 %v4638_v48, %v11316_v37  ;;  %v4651_v54 = vsel %vm204_vm0, %v11673_v55, 0.0 }
 0xe3b   :  { %4652 = vadd.xlane.f32.xlu1 %v4651_v54 }
 0xe3c   :  { %v4648_v33 = vsel %vm204_vm0, %v11676_v49, 0.0 }
 0xe3d   :  { %4649 = vadd.xlane.f32.xlu0 %v4648_v33 }
 0xec4   :  { %v4653_v43 = vpop.xlane.xlu1 %4652 }
 0xec5   :  { %v4655_v51 = vmul.f32 0.03125, %v4653_v43 }
 0xec6   :  { %v4650_v52 = vpop.xlane.xlu0 %4649 }
 0xec7   :  { %v4654_v53 = vmul.f32 0.03125, %v4650_v52  ;;  %v4657_v35 = vsub.f32 %v11673_v55, %v4655_v51 }
 0xec9   :  { %v4656_v44 = vsub.f32 %v11676_v49, %v4654_v53  ;;  %v4659_v20 = vmul.f32 %v4657_v35, %v4657_v35 }
 0xecb   :  { %v4658_v19 = vmul.f32 %v4656_v44, %v4656_v44  ;;  %v4663_v56 = vsel %vm204_vm0, %v4659_v20, 0.0  ;;  %v9678_v20 = vld [vmem:[%s12519_s4 + $0x28] sm:$0xff] }
 0xecd   :  { %v4660_v37 = vsel %vm204_vm0, %v4658_v19, 0.0  ;;  %v9680_v19 = vld [vmem:[%s12519_s4 + $0x38] sm:$0xff] }
 0xece   :  { %4661 = vadd.xlane.f32.xlu0 %v4660_v37  ;;  %v9679_v37 = vld [vmem:[%s12519_s4 + $0x30] sm:$0xff]  ;;  %10221 = vmatprep.subr.mxu1 %v9680_v19 }
 0xed2   :  { %4664 = vadd.xlane.f32.xlu0 %v4663_v56  ;;  %v9677_v56 = vld [vmem:[%s12519_s4 + $0x20] sm:$0xff] }
 0xf57   :  { %v4662_v34 = vpop.xlane.xlu0 %4661 }
 0xf58   :  { %v4666_v63 = vmul.f32 0.03125, %v4662_v34 }
 0xf5a   :  { %v4668_v0 = vadd.f32 1e-05, %v4666_v63 }
 0xf5b   :  { %v4665_v17 = vpop.xlane.xlu0 %4664 }
 0xf5c   :  { %10510 = vrsqrt.f32 %v4668_v0  ;;  %v4667_v45 = vmul.f32 0.03125, %v4665_v17 }
 0xf5e   :  { %v4669_v16 = vadd.f32 1e-05, %v4667_v45  ;;  %v9698_v45 = vld [vmem:[#allocation14 + $0x18] ss:$0 sm:$0xff] }
 0xf60   :  { %10512 = vrsqrt.f32 %v4669_v16 }
 0xf69   :  { %v10511_v6 = vpop.eup %10510 }
 0xf6a   :  { %v4672_v25 = vmul.f32 %v10511_v6, %v4656_v44 }
 0xf6c   :  { %v4678_v7 = vmul.f32 %v9669_v1, %v4672_v25  ;;  %v9699_v25 = vld [vmem:[#allocation14 + $0x10] ss:$0 sm:$0xff] }
 0xf6d   :  { %v10513_v8 = vpop.eup %10512 }
 0xf6e   :  { %v4673_v9 = vmul.f32 %v10513_v8, %v4657_v35  ;;  %v4684_v10 = vadd.f32 %v9670_v42, %v4678_v7 }
 0xf70   :  { %v4679_v41 = vmul.f32 %v9669_v1, %v4673_v9  ;;  %10199 = vmatprep.mubr.msk.f32.mxu1 %vm204_vm0, %v4684_v10 }
 0xf72   :  { %v4685_v11 = vadd.f32 %v9670_v42, %v4679_v41 }
 0xf74   :  { %10200 = vmatmul.mubr.msk.f32.vlgmr.msra.gmra.mxu1 %vm204_vm0, %v4685_v11 }
 0xf75   :  { %10222 = vmatpush3.msra.mxu1 %v9680_v19 }
 0xf76   :  { %10223 = vmatprep.subr.mxu1 %v9679_v37 }
 0xf77   :  { %10224 = vmatpush3.msra.mxu1 %v9679_v37 }
 0xf78   :  { %10225 = vmatprep.subr.mxu1 %v9678_v20 }
 0xf79   :  { %10226 = vmatpush3.msra.mxu1 %v9678_v20 }
 0xf7a   :  { %10227 = vmatprep.subr.mxu1 %v9677_v56 }
 0xf7b   :  { %10228 = vmatpush3.msra.mxu1 %v9677_v56 }
0x1034   :  { %v10201_v14 = vpop.f32.mrf.mxu1 }
0x1035   :  { %v4768_v28 = vadd.f32 %v10201_v14, %v9671_v38 }
0x1036   :  { %v4762_v15 = vpop.f32.mrf.mxu1 }
0x1037   :  { %v4763_v50 = vadd.f32 %v9671_v38, %v4762_v15  ;;  %v4772_v22 = vmax.f32 %v4768_v28, 0.0 }
0x1039   :  { %v4771_v21 = vmax.f32 %v4763_v50, 0.0 }
0x103b   :  { %10218 = vmatprep.mubr.msk.f32.mxu0 %vm4777_vm8, %v4771_v21 }
0x103c   :  { %10219 = vmatmul.mubr.msk.f32.vlgmr.msra.gmra.mxu0 %vm4777_vm8, %v4772_v22 }
0x10fc   :  { %v10220_v36 = vpop.f32.mrf.mxu0 }
0x10fd   :  { %v4856_v26 = vadd.f32 %v10220_v36, %v9674_v23 }
0x10fe   :  { %v4850_v27 = vpop.f32.mrf.mxu0 }
0x10ff   :  { %v11715_v46 = vadd.f32 %v4856_v26, %v11673_v55  ;;  %v4851_v31 = vadd.f32 %v9674_v23, %v4850_v27 }
0x1101   :  { %v11718_v32 = vadd.f32 %v4851_v31, %v11676_v49  ;;  %v4917_v18 = vsel %vm204_vm0, %v11715_v46, 0.0 }
0x1102   :  { %4918 = vadd.xlane.f32.xlu1 %v4917_v18 }
0x1103   :  { %v4914_v48 = vsel %vm204_vm0, %v11718_v32, 0.0 }
0x1104   :  { %4915 = vadd.xlane.f32.xlu0 %v4914_v48 }
0x118b   :  { %v4919_v54 = vpop.xlane.xlu1 %4918 }
0x118c   :  { %v4921_v33 = vmul.f32 0.03125, %v4919_v54 }
0x118d   :  { %v4916_v43 = vpop.xlane.xlu0 %4915 }
0x118e   :  { %v4923_v51 = vsub.f32 %v11715_v46, %v4921_v33  ;;  %v4920_v52 = vmul.f32 0.03125, %v4916_v43 }
0x1190   :  { %v4922_v55 = vsub.f32 %v11718_v32, %v4920_v52  ;;  %v4925_v53 = vmul.f32 %v4923_v51, %v4923_v51 }
0x1192   :  { %v4929_v49 = vsel %vm204_vm0, %v4925_v53, 0.0  ;;  %v4924_v35 = vmul.f32 %v4922_v55, %v4922_v55 }
0x1193   :  { %4930 = vadd.xlane.f32.xlu1 %v4929_v49 }
0x1194   :  { %v4926_v44 = vsel %vm204_vm0, %v4924_v35, 0.0 }
0x1195   :  { %4927 = vadd.xlane.f32.xlu0 %v4926_v44 }
0x121c   :  { %v4931_v39 = vpop.xlane.xlu1 %4930 }
0x121d   :  { %v4933_v57 = vmul.f32 0.03125, %v4931_v39 }
0x121e   :  { %v4928_v3 = vpop.xlane.xlu0 %4927 }
0x121f   :  { %v4935_v58 = vadd.f32 1e-05, %v4933_v57  ;;  %v4932_v60 = vmul.f32 0.03125, %v4928_v3 }
0x1221   :  { %10514 = vrsqrt.f32 %v4935_v58  ;;  %v4934_v5 = vadd.f32 1e-05, %v4932_v60 }
0x1223   :  { %10516 = vrsqrt.f32 %v4934_v5 }
0x122e   :  { %v10515_v61 = vpop.eup %10514 }
0x122f   :  { %v4939_v34 = vmul.f32 %v10515_v61, %v4923_v51 }
0x1230   :  { %v10517_v63 = vpop.eup %10516 }
0x1231   :  { %v4938_v0 = vmul.f32 %v10517_v63, %v4922_v55  ;;  %v4945_v17 = vmul.f32 %v9697_v62, %v4939_v34 }
0x1233   :  { %v4944_v16 = vmul.f32 %v9697_v62, %v4938_v0  ;;  %v4951_v1 = vadd.f32 %v9698_v45, %v4945_v17 }
0x1235   :  { %v4950_v6 = vadd.f32 %v9698_v45, %v4944_v16 }
0x1237   :  { %10229 = vmatprep.mubr.msk.f32.mxu1 %vm204_vm0, %v4950_v6 }
0x1238   :  { %10230 = vmatmul.mubr.msk.f32.vlgmr.msra.gmra.mxu1 %vm204_vm0, %v4951_v1 }
0x12f8   :  { %v10231_v42 = vpop.f32.mrf.mxu1 }
0x12f9   :  { %v11742_v7 = vadd.f32 %v10231_v42, %v9699_v25 }
0x12fa   :  { %v5028_v8 = vpop.f32.mrf.mxu1 }
0x12fb   :  { %5339 = vrot.lane.b32.xlu1 %v11742_v7, %s10796_s8  ;;  %5335 = vrot.lane.b32.xlu0 %v11742_v7, %s10797_s29  ;;  %v11748_v9 = vadd.f32 %v9699_v25, %v5028_v8  ;;  %v11763_v10 = vmul.f32 0.17677669, %v11742_v7 }
0x12fd   :  { %v5037_v41 = vmul.f32 0.17677669, %v11748_v9 }
0x12ff   :  { %5343 = vrot.lane.b32.xlu1 %v11742_v7, %s10798_s30  ;;  %5337 = vrot.lane.b32.xlu0 %v11748_v9, %s10796_s8 }
0x1303   :  { %5347 = vrot.lane.b32.xlu0 %v11742_v7, %s10799_s0  ;;  %5333 = vrot.lane.b32.xlu1 %v11748_v9, %s10797_s29 }
0x1307   :  { %5345 = vrot.lane.b32.xlu0 %v11748_v9, %s10799_s0  ;;  %5341 = vrot.lane.b32.xlu1 %v11748_v9, %s10798_s30 }
0x130b   :  { %5043 = vrot.lane.b32.xlu1 %v11763_v10, %s10797_s29  ;;  %5041 = vrot.lane.b32.xlu0 %v5037_v41, %s10797_s29 }
0x130f   :  { %5047 = vrot.lane.b32.xlu1 %v5037_v41, %s10796_s8  ;;  %5053 = vrot.lane.b32.xlu0 %v5037_v41, %s10798_s30 }
0x136d   :  { %v11771_v11 = vpop.permute.xlu1 %5339  ;;  %v11773_v4 = vpop.permute.xlu0 %5335 }
0x136e   :  { %5351 = vrot.lane.b32.xlu1 %v11773_v4, %s10799_s0  ;;  %5355 = vrot.lane.b32.xlu0 %v11771_v11, %s10799_s0 }
0x1371   :  { %v11779_v24 = vpop.permute.xlu1 %5343  ;;  %v11781_v12 = vpop.permute.xlu0 %5337 }
0x1372   :  { %5359 = vrot.lane.b32.xlu1 %v11779_v24, %s10799_s0  ;;  %5353 = vrot.lane.b32.xlu0 %v11781_v12, %s10799_s0 }
0x1375   :  { %v5348_v13 = vpop.permute.xlu0 %5347  ;;  %v11787_v38 = vpop.permute.xlu1 %5333 }
0x1376   :  { %5349 = vrot.lane.b32.xlu1 %v11787_v38, %s10799_s0  ;;  %5049 = vrot.lane.b32.xlu0 %v11763_v10, %s10796_s8 }
0x1379   :  { %v11793_v14 = vpop.permute.xlu0 %5345  ;;  %v11795_v28 = vpop.permute.xlu1 %5341 }
0x137a   :  { %5357 = vrot.lane.b32.xlu1 %v11795_v28, %s10799_s0 }
0x137d   :  { %v11799_v15 = vpop.permute.xlu1 %5043  ;;  %v5042_v50 = vpop.permute.xlu0 %5041 }
0x137e   :  { %5055 = vrot.lane.b32.xlu1 %v11763_v10, %s10798_s30 }
0x1381   :  { %v5048_v21 = vpop.permute.xlu1 %5047  ;;  %v5054_v22 = vpop.permute.xlu0 %5053 }
0x1382   :  { %v5059_v23 = vcombine.low %v5037_v41, %v5048_v21  ;;  %v5060_v36 = vcombine.high %v5037_v41, %v5048_v21  ;;  %v5075_v26 = vcombine.low %v5042_v50, %v5054_v22  ;;  %v5076_v27 = vcombine.high %v5042_v50, %v5054_v22 }
0x1384   :  { %v5067_v31 = vrot.slane %v5059_v23, %v11000_v59  ;;  %v5074_v18 = vrot.slane %v5060_v36, %v11000_v59  ;;  %v5083_v48 = vrot.slane %v5075_v26, %v11000_v59  ;;  %v5090_v54 = vrot.slane %v5076_v27, %v11000_v59 }
0x1386   :  { %v5091_v33 = vcombine.low %v5067_v31, %v5083_v48  ;;  %v5092_v43 = vcombine.high %v5067_v31, %v5083_v48  ;;  %v5107_v51 = vcombine.low %v5074_v18, %v5090_v54  ;;  %v5108_v52 = vcombine.high %v5074_v18, %v5090_v54 }
0x1388   :  { %v5099_v55 = vrot.slane %v5091_v33, %v11002_v2  ;;  %v5106_v53 = vrot.slane %v5092_v43, %v11002_v2  ;;  %v5115_v49 = vrot.slane %v5107_v51, %v11002_v2  ;;  %v5122_v35 = vrot.slane %v5108_v52, %v11002_v2 }
0x138a   :  { %v5195_v44 = vcombine.low %v5099_v55, %v5106_v53  ;;  %v9702_v19 = vcombine.high %v5099_v55, %v5106_v53  ;;  %v5211_v37 = vcombine.low %v5115_v49, %v5122_v35  ;;  %v9703_v20 = vcombine.high %v5115_v49, %v5122_v35 }
0x138c   :  { %v5202_v56 = vrot.slane %v5195_v44, %v11000_v59  ;;  %v5210_v39 = vrot.slane %v9702_v19, %v11000_v59  ;;  %v5218_v57 = vrot.slane %v5211_v37, %v11000_v59  ;;  %v5226_v3 = vrot.slane %v9703_v20, %v11000_v59 }
0x138e   :  { %v5227_v58 = vcombine.low %v5202_v56, %v5210_v39  ;;  %v5243_v60 = vcombine.low %v5218_v57, %v5226_v3  ;;  %v5228_v5 = vcombine.high %v5202_v56, %v5210_v39  ;;  %v5244_v61 = vcombine.high %v5218_v57, %v5226_v3 }
0x1390   :  { %v5235_v62 = vrot.slane %v5227_v58, %v11002_v2  ;;  %v5251_v34 = vrot.slane %v5243_v60, %v11002_v2  ;;  %v11818_v63 = vrot.slane %v5228_v5, %v11002_v2  ;;  %v11821_v0 = vrot.slane %v5244_v61, %v11002_v2 }
0x1392   :  { %v5259_v17 = vcombine.low %v5235_v62, %v5251_v34  ;;  %v5260_v45 = vcombine.high %v5235_v62, %v5251_v34  ;;  %v5261_v16 = vcombine.low %v11818_v63, %v11821_v0  ;;  %v5262_v6 = vcombine.high %v11818_v63, %v11821_v0 }
0x1394   :  { %10236 = vmatprep.mubr.msk.f32.mxu1 %vm1229_vm1, %v5259_v17  ;;  %10243 = vmatprep.mubr.msk.f32.mxu0 %vm1229_vm1, %v5260_v45 }
0x13e0   :  { %v5352_v1 = vpop.permute.xlu1 %5351  ;;  %v5356_v25 = vpop.permute.xlu0 %5355 }
0x13e1   :  { %v5437_v42 = vcombine.low %v5348_v13, %v5356_v25  ;;  %v5438_v8 = vcombine.high %v5348_v13, %v5356_v25 }
0x13e3   :  { %v5445_v23 = vrot.slane %v5437_v42, %v11000_v59  ;;  %v5452_v36 = vrot.slane %v5438_v8, %v11000_v59 }
0x13e4   :  { %v5360_v41 = vpop.permute.xlu1 %5359  ;;  %v5354_v50 = vpop.permute.xlu0 %5353 }
0x13e5   :  { %v5453_v21 = vcombine.low %v5352_v1, %v5360_v41  ;;  %v5454_v22 = vcombine.high %v5352_v1, %v5360_v41  ;;  %v5369_v13 = vcombine.low %v11793_v14, %v5354_v50  ;;  %v5370_v51 = vcombine.high %v11793_v14, %v5354_v50 }
0x13e7   :  { %v5461_v26 = vrot.slane %v5453_v21, %v11000_v59  ;;  %v5468_v27 = vrot.slane %v5454_v22, %v11000_v59  ;;  %v5377_v57 = vrot.slane %v5369_v13, %v11000_v59  ;;  %v5384_v14 = vrot.slane %v5370_v51, %v11000_v59 }
0x13e8   :  { %v5350_v31 = vpop.permute.xlu1 %5349  ;;  %v5050_v43 = vpop.permute.xlu0 %5049 }
0x13e9   :  { %v5469_v18 = vcombine.low %v5445_v23, %v5461_v26  ;;  %v5470_v48 = vcombine.high %v5445_v23, %v5461_v26  ;;  %v5485_v54 = vcombine.low %v5452_v36, %v5468_v27  ;;  %v5486_v33 = vcombine.high %v5452_v36, %v5468_v27 }
0x13ea   :  { %v5127_v35 = vcombine.low %v11763_v10, %v5050_v43  ;;  %v5128_v44 = vcombine.high %v11763_v10, %v5050_v43 }
0x13eb   :  { %v5477_v52 = vrot.slane %v5469_v18, %v11002_v2  ;;  %v5484_v55 = vrot.slane %v5470_v48, %v11002_v2  ;;  %v5493_v53 = vrot.slane %v5485_v54, %v11002_v2  ;;  %v5500_v49 = vrot.slane %v5486_v33, %v11002_v2 }
0x13ec   :  { %v5358_v19 = vpop.permute.xlu1 %5357  ;;  %v5135_v62 = vrot.slane %v5127_v35, %v11000_v59  ;;  %v5142_v34 = vrot.slane %v5128_v44, %v11000_v59 }
0x13ed   :  { %v5573_v37 = vcombine.low %v5477_v52, %v5484_v55  ;;  %v9708_v20 = vcombine.high %v5477_v52, %v5484_v55  ;;  %v5589_v56 = vcombine.low %v5493_v53, %v5500_v49  ;;  %v9709_v39 = vcombine.high %v5493_v53, %v5500_v49 }
0x13ee   :  { %v5385_v3 = vcombine.low %v5350_v31, %v5358_v19  ;;  %v5386_v58 = vcombine.high %v5350_v31, %v5358_v19 }
0x13ef   :  { %v11844_v60 = vrot.slane %v5573_v37, %v11000_v59  ;;  %v11847_v5 = vrot.slane %v9708_v20, %v11000_v59  ;;  %v11850_v61 = vrot.slane %v5589_v56, %v11000_v59  ;;  %v11853_v10 = vrot.slane %v9709_v39, %v11000_v59 }
0x13f0   :  { %v5393_v17 = vrot.slane %v5385_v3, %v11000_v59  ;;  %v5400_v45 = vrot.slane %v5386_v58, %v11000_v59  ;;  %v5056_v1 = vpop.permute.xlu1 %5055 }
0x13f1   :  { %v5143_v25 = vcombine.low %v11799_v15, %v5056_v1  ;;  %v5144_v42 = vcombine.high %v11799_v15, %v5056_v1  ;;  %v5605_v8 = vcombine.low %v11844_v60, %v11847_v5  ;;  %v5621_v41 = vcombine.low %v11850_v61, %v11853_v10 }
0x13f2   :  { %v5401_v50 = vcombine.low %v5377_v57, %v5393_v17  ;;  %v5402_v21 = vcombine.high %v5377_v57, %v5393_v17  ;;  %v5417_v22 = vcombine.low %v5384_v14, %v5400_v45  ;;  %v5418_v23 = vcombine.high %v5384_v14, %v5400_v45 }
0x13f3   :  { %v5151_v36 = vrot.slane %v5143_v25, %v11000_v59  ;;  %v5158_v26 = vrot.slane %v5144_v42, %v11000_v59  ;;  %v5613_v27 = vrot.slane %v5605_v8, %v11002_v2  ;;  %v5629_v31 = vrot.slane %v5621_v41, %v11002_v2 }
0x13f4   :  { %v5409_v15 = vrot.slane %v5401_v50, %v11002_v2  ;;  %v5416_v18 = vrot.slane %v5402_v21, %v11002_v2  ;;  %v5425_v48 = vrot.slane %v5417_v22, %v11002_v2  ;;  %v5432_v54 = vrot.slane %v5418_v23, %v11002_v2 }
0x13f5   :  { %v5159_v33 = vcombine.low %v5135_v62, %v5151_v36  ;;  %v5160_v43 = vcombine.high %v5135_v62, %v5151_v36  ;;  %v5175_v13 = vcombine.low %v5142_v34, %v5158_v26  ;;  %v5176_v51 = vcombine.high %v5142_v34, %v5158_v26 }
0x13f6   :  { %v5505_v52 = vcombine.low %v5409_v15, %v5416_v18  ;;  %v9706_v55 = vcombine.high %v5409_v15, %v5416_v18  ;;  %v5521_v53 = vcombine.low %v5425_v48, %v5432_v54  ;;  %v9707_v49 = vcombine.high %v5425_v48, %v5432_v54 }
0x13f7   :  { %v5167_v35 = vrot.slane %v5159_v33, %v11002_v2  ;;  %v5174_v44 = vrot.slane %v5160_v43, %v11002_v2  ;;  %v5183_v19 = vrot.slane %v5175_v13, %v11002_v2  ;;  %v5190_v37 = vrot.slane %v5176_v51, %v11002_v2 }
0x13f8   :  { %v5512_v20 = vrot.slane %v5505_v52, %v11000_v59  ;;  %v5520_v56 = vrot.slane %v9706_v55, %v11000_v59  ;;  %v5528_v39 = vrot.slane %v5521_v53, %v11000_v59  ;;  %v5536_v57 = vrot.slane %v9707_v49, %v11000_v59 }
0x13f9   :  { %v5263_v14 = vcombine.low %v5167_v35, %v5174_v44  ;;  %v9704_v3 = vcombine.high %v5167_v35, %v5174_v44  ;;  %v5279_v58 = vcombine.low %v5183_v19, %v5190_v37  ;;  %v9705_v62 = vcombine.high %v5183_v19, %v5190_v37 }
0x13fa   :  { %v5637_v34 = vcombine.low %v5613_v27, %v5629_v31  ;;  %v5638_v17 = vcombine.high %v5613_v27, %v5629_v31  ;;  %v5537_v45 = vcombine.low %v5512_v20, %v5520_v56  ;;  %v5553_v1 = vcombine.low %v5528_v39, %v5536_v57 }
0x13fb   :  { %v5270_v25 = vrot.slane %v5263_v14, %v11000_v59  ;;  %v5278_v42 = vrot.slane %v9704_v3, %v11000_v59  ;;  %v5286_v8 = vrot.slane %v5279_v58, %v11000_v59  ;;  %v5294_v41 = vrot.slane %v9705_v62, %v11000_v59 }
0x13fc   :  { %10232 = vmatprep.subr.msk.mxu1 %vm1229_vm1, %v5637_v34  ;;  %10239 = vmatprep.subr.msk.mxu0 %vm1229_vm1, %v5638_v17  ;;  %v5545_v50 = vrot.slane %v5537_v45, %v11002_v2  ;;  %v5561_v21 = vrot.slane %v5553_v1, %v11002_v2  ;;  %v5606_v22 = vcombine.high %v11844_v60, %v11847_v5 }
0x13fd   :  { %v5295_v23 = vcombine.low %v5270_v25, %v5278_v42  ;;  %v5311_v36 = vcombine.low %v5286_v8, %v5294_v41  ;;  %10233 = vmatpush3.xpose.msk.msra.mxu1 %vm1229_vm1, %v5637_v34  ;;  %10240 = vmatpush3.xpose.msk.msra.mxu0 %vm1229_vm1, %v5638_v17  ;;  %v5622_v15 = vcombine.high %v11850_v61, %v11853_v10 }
0x13fe   :  { %v5569_v26 = vcombine.low %v5545_v50, %v5561_v21  ;;  %v5570_v27 = vcombine.high %v5545_v50, %v5561_v21  ;;  %v5620_v31 = vrot.slane %v5606_v22, %v11002_v2  ;;  %v5538_v54 = vcombine.high %v5512_v20, %v5520_v56 }
0x13ff   :  { %v5303_v18 = vrot.slane %v5295_v23, %v11002_v2  ;;  %v5319_v48 = vrot.slane %v5311_v36, %v11002_v2  ;;  %v5554_v33 = vcombine.high %v5528_v39, %v5536_v57  ;;  %v5636_v60 = vrot.slane %v5622_v15, %v11002_v2 }
0x1400   :  { %10234 = vmatprep.subr.msk.mxu1 %vm1229_vm1, %v5569_v26  ;;  %10241 = vmatprep.subr.msk.mxu0 %vm1229_vm1, %v5570_v27  ;;  %v5552_v10 = vrot.slane %v5538_v54, %v11002_v2  ;;  %v5296_v52 = vcombine.high %v5270_v25, %v5278_v42  ;;  %v5312_v55 = vcombine.high %v5286_v8, %v5294_v41 }
0x1401   :  { %10235 = vmatpush3.xpose.msk.msra.mxu1 %vm1229_vm1, %v5569_v26  ;;  %v5327_v5 = vcombine.low %v5303_v18, %v5319_v48  ;;  %v5328_v43 = vcombine.high %v5303_v18, %v5319_v48  ;;  %10242 = vmatpush3.xpose.msk.msra.mxu0 %vm1229_vm1, %v5570_v27  ;;  %v5639_v13 = vcombine.low %v5620_v31, %v5636_v60 }
0x1402   :  { %v5640_v61 = vcombine.high %v5620_v31, %v5636_v60  ;;  %v5568_v51 = vrot.slane %v5554_v33, %v11002_v2  ;;  %v5310_v35 = vrot.slane %v5296_v52, %v11002_v2  ;;  %v5326_v44 = vrot.slane %v5312_v55, %v11002_v2 }
0x1403   :  { %10246 = vmatprep.subr.msk.mxu1 %vm1229_vm1, %v5639_v13 }
0x1404   :  { %10253 = vmatprep.subr.msk.mxu0 %vm1229_vm1, %v5640_v61  ;;  %10237 = vmatmul.mubr.msk.f32.vlgmr.msra.gmra.mxu1 %vm1229_vm1, %v5327_v5  ;;  %v5571_v53 = vcombine.low %v5552_v10, %v5568_v51  ;;  %v5572_v49 = vcombine.high %v5552_v10, %v5568_v51  ;;  %v5330_v19 = vcombine.high %v5310_v35, %v5326_v44 }
0x1405   :  { %10244 = vmatmul.mubr.msk.f32.vlgmr.msra.gmra.mxu0 %vm1229_vm1, %v5328_v43  ;;  %10247 = vmatpush3.xpose.msk.msra.mxu1 %vm1229_vm1, %v5639_v13 }
0x1406   :  { %10250 = vmatprep.mubr.msk.f32.mxu1 %vm1229_vm1, %v5261_v16  ;;  %10254 = vmatpush3.xpose.msk.msra.mxu0 %vm1229_vm1, %v5640_v61  ;;  %v5329_v16 = vcombine.low %v5310_v35, %v5326_v44 }
0x1407   :  { %10257 = vmatprep.mubr.msk.f32.mxu0 %vm1229_vm1, %v5262_v6  ;;  %10248 = vmatprep.subr.msk.mxu1 %vm1229_vm1, %v5571_v53 }
0x1408   :  { %10255 = vmatprep.subr.msk.mxu0 %vm1229_vm1, %v5572_v49 }
0x1409   :  { %10249 = vmatpush3.xpose.msk.msra.mxu1 %vm1229_vm1, %v5571_v53 }
0x140a   :  { %10256 = vmatpush3.xpose.msk.msra.mxu0 %vm1229_vm1, %v5572_v49 }
0x140c   :  { %10251 = vmatmul.mubr.msk.f32.vlgmr.msra.gmra.mxu1 %vm1229_vm1, %v5329_v16 }
0x140d   :  { %10258 = vmatmul.mubr.msk.f32.vlgmr.msra.gmra.mxu0 %vm1229_vm1, %v5330_v19 }
0x14c4   :  { %v10238_v63 = vpop.f32.mrf.mxu1 }
0x14c5   :  { %v10245_v0 = vpop.f32.mrf.mxu0  ;;  %v6286_v6 = vsel %vm1579_vm2, -3.4028235e+38, %v10238_v63 }
0x14c6   :  { %v6288_v37 = vsel %vm1579_vm2, -3.4028235e+38, %v10245_v0  ;;  %v6296_v20 = vsel %vm1592_vm3, %v6286_v6, -inf  ;;  %v6015_v39 = vpop.f32.mrf.mxu1 }
0x14c7   :  { %v6302_v56 = vsel %vm1592_vm3, %v6288_v37, -inf  ;;  %v6285_v57 = vsel %vm1578_vm4, -3.4028235e+38, %v6015_v39  ;;  %6297 = vmax.xlane.f32.xlu1 %v6296_v20  ;;  %v6102_v14 = vpop.f32.mrf.mxu0 }
0x14c8   :  { %6303 = vmax.xlane.f32.xlu0 %v6302_v56  ;;  %v6293_v3 = vsel %vm1592_vm3, %v6285_v57, -inf  ;;  %v6287_v58 = vsel %vm1578_vm4, -3.4028235e+38, %v6102_v14 }
0x14c9   :  { %v6299_v17 = vsel %vm1592_vm3, %v6287_v58, -inf }
0x14cc   :  { %6294 = vmax.xlane.f32.xlu0 %v6293_v3  ;;  %v10252_v62 = vpop.f32.mrf.mxu1 }
0x14cd   :  { %v10259_v34 = vpop.f32.mrf.mxu0  ;;  %v6290_v21 = vsel %vm1579_vm2, -3.4028235e+38, %v10252_v62 }
0x14ce   :  { %v6189_v45 = vpop.f32.mrf.mxu1  ;;  %v6292_v41 = vsel %vm1579_vm2, -3.4028235e+38, %v10259_v34  ;;  %v6308_v23 = vsel %vm1592_vm3, %v6290_v21, -inf }
0x14cf   :  { %v6289_v1 = vsel %vm1578_vm4, -3.4028235e+38, %v6189_v45  ;;  %v6276_v25 = vpop.f32.mrf.mxu0  ;;  %v6314_v22 = vsel %vm1592_vm3, %v6292_v41, -inf }
0x14d0   :  { %6300 = vmax.xlane.f32.xlu0 %v6299_v17  ;;  %v6291_v42 = vsel %vm1578_vm4, -3.4028235e+38, %v6276_v25  ;;  %v6305_v50 = vsel %vm1592_vm3, %v6289_v1, -inf }
0x14d1   :  { %v6311_v8 = vsel %vm1592_vm3, %v6291_v42, -inf }
0x14d2   :  { %6312 = vmax.xlane.f32.xlu1 %v6311_v8 }
0x14d4   :  { %6306 = vmax.xlane.f32.xlu0 %v6305_v50 }
0x14d6   :  { %6315 = vmax.xlane.f32.xlu1 %v6314_v22 }
0x14d8   :  { %6309 = vmax.xlane.f32.xlu0 %v6308_v23 }
0x14e7   :  { %5647 = vrot.lane.b32.xlu1 %v11773_v4, %s10802_s13 }
0x14eb   :  { %5651 = vrot.lane.b32.xlu1 %v11771_v11, %s10802_s13 }
0x14ee   :  { %5643 = vrot.lane.b32.xlu0 %v11742_v7, %s10802_s13 }
0x14ef   :  { %5655 = vrot.lane.b32.xlu1 %v11779_v24, %s10802_s13 }
0x14f2   :  { %5641 = vrot.lane.b32.xlu0 %v11748_v9, %s10802_s13 }
0x14f3   :  { %5645 = vrot.lane.b32.xlu1 %v11787_v38, %s10802_s13 }
0x14f6   :  { %5649 = vrot.lane.b32.xlu0 %v11781_v12, %s10802_s13 }
0x14f7   :  { %5653 = vrot.lane.b32.xlu1 %v11795_v28, %s10802_s13 }
0x1550   :  { %v6298_v30 = vpop.xlane.xlu1 %6297 }
0x1551   :  { %v6304_v29 = vpop.xlane.xlu0 %6303  ;;  %v6318_v4 = vsub.f32 %v6286_v6, %v6298_v30 }
0x1552   :  { %v6320_v11 = vsub.f32 %v6288_v37, %v6304_v29 }
0x1553   :  { %v6327_v7 = vmul.f32 1.442695, %v6318_v4 }
0x1554   :  { %v6331_v36 = vmul.f32 1.442695, %v6320_v11 }
0x1555   :  { %v6295_v26 = vpop.xlane.xlu0 %6294  ;;  %10518 = vpow2.f32 %v6327_v7 }
0x1556   :  { %v6317_v24 = vsub.f32 %v6285_v57, %v6295_v26  ;;  %10520 = vpow2.f32 %v6331_v36 }
0x1558   :  { %v6325_v27 = vmul.f32 1.442695, %v6317_v24 }
0x1559   :  { %v6301_v9 = vpop.xlane.xlu0 %6300 }
0x155a   :  { %10522 = vpow2.f32 %v6325_v27  ;;  %v6319_v38 = vsub.f32 %v6287_v58, %v6301_v9 }
0x155b   :  { %v6313_v15 = vpop.xlane.xlu1 %6312 }
0x155c   :  { %v6329_v31 = vmul.f32 1.442695, %v6319_v38  ;;  %v6323_v12 = vsub.f32 %v6291_v42, %v6313_v15 }
0x155d   :  { %v6307_v18 = vpop.xlane.xlu0 %6306 }
0x155e   :  { %10524 = vpow2.f32 %v6329_v31  ;;  %v6321_v28 = vsub.f32 %v6289_v1, %v6307_v18  ;;  %v6337_v48 = vmul.f32 1.442695, %v6323_v12 }
0x155f   :  { %v6316_v33 = vpop.xlane.xlu1 %6315 }
0x1560   :  { %v6333_v54 = vmul.f32 1.442695, %v6321_v28  ;;  %10526 = vpow2.f32 %v6337_v48  ;;  %v6324_v60 = vsub.f32 %v6292_v41, %v6316_v33 }
0x1561   :  { %v6310_v5 = vpop.xlane.xlu0 %6309 }
0x1562   :  { %10528 = vpow2.f32 %v6333_v54  ;;  %v6322_v43 = vsub.f32 %v6290_v21, %v6310_v5  ;;  %v6339_v13 = vmul.f32 1.442695, %v6324_v60  ;;  %v11967_v61 = vpop.eup %10518 }
0x1563   :  { %v5648_v51 = vpop.permute.xlu1 %5647  ;;  %v6344_v52 = vsel %vm1592_vm3, %v11967_v61, 0.0  ;;  %v11971_v53 = vpop.eup %10520 }
0x1564   :  { %v6335_v10 = vmul.f32 1.442695, %v6322_v43  ;;  %10530 = vpow2.f32 %v6339_v13  ;;  %6345 = vadd.xlane.f32.xlu1 %v6344_v52  ;;  %v6350_v16 = vsel %vm1592_vm3, %v11971_v53, 0.0 }
0x1565   :  { %v5644_v55 = vpop.permute.xlu0 %5643 }
0x1566   :  { %10532 = vpow2.f32 %v6335_v10 }
0x1567   :  { %v11973_v49 = vpop.eup %10522  ;;  %v5652_v35 = vpop.permute.xlu1 %5651 }
0x1568   :  { %v6341_v44 = vsel %vm1592_vm3, %v11973_v49, 0.0  ;;  %v5733_v19 = vcombine.low %v5644_v55, %v5652_v35  ;;  %6351 = vadd.xlane.f32.xlu1 %v6350_v16  ;;  %v5734_v0 = vcombine.high %v5644_v55, %v5652_v35 }
0x1569   :  { %6342 = vadd.xlane.f32.xlu0 %v6341_v44  ;;  %v5642_v6 = vpop.permute.xlu0 %5641 }
0x156a   :  { %v5741_v14 = vrot.slane %v5733_v19, %v11000_v59  ;;  %v5748_v58 = vrot.slane %v5734_v0, %v11000_v59 }
0x156b   :  { %v11979_v63 = vpop.eup %10524  ;;  %v5656_v37 = vpop.permute.xlu1 %5655 }
0x156c   :  { %v6347_v20 = vsel %vm1592_vm3, %v11979_v63, 0.0  ;;  %v5749_v56 = vcombine.low %v5648_v51, %v5656_v37  ;;  %v5750_v39 = vcombine.high %v5648_v51, %v5656_v37 }
0x156d   :  { %6348 = vadd.xlane.f32.xlu0 %v6347_v20  ;;  %v11983_v57 = vpop.eup %10526  ;;  %v5650_v50 = vpop.permute.xlu0 %5649 }
0x156e   :  { %v5757_v62 = vrot.slane %v5749_v56, %v11000_v59  ;;  %v5764_v34 = vrot.slane %v5750_v39, %v11000_v59  ;;  %v6359_v17 = vsel %vm1592_vm3, %v11983_v57, 0.0  ;;  %v5665_v4 = vcombine.low %v5642_v6, %v5650_v50 }
0x156f   :  { %v11986_v3 = vpop.eup %10528  ;;  %6360 = vadd.xlane.f32.xlu1 %v6359_v17  ;;  %v5646_v45 = vpop.permute.xlu1 %5645  ;;  %v5666_v7 = vcombine.high %v5642_v6, %v5650_v50 }
0x1570   :  { %v6353_v1 = vsel %vm1592_vm3, %v11986_v3, 0.0  ;;  %v5765_v25 = vcombine.low %v5741_v14, %v5757_v62  ;;  %v5766_v42 = vcombine.high %v5741_v14, %v5757_v62  ;;  %v5781_v8 = vcombine.low %v5748_v58, %v5764_v34 }
0x1571   :  { %v5782_v41 = vcombine.high %v5748_v58, %v5764_v34  ;;  %6354 = vadd.xlane.f32.xlu0 %v6353_v1  ;;  %v11995_v21 = vpop.eup %10530  ;;  %v5673_v33 = vrot.slane %v5665_v4, %v11000_v59  ;;  %v5680_v60 = vrot.slane %v5666_v7, %v11000_v59 }
0x1572   :  { %v5773_v23 = vrot.slane %v5765_v25, %v11002_v2  ;;  %v5780_v29 = vrot.slane %v5766_v42, %v11002_v2  ;;  %v5789_v30 = vrot.slane %v5781_v8, %v11002_v2  ;;  %v6362_v36 = vsel %vm1592_vm3, %v11995_v21, 0.0 }
0x1573   :  { %v11997_v22 = vpop.eup %10532  ;;  %v5796_v11 = vrot.slane %v5782_v41, %v11002_v2  ;;  %v5654_v26 = vpop.permute.xlu1 %5653  ;;  %6363 = vadd.xlane.f32.xlu1 %v6362_v36 }
0x1574   :  { %v6356_v24 = vsel %vm1592_vm3, %v11997_v22, 0.0  ;;  %v5869_v27 = vcombine.low %v5773_v23, %v5780_v29  ;;  %v9712_v9 = vcombine.high %v5773_v23, %v5780_v29  ;;  %v5681_v15 = vcombine.low %v5646_v45, %v5654_v26 }
0x1575   :  { %v5885_v38 = vcombine.low %v5789_v30, %v5796_v11  ;;  %v9713_v31 = vcombine.high %v5789_v30, %v5796_v11  ;;  %v5682_v12 = vcombine.high %v5646_v45, %v5654_v26  ;;  %6357 = vadd.xlane.f32.xlu0 %v6356_v24 }
0x1576   :  { %v5876_v18 = vrot.slane %v5869_v27, %v11000_v59  ;;  %v5884_v28 = vrot.slane %v9712_v9, %v11000_v59  ;;  %v5689_v5 = vrot.slane %v5681_v15, %v11000_v59 }
0x1577   :  { %v5892_v48 = vrot.slane %v5885_v38, %v11000_v59  ;;  %v5900_v54 = vrot.slane %v9713_v31, %v11000_v59  ;;  %v5696_v43 = vrot.slane %v5682_v12, %v11000_v59 }
0x1578   :  { %v5901_v13 = vcombine.low %v5876_v18, %v5884_v28  ;;  %v5902_v51 = vcombine.high %v5876_v18, %v5884_v28  ;;  %v5697_v55 = vcombine.low %v5673_v33, %v5689_v5  ;;  %v5698_v35 = vcombine.high %v5673_v33, %v5689_v5 }
0x1579   :  { %v5917_v10 = vcombine.low %v5892_v48, %v5900_v54  ;;  %v5918_v52 = vcombine.high %v5892_v48, %v5900_v54  ;;  %v5713_v44 = vcombine.low %v5680_v60, %v5696_v43  ;;  %v5714_v16 = vcombine.high %v5680_v60, %v5696_v43 }
0x157a   :  { %v5909_v19 = vrot.slane %v5901_v13, %v11002_v2  ;;  %v5916_v6 = vrot.slane %v5902_v51, %v11002_v2  ;;  %v5705_v20 = vrot.slane %v5697_v55, %v11002_v2  ;;  %v5712_v56 = vrot.slane %v5698_v35, %v11002_v2 }
0x157b   :  { %v5925_v0 = vrot.slane %v5917_v10, %v11002_v2  ;;  %v5932_v37 = vrot.slane %v5918_v52, %v11002_v2  ;;  %v5721_v39 = vrot.slane %v5713_v44, %v11002_v2  ;;  %v5728_v14 = vrot.slane %v5714_v16, %v11002_v2 }
0x157c   :  { %v5801_v17 = vcombine.low %v5705_v20, %v5712_v56  ;;  %v9710_v45 = vcombine.high %v5705_v20, %v5712_v56 }
0x157d   :  { %v5933_v58 = vcombine.low %v5909_v19, %v5925_v0  ;;  %v5935_v62 = vcombine.low %v5916_v6, %v5932_v37  ;;  %v12023_v34 = vcombine.high %v5916_v6, %v5932_v37  ;;  %v5817_v1 = vcombine.low %v5721_v39, %v5728_v14 }
0x157e   :  { %v9711_v25 = vcombine.high %v5721_v39, %v5728_v14  ;;  %v5808_v42 = vrot.slane %v5801_v17, %v11000_v59  ;;  %v5816_v8 = vrot.slane %v9710_v45, %v11000_v59  ;;  %v5934_v31 = vcombine.high %v5909_v19, %v5925_v0 }
0x157f   :  { %10260 = vmatprep.subr.mxu1 %v5933_v58  ;;  %10274 = vmatprep.subr.mxu0 %v5935_v62  ;;  %v5824_v41 = vrot.slane %v5817_v1, %v11000_v59 }
0x1580   :  { %10261 = vmatpush3.msra.mxu1 %v5933_v58  ;;  %10275 = vmatpush3.msra.mxu0 %v5935_v62  ;;  %v5832_v50 = vrot.slane %v9711_v25, %v11000_v59  ;;  %v5833_v23 = vcombine.low %v5808_v42, %v5816_v8  ;;  %v5834_v29 = vcombine.high %v5808_v42, %v5816_v8 }
0x1582   :  { %v5849_v30 = vcombine.low %v5824_v41, %v5832_v50  ;;  %v5850_v11 = vcombine.high %v5824_v41, %v5832_v50  ;;  %v5841_v4 = vrot.slane %v5833_v23, %v11002_v2  ;;  %v5848_v7 = vrot.slane %v5834_v29, %v11002_v2 }
0x1584   :  { %v5857_v36 = vrot.slane %v5849_v30, %v11002_v2  ;;  %v5864_v26 = vrot.slane %v5850_v11, %v11002_v2 }
0x1586   :  { %v5865_v24 = vcombine.low %v5841_v4, %v5857_v36  ;;  %v5867_v27 = vcombine.low %v5848_v7, %v5864_v26  ;;  %v5866_v9 = vcombine.high %v5841_v4, %v5857_v36  ;;  %v5868_v38 = vcombine.high %v5848_v7, %v5864_v26 }
0x1588   :  { %10262 = vmatprep.subr.mxu1 %v5865_v24  ;;  %10276 = vmatprep.subr.mxu0 %v5867_v27 }
0x1589   :  { %10263 = vmatpush3.msra.mxu1 %v5865_v24  ;;  %10277 = vmatpush3.msra.mxu0 %v5867_v27 }
0x158a   :  { %10267 = vmatprep.subr.mxu1 %v5934_v31 }
0x15ed   :  { %v6346_v15 = vpop.xlane.xlu1 %6345 }
0x15ee   :  { %10534 = vrcp.f32 %v6346_v15 }
0x15f1   :  { %v6352_v18 = vpop.xlane.xlu1 %6351 }
0x15f2   :  { %v6343_v12 = vpop.xlane.xlu0 %6342 }
0x15f3   :  { %10536 = vrcp.f32 %v6343_v12 }
0x15f4   :  { %10538 = vrcp.f32 %v6352_v18 }
0x15f6   :  { %v6349_v28 = vpop.xlane.xlu0 %6348 }
0x15f7   :  { %10540 = vrcp.f32 %v6349_v28 }
0x15f8   :  { %v6361_v48 = vpop.xlane.xlu1 %6360 }
0x15f9   :  { %10542 = vrcp.f32 %v6361_v48 }
0x15fa   :  { %v6355_v54 = vpop.xlane.xlu0 %6354 }
0x15fb   :  { %10544 = vrcp.f32 %v6355_v54  ;;  %v10535_v60 = vpop.eup %10534 }
0x15fc   :  { %v6364_v33 = vpop.xlane.xlu1 %6363  ;;  %v6368_v10 = vmul.f32 %v10535_v60, %v11967_v61 }
0x15fd   :  { %10546 = vrcp.f32 %v6364_v33 }
0x15fe   :  { %v6358_v5 = vpop.xlane.xlu0 %6357 }
0x15ff   :  { %10548 = vrcp.f32 %v6358_v5 }
0x1600   :  { %v10537_v43 = vpop.eup %10536 }
0x1601   :  { %v6366_v13 = vmul.f32 %v10537_v43, %v11973_v49  ;;  %v10539_v51 = vpop.eup %10538 }
0x1602   :  { %v6372_v35 = vmul.f32 %v10539_v51, %v11971_v53 }
0x1603   :  { %10264 = vmatprep.mubr.msk.f32.mxu1 %vm1592_vm3, %v6366_v13  ;;  %v9684_v13 = vld [vmem:[%s12520_s5 + $0x38] sm:$0xff] }
0x1604   :  { %v10541_v52 = vpop.eup %10540  ;;  %10265 = vmatmul.mubr.msk.f32.vlgmr.msra.gmra.mxu1 %vm1592_vm3, %v6368_v10  ;;  %10288 = vmatprep.subr.mxu0 %v9684_v13 }
0x1605   :  { %10268 = vmatpush3.msra.mxu1 %v5934_v31  ;;  %v6370_v55 = vmul.f32 %v10541_v52, %v11979_v63 }
0x1606   :  { %10269 = vmatprep.subr.mxu1 %v5866_v9  ;;  %v10543_v44 = vpop.eup %10542 }
0x1607   :  { %10270 = vmatpush3.msra.mxu1 %v5866_v9  ;;  %10271 = vmatprep.mubr.msk.f32.mxu1 %vm1592_vm3, %v6370_v55  ;;  %v6378_v61 = vmul.f32 %v10543_v44, %v11983_v57 }
0x1608   :  { %v10545_v16 = vpop.eup %10544  ;;  %10281 = vmatprep.subr.mxu1 %v12023_v34  ;;  %10272 = vmatmul.mubr.msk.f32.vlgmr.msra.gmra.mxu1 %vm1592_vm3, %v6372_v35 }
0x1609   :  { %10282 = vmatpush3.msra.mxu1 %v12023_v34  ;;  %v6374_v49 = vmul.f32 %v10545_v16, %v11986_v3  ;;  %10285 = vmatprep.mubr.msk.f32.mxu1 %vm1592_vm3, %v6378_v61 }
0x160a   :  { %10283 = vmatprep.subr.mxu1 %v5868_v38  ;;  %v10547_v53 = vpop.eup %10546 }
0x160b   :  { %10284 = vmatpush3.msra.mxu1 %v5868_v38  ;;  %10278 = vmatprep.mubr.msk.f32.mxu0 %vm1592_vm3, %v6374_v49  ;;  %v6380_v19 = vmul.f32 %v10547_v53, %v11995_v21 }
0x160c   :  { %v10549_v63 = vpop.eup %10548 }
0x160d   :  { %v6376_v0 = vmul.f32 %v10549_v63, %v11997_v22  ;;  %10286 = vmatmul.mubr.msk.f32.vlgmr.msra.gmra.mxu1 %vm1592_vm3, %v6380_v19 }
0x160f   :  { %10279 = vmatmul.mubr.msk.f32.vlgmr.msra.gmra.mxu0 %vm1592_vm3, %v6376_v0  ;;  %v9683_v0 = vld [vmem:[%s12520_s5 + $0x30] sm:$0xff] }
0x1610   :  { %10289 = vmatpush3.msra.mxu0 %v9684_v13 }
0x1611   :  { %10290 = vmatprep.subr.mxu0 %v9683_v0 }
0x1612   :  { %10291 = vmatpush3.msra.mxu0 %v9683_v0 }
0x16c4   :  { %v10266_v57 = vpop.f32.mrf.mxu1 }
0x16c6   :  { %v6453_v6 = vpop.f32.mrf.mxu1 }
0x16c8   :  { %v10273_v37 = vpop.f32.mrf.mxu1 }
0x16ca   :  { %v6534_v3 = vpop.f32.mrf.mxu1 }
0x16cd   :  { %v10287_v20 = vpop.f32.mrf.mxu1 }
0x16ce   :  { %v6789_v56 = vcombine.low %v10273_v37, %v10287_v20  ;;  %v6790_v39 = vcombine.high %v10273_v37, %v10287_v20  ;;  %v9682_v20 = vld [vmem:[%s12520_s5 + $0x28] sm:$0xff] }
0x16cf   :  { %v10280_v14 = vpop.f32.mrf.mxu0  ;;  %v6696_v34 = vpop.f32.mrf.mxu1  ;;  %10292 = vmatprep.subr.mxu0 %v9682_v20 }
0x16d0   :  { %v6773_v58 = vcombine.low %v10266_v57, %v10280_v14  ;;  %v6774_v62 = vcombine.high %v10266_v57, %v10280_v14  ;;  %v6797_v17 = vrot.slane %v6789_v56, %v11000_v59  ;;  %v6804_v21 = vrot.slane %v6790_v39, %v11000_v59  ;;  %10293 = vmatpush3.msra.mxu0 %v9682_v20  ;;  %v9687_v20 = vld [vmem:[%s12521_s6 + $0x30] sm:$0xff] }
0x16d1   :  { %v6721_v22 = vcombine.low %v6534_v3, %v6696_v34  ;;  %v6722_v45 = vcombine.high %v6534_v3, %v6696_v34  ;;  %v6615_v1 = vpop.f32.mrf.mxu0 }
0x16d2   :  { %v6781_v25 = vrot.slane %v6773_v58, %v11000_v59  ;;  %v6788_v42 = vrot.slane %v6774_v62, %v11000_v59  ;;  %v6705_v8 = vcombine.low %v6453_v6, %v6615_v1  ;;  %v6706_v41 = vcombine.high %v6453_v6, %v6615_v1  ;;  %v9681_v1 = vld [vmem:[%s12520_s5 + $0x20] sm:$0xff] }
0x16d3   :  { %v6729_v11 = vrot.slane %v6721_v22, %v11000_v59  ;;  %v6736_v4 = vrot.slane %v6722_v45, %v11000_v59  ;;  %10294 = vmatprep.subr.mxu0 %v9681_v1 }
0x16d4   :  { %v6805_v50 = vcombine.low %v6781_v25, %v6797_v17  ;;  %v6806_v23 = vcombine.high %v6781_v25, %v6797_v17  ;;  %v6821_v29 = vcombine.low %v6788_v42, %v6804_v21  ;;  %v6822_v30 = vcombine.high %v6788_v42, %v6804_v21  ;;  %10295 = vmatpush3.msra.mxu0 %v9681_v1 }
0x16d5   :  { %v6713_v7 = vrot.slane %v6705_v8, %v11000_v59  ;;  %v6720_v36 = vrot.slane %v6706_v41, %v11000_v59 }
0x16d6   :  { %v6813_v26 = vrot.slane %v6805_v50, %v11002_v2  ;;  %v6820_v24 = vrot.slane %v6806_v23, %v11002_v2  ;;  %v6829_v27 = vrot.slane %v6821_v29, %v11002_v2  ;;  %v6836_v9 = vrot.slane %v6822_v30, %v11002_v2 }
0x16d7   :  { %v6737_v38 = vcombine.low %v6713_v7, %v6729_v11  ;;  %v6738_v31 = vcombine.high %v6713_v7, %v6729_v11  ;;  %v6753_v15 = vcombine.low %v6720_v36, %v6736_v4  ;;  %v6754_v12 = vcombine.high %v6720_v36, %v6736_v4 }
0x16d8   :  { %v6909_v18 = vcombine.low %v6813_v26, %v6820_v24  ;;  %v9740_v28 = vcombine.high %v6813_v26, %v6820_v24  ;;  %v6925_v48 = vcombine.low %v6829_v27, %v6836_v9  ;;  %v9741_v54 = vcombine.high %v6829_v27, %v6836_v9 }
0x16d9   :  { %v6745_v33 = vrot.slane %v6737_v38, %v11002_v2  ;;  %v6752_v60 = vrot.slane %v6738_v31, %v11002_v2  ;;  %v6761_v5 = vrot.slane %v6753_v15, %v11002_v2  ;;  %v6768_v43 = vrot.slane %v6754_v12, %v11002_v2 }
0x16da   :  { %v6916_v10 = vrot.slane %v6909_v18, %v11000_v59  ;;  %v6924_v51 = vrot.slane %v9740_v28, %v11000_v59  ;;  %v6932_v52 = vrot.slane %v6925_v48, %v11000_v59  ;;  %v6940_v55 = vrot.slane %v9741_v54, %v11000_v59  ;;  %v10592_v48 = vld [vmem:[#allocation5] sm:$0xff] }
0x16db   :  { %v6841_v35 = vcombine.low %v6745_v33, %v6752_v60  ;;  %v9738_v44 = vcombine.high %v6745_v33, %v6752_v60  ;;  %v6857_v16 = vcombine.low %v6761_v5, %v6768_v43  ;;  %v9739_v61 = vcombine.high %v6761_v5, %v6768_v43  ;;  %v9742_v54 = vld [vmem:[#allocation14 + $0x11] ss:$0 sm:$0xff] }
0x16dc   :  { %v6941_v49 = vcombine.low %v6916_v10, %v6924_v51  ;;  %v6957_v53 = vcombine.low %v6932_v52, %v6940_v55  ;;  %v6942_v63 = vcombine.high %v6916_v10, %v6924_v51  ;;  %v6958_v19 = vcombine.high %v6932_v52, %v6940_v55  ;;  %v4880_v55 = vld [vmem:[#allocation10 + $0x38] sm:$0xff] }
0x16dd   :  { %v6848_v57 = vrot.slane %v6841_v35, %v11000_v59  ;;  %v6856_v6 = vrot.slane %v9738_v44, %v11000_v59  ;;  %v6864_v37 = vrot.slane %v6857_v16, %v11000_v59  ;;  %v6872_v3 = vrot.slane %v9739_v61, %v11000_v59  ;;  %v4879_v35 = vld [vmem:[#allocation10 + $0x30] sm:$0xff]  ;;  %10310 = vmatprep.subr.mxu0 %v4880_v55  ;;  %v4878_v44 = vld [vmem:[#allocation10 + $0x28] sm:$0xff] }
0x16de   :  { %v6949_v56 = vrot.slane %v6941_v49, %v11002_v2  ;;  %v6965_v39 = vrot.slane %v6957_v53, %v11002_v2  ;;  %v6956_v21 = vrot.slane %v6942_v63, %v11002_v2  ;;  %v6972_v22 = vrot.slane %v6958_v19, %v11002_v2 }
0x16df   :  { %v6873_v14 = vcombine.low %v6848_v57, %v6856_v6  ;;  %v6889_v58 = vcombine.low %v6864_v37, %v6872_v3  ;;  %v6874_v62 = vcombine.high %v6848_v57, %v6856_v6  ;;  %v6890_v34 = vcombine.high %v6864_v37, %v6872_v3  ;;  %v9688_v3 = vld [vmem:[%s12521_s6 + $0x38] sm:$0xff] }
0x16e0   :  { %v6974_v17 = vcombine.high %v6949_v56, %v6965_v39  ;;  %v6973_v45 = vcombine.low %v6949_v56, %v6965_v39  ;;  %v6975_v29 = vcombine.low %v6956_v21, %v6972_v22  ;;  %v6976_v11 = vcombine.high %v6956_v21, %v6972_v22  ;;  %10299 = vmatprep.subr.mxu1 %v9688_v3  ;;  %v9686_v56 = vld [vmem:[%s12521_s6 + $0x28] sm:$0xff]  ;;  %v9685_v39 = vld [vmem:[%s12521_s6 + $0x20] sm:$0xff] }
0x16e1   :  { %v6881_v25 = vrot.slane %v6873_v14, %v11002_v2  ;;  %v6897_v42 = vrot.slane %v6889_v58, %v11002_v2  ;;  %v6888_v41 = vrot.slane %v6874_v62, %v11002_v2  ;;  %v6904_v50 = vrot.slane %v6890_v34, %v11002_v2  ;;  %10300 = vmatpush3.msra.mxu1 %v9688_v3  ;;  %v9750_v14 = vld [vmem:[#allocation14 + $0x13] ss:$0 sm:$0xff] }
0x16e2   :  { %6981 = vrot.lane.b32.xlu1 %v6974_v17, %s10789_s27  ;;  %10301 = vmatprep.subr.mxu1 %v9687_v20 }
0x16e3   :  { %v6906_v8 = vcombine.high %v6881_v25, %v6897_v42  ;;  %v6905_v23 = vcombine.low %v6881_v25, %v6897_v42  ;;  %v6907_v30 = vcombine.low %v6888_v41, %v6904_v50  ;;  %v6908_v4 = vcombine.high %v6888_v41, %v6904_v50  ;;  %10302 = vmatpush3.msra.mxu1 %v9687_v20  ;;  %v9745_v41 = vld [vmem:[#allocation14 + $0x19] ss:$0 sm:$0xff] }
0x16e4   :  { %10303 = vmatprep.subr.mxu1 %v9686_v56 }
0x16e5   :  { %6979 = vrot.lane.b32.xlu0 %v6906_v8, %s10789_s27  ;;  %10304 = vmatpush3.msra.mxu1 %v9686_v56 }
0x16e6   :  { %6989 = vrot.lane.b32.xlu1 %v6975_v29, %s10803_s7  ;;  %10305 = vmatprep.subr.mxu1 %v9685_v39 }
0x16e7   :  { %10306 = vmatpush3.msra.mxu1 %v9685_v39 }
0x16e9   :  { %6987 = vrot.lane.b32.xlu0 %v6907_v30, %s10803_s7 }
0x16ea   :  { %6997 = vrot.lane.b32.xlu1 %v6976_v11, %s10804_s20 }
0x16ed   :  { %6995 = vrot.lane.b32.xlu0 %v6908_v4, %s10804_s20 }
0x1754   :  { %v6982_v7 = vpop.permute.xlu1 %6981 }
0x1755   :  { %v7002_v38 = vsel %vm1229_vm1, %v6973_v45, %v6982_v7 }
0x1757   :  { %v6980_v36 = vpop.permute.xlu0 %6979 }
0x1758   :  { %v6990_v26 = vpop.permute.xlu1 %6989  ;;  %v7001_v27 = vsel %vm1229_vm1, %v6905_v23, %v6980_v36  ;;  %v9746_v23 = vld [vmem:[#allocation14 + $0x1a] ss:$0 sm:$0xff] }
0x1759   :  { %v7004_v12 = vsel %vm1592_vm3, %v7002_v38, %v6990_v26 }
0x175b   :  { %v6988_v24 = vpop.permute.xlu0 %6987 }
0x175c   :  { %v6998_v9 = vpop.permute.xlu1 %6997  ;;  %v7003_v31 = vsel %vm1592_vm3, %v7001_v27, %v6988_v24 }
0x175d   :  { %v7006_v28 = vsel %vm2305_vm5, %v7004_v12, %v6998_v9 }
0x175f   :  { %v6996_v15 = vpop.permute.xlu0 %6995 }
0x1760   :  { %v7005_v18 = vsel %vm2305_vm5, %v7003_v31, %v6996_v15 }
0x1761   :  { %10296 = vmatprep.mubr.msk.f32.mxu0 %vm204_vm0, %v7005_v18 }
0x1762   :  { %10297 = vmatmul.mubr.msk.f32.vlgmr.msra.gmra.mxu0 %vm204_vm0, %v7006_v28 }
0x1763   :  { %10318 = vmatprep.mubr.msk.f32.mxu0 %vm204_vm0, %v10592_v48  ;;  %10311 = vmatpush3.msra.mxu0 %v4880_v55 }
0x1764   :  { %10312 = vmatprep.subr.mxu0 %v4879_v35 }
0x1765   :  { %10313 = vmatpush3.msra.mxu0 %v4879_v35 }
0x1766   :  { %10314 = vmatprep.subr.mxu0 %v4878_v44 }
0x1767   :  { %10315 = vmatpush3.msra.mxu0 %v4878_v44 }
0x1822   :  { %v10298_v33 = vpop.f32.mrf.mxu0 }
0x1823   :  { %v7089_v60 = vadd.f32 %v10298_v33, %v9742_v54 }
0x1824   :  { %v7083_v5 = vpop.f32.mrf.mxu0 }
0x1825   :  { %v12111_v43 = vadd.f32 %v7089_v60, %v11715_v46  ;;  %v7084_v13 = vadd.f32 %v9742_v54, %v7083_v5  ;;  %v4877_v46 = vld [vmem:[#allocation10 + $0x20] sm:$0xff] }
0x1826   :  { %10316 = vmatprep.subr.mxu0 %v4877_v46 }
0x1827   :  { %v12114_v10 = vadd.f32 %v7084_v13, %v11718_v32  ;;  %v7097_v51 = vsel %vm204_vm0, %v12111_v43, 0.0  ;;  %10317 = vmatpush3.msra.mxu0 %v4877_v46  ;;  %v10593_v32 = vld [vmem:[#allocation5 + $0x8] sm:$0xff] }
0x1828   :  { %7098 = vadd.xlane.f32.xlu1 %v7097_v51  ;;  %10319 = vmatmul.mubr.msk.f32.vlgmr.msra.gmra.mxu0 %vm204_vm0, %v10593_v32 }
0x1829   :  { %v7094_v52 = vsel %vm204_vm0, %v12114_v10, 0.0 }
0x182a   :  { %7095 = vadd.xlane.f32.xlu0 %v7094_v52 }
0x18b1   :  { %v7099_v16 = vpop.xlane.xlu1 %7098 }
0x18b2   :  { %v7101_v61 = vmul.f32 0.03125, %v7099_v16 }
0x18b3   :  { %v7096_v49 = vpop.xlane.xlu0 %7095 }
0x18b4   :  { %v7100_v53 = vmul.f32 0.03125, %v7096_v49  ;;  %v7103_v63 = vsub.f32 %v12111_v43, %v7101_v61 }
0x18b6   :  { %v7102_v19 = vsub.f32 %v12114_v10, %v7100_v53  ;;  %v7105_v6 = vmul.f32 %v7103_v63, %v7103_v63 }
0x18b8   :  { %v7104_v0 = vmul.f32 %v7102_v19, %v7102_v19  ;;  %v7109_v37 = vsel %vm204_vm0, %v7105_v6, 0.0 }
0x18ba   :  { %v7106_v57 = vsel %vm204_vm0, %v7104_v0, 0.0 }
0x18bb   :  { %7107 = vadd.xlane.f32.xlu0 %v7106_v57 }
0x18bf   :  { %7110 = vadd.xlane.f32.xlu0 %v7109_v37 }
0x18e8   :  { %v10320_v58 = vpop.f32.mrf.mxu0 }
0x18e9   :  { %v12137_v62 = vadd.f32 %v10320_v58, %v9750_v14 }
0x18ea   :  { %v7287_v34 = vpop.f32.mrf.mxu0 }
0x18eb   :  { %7600 = vrot.lane.b32.xlu1 %v12137_v62, %s10796_s8  ;;  %7594 = vrot.lane.b32.xlu0 %v12137_v62, %s10797_s29  ;;  %v12143_v17 = vadd.f32 %v9750_v14, %v7287_v34 }
0x18ef   :  { %7606 = vrot.lane.b32.xlu1 %v12137_v62, %s10798_s30  ;;  %7598 = vrot.lane.b32.xlu0 %v12143_v17, %s10796_s8 }
0x18f3   :  { %7592 = vrot.lane.b32.xlu1 %v12143_v17, %s10797_s29 }
0x18f7   :  { %7604 = vrot.lane.b32.xlu1 %v12143_v17, %s10798_s30 }
0x1944   :  { %v7108_v21 = vpop.xlane.xlu0 %7107 }
0x1945   :  { %v7112_v22 = vmul.f32 0.03125, %v7108_v21 }
0x1947   :  { %v7114_v45 = vadd.f32 1e-05, %v7112_v22 }
0x1948   :  { %v7111_v1 = vpop.xlane.xlu0 %7110 }
0x1949   :  { %10550 = vrsqrt.f32 %v7114_v45  ;;  %v7113_v25 = vmul.f32 0.03125, %v7111_v1 }
0x194b   :  { %v7115_v42 = vadd.f32 1e-05, %v7113_v25 }
0x194d   :  { %10552 = vrsqrt.f32 %v7115_v42 }
0x1956   :  { %v10551_v8 = vpop.eup %10550 }
0x1957   :  { %v7118_v50 = vmul.f32 %v10551_v8, %v7102_v19 }
0x1959   :  { %v7124_v29 = vmul.f32 %v9745_v41, %v7118_v50 }
0x195a   :  { %v10553_v30 = vpop.eup %10552 }
0x195b   :  { %v7119_v11 = vmul.f32 %v10553_v30, %v7103_v63  ;;  %v7130_v4 = vadd.f32 %v9746_v23, %v7124_v29 }
0x195d   :  { %v7125_v7 = vmul.f32 %v9745_v41, %v7119_v11  ;;  %10307 = vmatprep.mubr.msk.f32.mxu1 %vm204_vm0, %v7130_v4  ;;  %v12155_v26 = vpop.permute.xlu1 %7600  ;;  %v12161_v9 = vpop.permute.xlu0 %7594 }
0x195e   :  { %v7678_v38 = vcombine.low %v12137_v62, %v12155_v26  ;;  %v7679_v31 = vcombine.high %v12137_v62, %v12155_v26 }
0x195f   :  { %v7131_v36 = vadd.f32 %v9746_v23, %v7125_v7 }
0x1960   :  { %v7686_v5 = vrot.slane %v7678_v38, %v11000_v59  ;;  %v7693_v13 = vrot.slane %v7679_v31, %v11000_v59 }
0x1961   :  { %10308 = vmatmul.mubr.msk.f32.vlgmr.msra.gmra.mxu1 %vm204_vm0, %v7131_v36  ;;  %v12157_v24 = vpop.permute.xlu1 %7606  ;;  %v12173_v28 = vpop.permute.xlu0 %7598 }
0x1962   :  { %v7694_v15 = vcombine.low %v12161_v9, %v12157_v24  ;;  %v7695_v12 = vcombine.high %v12161_v9, %v12157_v24  ;;  %v7610_v33 = vcombine.low %v12143_v17, %v12173_v28  ;;  %v7611_v60 = vcombine.high %v12143_v17, %v12173_v28 }
0x1964   :  { %v7702_v51 = vrot.slane %v7694_v15, %v11000_v59  ;;  %v7709_v52 = vrot.slane %v7695_v12, %v11000_v59  ;;  %v7618_v44 = vrot.slane %v7610_v33, %v11000_v59  ;;  %v7625_v46 = vrot.slane %v7611_v60, %v11000_v59 }
0x1965   :  { %v12159_v27 = vpop.permute.xlu1 %7592 }
0x1966   :  { %v7710_v32 = vcombine.low %v7686_v5, %v7702_v51  ;;  %v7711_v16 = vcombine.high %v7686_v5, %v7702_v51  ;;  %v7726_v61 = vcombine.low %v7693_v13, %v7709_v52  ;;  %v7727_v49 = vcombine.high %v7693_v13, %v7709_v52 }
0x1968   :  { %v7718_v57 = vrot.slane %v7710_v32, %v11002_v2  ;;  %v7725_v6 = vrot.slane %v7711_v16, %v11002_v2  ;;  %v7734_v37 = vrot.slane %v7726_v61, %v11002_v2  ;;  %v7741_v3 = vrot.slane %v7727_v49, %v11002_v2 }
0x1969   :  { %v12171_v18 = vpop.permute.xlu1 %7604 }
0x196a   :  { %v7626_v48 = vcombine.low %v12159_v27, %v12171_v18  ;;  %v7627_v54 = vcombine.high %v12159_v27, %v12171_v18  ;;  %v7814_v58 = vcombine.low %v7718_v57, %v7725_v6  ;;  %v9759_v34 = vcombine.high %v7718_v57, %v7725_v6 }
0x196b   :  { %v7830_v21 = vcombine.low %v7734_v37, %v7741_v3  ;;  %v9760_v22 = vcombine.high %v7734_v37, %v7741_v3 }
0x196c   :  { %v7634_v55 = vrot.slane %v7626_v48, %v11000_v59  ;;  %v7641_v35 = vrot.slane %v7627_v54, %v11000_v59  ;;  %v7821_v8 = vrot.slane %v7814_v58, %v11000_v59  ;;  %v7829_v41 = vrot.slane %v9759_v34, %v11000_v59 }
0x196d   :  { %v7837_v50 = vrot.slane %v7830_v21, %v11000_v59  ;;  %v7845_v23 = vrot.slane %v9760_v22, %v11000_v59 }
0x196e   :  { %v7642_v53 = vcombine.low %v7618_v44, %v7634_v55  ;;  %v7643_v63 = vcombine.high %v7618_v44, %v7634_v55  ;;  %v7658_v19 = vcombine.low %v7625_v46, %v7641_v35  ;;  %v7659_v0 = vcombine.high %v7625_v46, %v7641_v35 }
0x196f   :  { %v7846_v29 = vcombine.low %v7821_v8, %v7829_v41  ;;  %v7862_v30 = vcombine.low %v7837_v50, %v7845_v23  ;;  %v7847_v48 = vcombine.high %v7821_v8, %v7829_v41  ;;  %v7863_v54 = vcombine.high %v7837_v50, %v7845_v23 }
0x1970   :  { %v7650_v20 = vrot.slane %v7642_v53, %v11002_v2  ;;  %v7657_v56 = vrot.slane %v7643_v63, %v11002_v2  ;;  %v7666_v39 = vrot.slane %v7658_v19, %v11002_v2  ;;  %v7673_v14 = vrot.slane %v7659_v0, %v11002_v2  ;;  %v9747_v19 = vld [vmem:[#allocation14 + $0x12] ss:$0 sm:$0xff] }
0x1971   :  { %v7854_v38 = vrot.slane %v7846_v29, %v11002_v2  ;;  %v7870_v31 = vrot.slane %v7862_v30, %v11002_v2  ;;  %v7861_v51 = vrot.slane %v7847_v48, %v11002_v2  ;;  %v7877_v52 = vrot.slane %v7863_v54, %v11002_v2 }
0x1972   :  { %v7746_v45 = vcombine.low %v7650_v20, %v7657_v56  ;;  %v9757_v1 = vcombine.high %v7650_v20, %v7657_v56  ;;  %v7762_v25 = vcombine.low %v7666_v39, %v7673_v14  ;;  %v9758_v42 = vcombine.high %v7666_v39, %v7673_v14 }
0x1973   :  { %v7878_v33 = vcombine.low %v7854_v38, %v7870_v31  ;;  %v7879_v60 = vcombine.high %v7854_v38, %v7870_v31  ;;  %v12217_v32 = vcombine.low %v7861_v51, %v7877_v52  ;;  %v12219_v16 = vcombine.high %v7861_v51, %v7877_v52 }
0x1974   :  { %v7753_v11 = vrot.slane %v7746_v45, %v11000_v59  ;;  %v7761_v4 = vrot.slane %v9757_v1, %v11000_v59  ;;  %v7769_v7 = vrot.slane %v7762_v25, %v11000_v59  ;;  %v7777_v36 = vrot.slane %v9758_v42, %v11000_v59 }
0x1975   :  { %10321 = vmatprep.subr.msk.mxu1 %vm1229_vm1, %v7878_v33  ;;  %10328 = vmatprep.subr.msk.mxu0 %vm1229_vm1, %v7879_v60 }
0x1976   :  { %v7778_v15 = vcombine.low %v7753_v11, %v7761_v4  ;;  %v7794_v12 = vcombine.low %v7769_v7, %v7777_v36  ;;  %v7779_v55 = vcombine.high %v7753_v11, %v7761_v4  ;;  %v7795_v35 = vcombine.high %v7769_v7, %v7777_v36  ;;  %10322 = vmatpush3.xpose.msk.msra.mxu1 %vm1229_vm1, %v7878_v33 }
0x1977   :  { %10329 = vmatpush3.xpose.msk.msra.mxu0 %vm1229_vm1, %v7879_v60 }
0x1978   :  { %v7786_v5 = vrot.slane %v7778_v15, %v11002_v2  ;;  %v7802_v13 = vrot.slane %v7794_v12, %v11002_v2  ;;  %v7793_v61 = vrot.slane %v7779_v55, %v11002_v2  ;;  %v7809_v49 = vrot.slane %v7795_v35, %v11002_v2 }
0x197a   :  { %v7810_v44 = vcombine.low %v7786_v5, %v7802_v13  ;;  %v7811_v46 = vcombine.high %v7786_v5, %v7802_v13  ;;  %v12225_v53 = vcombine.low %v7793_v61, %v7809_v49  ;;  %v12227_v63 = vcombine.high %v7793_v61, %v7809_v49 }
0x197c   :  { %10323 = vmatprep.subr.msk.mxu1 %vm1229_vm1, %v7810_v44  ;;  %10330 = vmatprep.subr.msk.mxu0 %vm1229_vm1, %v7811_v46 }
0x197d   :  { %10324 = vmatpush3.xpose.msk.msra.mxu1 %vm1229_vm1, %v7810_v44  ;;  %10331 = vmatpush3.xpose.msk.msra.mxu0 %vm1229_vm1, %v7811_v46 }
0x197e   :  { %10335 = vmatprep.subr.msk.mxu1 %vm1229_vm1, %v12217_v32  ;;  %10342 = vmatprep.subr.msk.mxu0 %vm1229_vm1, %v12219_v16 }
0x1a21   :  { %v10309_v0 = vpop.f32.mrf.mxu1 }
0x1a22   :  { %v7214_v57 = vadd.f32 %v10309_v0, %v9747_v19 }
0x1a23   :  { %v7208_v6 = vpop.f32.mrf.mxu1 }
0x1a24   :  { %v7297_v37 = vmul.f32 0.17677669, %v7214_v57  ;;  %v7209_v3 = vadd.f32 %v9747_v19, %v7208_v6 }
0x1a26   :  { %v7296_v20 = vmul.f32 0.17677669, %v7209_v3  ;;  %7302 = vrot.lane.b32.xlu1 %v7297_v37, %s10797_s29 }
0x1a28   :  { %7300 = vrot.lane.b32.xlu0 %v7296_v20, %s10797_s29 }
0x1a2a   :  { %7306 = vrot.lane.b32.xlu1 %v7296_v20, %s10796_s8 }
0x1a2c   :  { %7312 = vrot.lane.b32.xlu0 %v7296_v20, %s10798_s30 }
0x1a2e   :  { %7314 = vrot.lane.b32.xlu1 %v7297_v37, %s10798_s30 }
0x1a30   :  { %7308 = vrot.lane.b32.xlu0 %v7297_v37, %s10796_s8 }
0x1a98   :  { %v7303_v56 = vpop.permute.xlu1 %7302 }
0x1a9a   :  { %v7301_v39 = vpop.permute.xlu0 %7300 }
0x1a9c   :  { %v7307_v14 = vpop.permute.xlu1 %7306 }
0x1a9d   :  { %v7318_v58 = vcombine.low %v7296_v20, %v7307_v14  ;;  %v7319_v34 = vcombine.high %v7296_v20, %v7307_v14 }
0x1a9e   :  { %v7313_v21 = vpop.permute.xlu0 %7312 }
0x1a9f   :  { %v7334_v22 = vcombine.low %v7301_v39, %v7313_v21  ;;  %v7335_v45 = vcombine.high %v7301_v39, %v7313_v21  ;;  %v7326_v25 = vrot.slane %v7318_v58, %v11000_v59  ;;  %v7333_v42 = vrot.slane %v7319_v34, %v11000_v59 }
0x1aa0   :  { %v7315_v1 = vpop.permute.xlu1 %7314 }
0x1aa1   :  { %v7342_v8 = vrot.slane %v7334_v22, %v11000_v59  ;;  %v7349_v41 = vrot.slane %v7335_v45, %v11000_v59  ;;  %v7402_v50 = vcombine.low %v7303_v56, %v7315_v1  ;;  %v7403_v23 = vcombine.high %v7303_v56, %v7315_v1 }
0x1aa2   :  { %v7309_v29 = vpop.permute.xlu0 %7308 }
0x1aa3   :  { %v7350_v30 = vcombine.low %v7326_v25, %v7342_v8  ;;  %v7351_v11 = vcombine.high %v7326_v25, %v7342_v8  ;;  %v7366_v4 = vcombine.low %v7333_v42, %v7349_v41  ;;  %v7367_v7 = vcombine.high %v7333_v42, %v7349_v41 }
0x1aa4   :  { %v7386_v36 = vcombine.low %v7297_v37, %v7309_v29  ;;  %v7387_v38 = vcombine.high %v7297_v37, %v7309_v29  ;;  %v7410_v54 = vrot.slane %v7402_v50, %v11000_v59  ;;  %v7417_v33 = vrot.slane %v7403_v23, %v11000_v59 }
0x1aa5   :  { %v7358_v31 = vrot.slane %v7350_v30, %v11002_v2  ;;  %v7365_v15 = vrot.slane %v7351_v11, %v11002_v2  ;;  %v7374_v12 = vrot.slane %v7366_v4, %v11002_v2  ;;  %v7381_v48 = vrot.slane %v7367_v7, %v11002_v2 }
0x1aa6   :  { %v7394_v60 = vrot.slane %v7386_v36, %v11000_v59  ;;  %v7401_v5 = vrot.slane %v7387_v38, %v11000_v59 }
0x1aa7   :  { %v7454_v13 = vcombine.low %v7358_v31, %v7365_v15  ;;  %v9753_v51 = vcombine.high %v7358_v31, %v7365_v15  ;;  %v7470_v52 = vcombine.low %v7374_v12, %v7381_v48  ;;  %v9754_v55 = vcombine.high %v7374_v12, %v7381_v48 }
0x1aa8   :  { %v7418_v35 = vcombine.low %v7394_v60, %v7410_v54  ;;  %v7419_v44 = vcombine.high %v7394_v60, %v7410_v54  ;;  %v7434_v46 = vcombine.low %v7401_v5, %v7417_v33  ;;  %v7435_v61 = vcombine.high %v7401_v5, %v7417_v33 }
0x1aa9   :  { %v7461_v49 = vrot.slane %v7454_v13, %v11000_v59  ;;  %v7469_v19 = vrot.slane %v9753_v51, %v11000_v59  ;;  %v7477_v0 = vrot.slane %v7470_v52, %v11000_v59  ;;  %v7485_v57 = vrot.slane %v9754_v55, %v11000_v59 }
0x1aaa   :  { %v7426_v6 = vrot.slane %v7418_v35, %v11002_v2  ;;  %v7433_v37 = vrot.slane %v7419_v44, %v11002_v2  ;;  %v7442_v3 = vrot.slane %v7434_v46, %v11002_v2  ;;  %v7449_v20 = vrot.slane %v7435_v61, %v11002_v2 }
0x1aab   :  { %v7486_v56 = vcombine.low %v7461_v49, %v7469_v19  ;;  %v7502_v39 = vcombine.low %v7477_v0, %v7485_v57  ;;  %v7487_v1 = vcombine.high %v7461_v49, %v7469_v19  ;;  %v7503_v25 = vcombine.high %v7477_v0, %v7485_v57 }
0x1aac   :  { %v7522_v14 = vcombine.low %v7426_v6, %v7433_v37  ;;  %v9755_v58 = vcombine.high %v7426_v6, %v7433_v37  ;;  %v7538_v34 = vcombine.low %v7442_v3, %v7449_v20  ;;  %v9756_v21 = vcombine.high %v7442_v3, %v7449_v20 }
0x1aad   :  { %v7494_v22 = vrot.slane %v7486_v56, %v11002_v2  ;;  %v7510_v45 = vrot.slane %v7502_v39, %v11002_v2  ;;  %v7501_v36 = vrot.slane %v7487_v1, %v11002_v2  ;;  %v7517_v38 = vrot.slane %v7503_v25, %v11002_v2 }
0x1aae   :  { %v7529_v42 = vrot.slane %v7522_v14, %v11000_v59  ;;  %v7537_v8 = vrot.slane %v9755_v58, %v11000_v59  ;;  %v7545_v41 = vrot.slane %v7538_v34, %v11000_v59  ;;  %v7553_v50 = vrot.slane %v9756_v21, %v11000_v59 }
0x1aaf   :  { %v7518_v23 = vcombine.low %v7494_v22, %v7510_v45  ;;  %v7519_v29 = vcombine.high %v7494_v22, %v7510_v45  ;;  %v7520_v54 = vcombine.low %v7501_v36, %v7517_v38  ;;  %v7521_v33 = vcombine.high %v7501_v36, %v7517_v38 }
0x1ab0   :  { %v7554_v30 = vcombine.low %v7529_v42, %v7537_v8  ;;  %v7570_v11 = vcombine.low %v7545_v41, %v7553_v50  ;;  %v7555_v31 = vcombine.high %v7529_v42, %v7537_v8  ;;  %v7571_v15 = vcombine.high %v7545_v41, %v7553_v50 }
0x1ab1   :  { %10325 = vmatprep.mubr.msk.f32.mxu1 %vm1229_vm1, %v7518_v23  ;;  %10332 = vmatprep.mubr.msk.f32.mxu0 %vm1229_vm1, %v7519_v29 }
0x1ab2   :  { %v7562_v4 = vrot.slane %v7554_v30, %v11002_v2  ;;  %v7578_v7 = vrot.slane %v7570_v11, %v11002_v2  ;;  %v7569_v60 = vrot.slane %v7555_v31, %v11002_v2  ;;  %v7585_v5 = vrot.slane %v7571_v15, %v11002_v2 }
0x1ab4   :  { %v7586_v12 = vcombine.low %v7562_v4, %v7578_v7  ;;  %v7587_v48 = vcombine.high %v7562_v4, %v7578_v7 }
0x1ab6   :  { %10326 = vmatmul.mubr.msk.f32.vlgmr.msra.gmra.mxu1 %vm1229_vm1, %v7586_v12  ;;  %10333 = vmatmul.mubr.msk.f32.vlgmr.msra.gmra.mxu0 %vm1229_vm1, %v7587_v48 }
0x1ab7   :  { %10336 = vmatpush3.xpose.msk.msra.mxu1 %vm1229_vm1, %v12217_v32  ;;  %10343 = vmatpush3.xpose.msk.msra.mxu0 %vm1229_vm1, %v12219_v16  ;;  %v7588_v32 = vcombine.low %v7569_v60, %v7585_v5  ;;  %v7589_v16 = vcombine.high %v7569_v60, %v7585_v5 }
0x1ab8   :  { %10337 = vmatprep.subr.msk.mxu1 %vm1229_vm1, %v12225_v53  ;;  %10339 = vmatprep.mubr.msk.f32.mxu1 %vm1229_vm1, %v7520_v54 }
0x1ab9   :  { %10344 = vmatprep.subr.msk.mxu0 %vm1229_vm1, %v12227_v63  ;;  %10346 = vmatprep.mubr.msk.f32.mxu0 %vm1229_vm1, %v7521_v33 }
0x1abb   :  { %10338 = vmatpush3.xpose.msk.msra.mxu1 %vm1229_vm1, %v12225_v53  ;;  %10345 = vmatpush3.xpose.msk.msra.mxu0 %vm1229_vm1, %v12227_v63 }
0x1abe   :  { %10340 = vmatmul.mubr.msk.f32.vlgmr.msra.gmra.mxu1 %vm1229_vm1, %v7588_v32  ;;  %10347 = vmatmul.mubr.msk.f32.vlgmr.msra.gmra.mxu0 %vm1229_vm1, %v7589_v16 }
0x1b76   :  { %v10327_v13 = vpop.f32.mrf.mxu1  ;;  %v10334_v51 = vpop.f32.mrf.mxu0 }
0x1b77   :  { %v8527_v52 = vsel %vm3834_vm6, -3.4028235e+38, %v10327_v13  ;;  %v8529_v55 = vsel %vm3834_vm6, -3.4028235e+38, %v10334_v51 }
0x1b78   :  { %v8537_v35 = vsel %vm1592_vm3, %v8527_v52, -inf  ;;  %v8543_v53 = vsel %vm1592_vm3, %v8529_v55, -inf  ;;  %v8256_v44 = vpop.f32.mrf.mxu1  ;;  %v8343_v46 = vpop.f32.mrf.mxu0 }
0x1b79   :  { %v8526_v63 = vsel %vm3833_vm7, -3.4028235e+38, %v8256_v44  ;;  %8544 = vmax.xlane.f32.xlu0 %v8543_v53  ;;  %8538 = vmax.xlane.f32.xlu1 %v8537_v35  ;;  %v8528_v49 = vsel %vm3833_vm7, -3.4028235e+38, %v8343_v46 }
0x1b7a   :  { %v8534_v61 = vsel %vm1592_vm3, %v8526_v63, -inf  ;;  %v8540_v57 = vsel %vm1592_vm3, %v8528_v49, -inf }
0x1b7d   :  { %8535 = vmax.xlane.f32.xlu0 %v8534_v61 }
0x1b7e   :  { %v10348_v19 = vpop.f32.mrf.mxu0  ;;  %v10341_v0 = vpop.f32.mrf.mxu1 }
0x1b7f   :  { %v8533_v39 = vsel %vm3834_vm6, -3.4028235e+38, %v10348_v19  ;;  %v8531_v58 = vsel %vm3834_vm6, -3.4028235e+38, %v10341_v0 }
0x1b80   :  { %v8430_v6 = vpop.f32.mrf.mxu1  ;;  %v8517_v37 = vpop.f32.mrf.mxu0  ;;  %v8555_v34 = vsel %vm1592_vm3, %v8533_v39, -inf  ;;  %v8549_v21 = vsel %vm1592_vm3, %v8531_v58, -inf }
0x1b81   :  { %v8530_v3 = vsel %vm3833_vm7, -3.4028235e+38, %v8430_v6  ;;  %v8532_v20 = vsel %vm3833_vm7, -3.4028235e+38, %v8517_v37  ;;  %8541 = vmax.xlane.f32.xlu0 %v8540_v57 }
0x1b82   :  { %v8552_v56 = vsel %vm1592_vm3, %v8532_v20, -inf  ;;  %v8546_v14 = vsel %vm1592_vm3, %v8530_v3, -inf }
0x1b83   :  { %8553 = vmax.xlane.f32.xlu1 %v8552_v56 }
0x1b85   :  { %8547 = vmax.xlane.f32.xlu0 %v8546_v14 }
0x1b87   :  { %8556 = vmax.xlane.f32.xlu1 %v8555_v34 }
0x1b89   :  { %8550 = vmax.xlane.f32.xlu0 %v8549_v21 }
0x1b98   :  { %7888 = vrot.lane.b32.xlu1 %v12161_v9, %s10799_s0 }
0x1b9c   :  { %7892 = vrot.lane.b32.xlu1 %v12155_v26, %s10799_s0 }
0x1b9f   :  { %7884 = vrot.lane.b32.xlu0 %v12137_v62, %s10799_s0 }
0x1ba0   :  { %7896 = vrot.lane.b32.xlu1 %v12157_v24, %s10799_s0 }
0x1ba3   :  { %7882 = vrot.lane.b32.xlu0 %v12143_v17, %s10799_s0 }
0x1ba4   :  { %7886 = vrot.lane.b32.xlu1 %v12159_v27, %s10799_s0 }
0x1ba7   :  { %7890 = vrot.lane.b32.xlu0 %v12173_v28, %s10799_s0 }
0x1ba8   :  { %7894 = vrot.lane.b32.xlu1 %v12171_v18, %s10799_s0 }
0x1c02   :  { %v8545_v40 = vpop.xlane.xlu0 %8544  ;;  %v8539_v47 = vpop.xlane.xlu1 %8538 }
0x1c03   :  { %v8561_v26 = vsub.f32 %v8529_v55, %v8545_v40  ;;  %v8559_v9 = vsub.f32 %v8527_v52, %v8539_v47 }
0x1c05   :  { %v8568_v62 = vmul.f32 1.442695, %v8559_v9  ;;  %v8572_v22 = vmul.f32 1.442695, %v8561_v26 }
0x1c06   :  { %v8536_v45 = vpop.xlane.xlu0 %8535 }
0x1c07   :  { %v8558_v24 = vsub.f32 %v8526_v63, %v8536_v45  ;;  %10554 = vpow2.f32 %v8568_v62 }
0x1c08   :  { %10556 = vpow2.f32 %v8572_v22 }
0x1c09   :  { %v8566_v1 = vmul.f32 1.442695, %v8558_v24 }
0x1c0a   :  { %v8542_v17 = vpop.xlane.xlu0 %8541 }
0x1c0b   :  { %10558 = vpow2.f32 %v8566_v1  ;;  %v8560_v27 = vsub.f32 %v8528_v49, %v8542_v17 }
0x1c0c   :  { %v8554_v25 = vpop.xlane.xlu1 %8553 }
0x1c0d   :  { %v8570_v42 = vmul.f32 1.442695, %v8560_v27  ;;  %v8564_v28 = vsub.f32 %v8532_v20, %v8554_v25 }
0x1c0e   :  { %v8548_v8 = vpop.xlane.xlu0 %8547 }
0x1c0f   :  { %10560 = vpow2.f32 %v8570_v42  ;;  %v8578_v18 = vmul.f32 1.442695, %v8564_v28  ;;  %v8562_v41 = vsub.f32 %v8530_v3, %v8548_v8 }
0x1c10   :  { %v8557_v50 = vpop.xlane.xlu1 %8556 }
0x1c11   :  { %10562 = vpow2.f32 %v8578_v18  ;;  %v8574_v23 = vmul.f32 1.442695, %v8562_v41  ;;  %v8565_v29 = vsub.f32 %v8533_v39, %v8557_v50 }
0x1c12   :  { %v8551_v30 = vpop.xlane.xlu0 %8550 }
0x1c13   :  { %10564 = vpow2.f32 %v8574_v23  ;;  %v8580_v11 = vmul.f32 1.442695, %v8565_v29  ;;  %v8563_v4 = vsub.f32 %v8531_v58, %v8551_v30 }
0x1c14   :  { %v7889_v7 = vpop.permute.xlu1 %7888  ;;  %v12333_v36 = vpop.eup %10554 }
0x1c15   :  { %10566 = vpow2.f32 %v8580_v11  ;;  %v8576_v38 = vmul.f32 1.442695, %v8563_v4  ;;  %v8585_v31 = vsel %vm1592_vm3, %v12333_v36, 0.0  ;;  %v12337_v12 = vpop.eup %10556 }
0x1c16   :  { %v7885_v15 = vpop.permute.xlu0 %7884  ;;  %8586 = vadd.xlane.f32.xlu1 %v8585_v31  ;;  %v8591_v60 = vsel %vm1592_vm3, %v12337_v12, 0.0 }
0x1c17   :  { %10568 = vpow2.f32 %v8576_v38 }
0x1c18   :  { %v12339_v48 = vpop.eup %10558  ;;  %v7893_v54 = vpop.permute.xlu1 %7892 }
0x1c19   :  { %v8582_v33 = vsel %vm1592_vm3, %v12339_v48, 0.0  ;;  %v7974_v5 = vcombine.low %v7885_v15, %v7893_v54  ;;  %v7975_v32 = vcombine.high %v7885_v15, %v7893_v54 }
0x1c1a   :  { %8583 = vadd.xlane.f32.xlu0 %v8582_v33  ;;  %8592 = vadd.xlane.f32.xlu1 %v8591_v60  ;;  %v7883_v16 = vpop.permute.xlu0 %7882 }
0x1c1b   :  { %v7982_v44 = vrot.slane %v7974_v5, %v11000_v59  ;;  %v7989_v63 = vrot.slane %v7975_v32, %v11000_v59 }
0x1c1c   :  { %v12345_v13 = vpop.eup %10560  ;;  %v7897_v51 = vpop.permute.xlu1 %7896 }
0x1c1d   :  { %v7990_v52 = vcombine.low %v7889_v7, %v7897_v51  ;;  %v7991_v55 = vcombine.high %v7889_v7, %v7897_v51  ;;  %v8588_v35 = vsel %vm1592_vm3, %v12345_v13, 0.0 }
0x1c1e   :  { %v12349_v53 = vpop.eup %10562  ;;  %8589 = vadd.xlane.f32.xlu0 %v8588_v35  ;;  %v7891_v20 = vpop.permute.xlu0 %7890 }
0x1c1f   :  { %v7998_v46 = vrot.slane %v7990_v52, %v11000_v59  ;;  %v8005_v61 = vrot.slane %v7991_v55, %v11000_v59  ;;  %v8600_v19 = vsel %vm1592_vm3, %v12349_v53, 0.0  ;;  %v7906_v47 = vcombine.low %v7883_v16, %v7891_v20 }
0x1c20   :  { %v12355_v49 = vpop.eup %10564  ;;  %v7887_v0 = vpop.permute.xlu1 %7886  ;;  %8601 = vadd.xlane.f32.xlu1 %v8600_v19  ;;  %v7907_v26 = vcombine.high %v7883_v16, %v7891_v20 }
0x1c21   :  { %v8006_v57 = vcombine.low %v7982_v44, %v7998_v46  ;;  %v8007_v6 = vcombine.high %v7982_v44, %v7998_v46  ;;  %v8022_v37 = vcombine.low %v7989_v63, %v8005_v61  ;;  %v8023_v3 = vcombine.high %v7989_v63, %v8005_v61 }
0x1c22   :  { %v12359_v56 = vpop.eup %10566  ;;  %v8594_v39 = vsel %vm1592_vm3, %v12355_v49, 0.0  ;;  %v7914_v41 = vrot.slane %v7906_v47, %v11000_v59  ;;  %v7921_v50 = vrot.slane %v7907_v26, %v11000_v59 }
0x1c23   :  { %v8014_v14 = vrot.slane %v8006_v57, %v11002_v2  ;;  %v8021_v58 = vrot.slane %v8007_v6, %v11002_v2  ;;  %v8030_v34 = vrot.slane %v8022_v37, %v11002_v2  ;;  %v8037_v21 = vrot.slane %v8023_v3, %v11002_v2  ;;  %8595 = vadd.xlane.f32.xlu0 %v8594_v39 }
0x1c24   :  { %v12367_v40 = vpop.eup %10568  ;;  %v8603_v9 = vsel %vm1592_vm3, %v12359_v56, 0.0  ;;  %v7895_v62 = vpop.permute.xlu1 %7894 }
0x1c25   :  { %v8110_v22 = vcombine.low %v8014_v14, %v8021_v58  ;;  %v9763_v45 = vcombine.high %v8014_v14, %v8021_v58  ;;  %v8126_v24 = vcombine.low %v8030_v34, %v8037_v21  ;;  %v9764_v1 = vcombine.high %v8030_v34, %v8037_v21  ;;  %8604 = vadd.xlane.f32.xlu1 %v8603_v9 }
0x1c26   :  { %v7922_v17 = vcombine.low %v7887_v0, %v7895_v62  ;;  %v7923_v27 = vcombine.high %v7887_v0, %v7895_v62  ;;  %v8597_v25 = vsel %vm1592_vm3, %v12367_v40, 0.0 }
0x1c27   :  { %8598 = vadd.xlane.f32.xlu0 %v8597_v25  ;;  %v8117_v42 = vrot.slane %v8110_v22, %v11000_v59  ;;  %v8125_v28 = vrot.slane %v9763_v45, %v11000_v59  ;;  %v8133_v8 = vrot.slane %v8126_v24, %v11000_v59  ;;  %v8141_v18 = vrot.slane %v9764_v1, %v11000_v59 }
0x1c28   :  { %v7930_v23 = vrot.slane %v7922_v17, %v11000_v59  ;;  %v7937_v29 = vrot.slane %v7923_v27, %v11000_v59 }
0x1c29   :  { %v8142_v30 = vcombine.low %v8117_v42, %v8125_v28  ;;  %v8158_v11 = vcombine.low %v8133_v8, %v8141_v18  ;;  %v8143_v4 = vcombine.high %v8117_v42, %v8125_v28  ;;  %v8159_v7 = vcombine.high %v8133_v8, %v8141_v18 }
0x1c2a   :  { %v7938_v38 = vcombine.low %v7914_v41, %v7930_v23  ;;  %v7939_v31 = vcombine.high %v7914_v41, %v7930_v23  ;;  %v7954_v15 = vcombine.low %v7921_v50, %v7937_v29  ;;  %v7955_v54 = vcombine.high %v7921_v50, %v7937_v29 }
0x1c2b   :  { %v8150_v33 = vrot.slane %v8142_v30, %v11002_v2  ;;  %v8166_v60 = vrot.slane %v8158_v11, %v11002_v2  ;;  %v8157_v5 = vrot.slane %v8143_v4, %v11002_v2  ;;  %v8173_v32 = vrot.slane %v8159_v7, %v11002_v2 }
0x1c2c   :  { %v7946_v16 = vrot.slane %v7938_v38, %v11002_v2  ;;  %v7953_v51 = vrot.slane %v7939_v31, %v11002_v2  ;;  %v7962_v52 = vrot.slane %v7954_v15, %v11002_v2  ;;  %v7969_v55 = vrot.slane %v7955_v54, %v11002_v2 }
0x1c2d   :  { %v8174_v35 = vcombine.low %v8150_v33, %v8166_v60  ;;  %v8176_v44 = vcombine.low %v8157_v5, %v8173_v32  ;;  %v12389_v63 = vcombine.high %v8157_v5, %v8173_v32  ;;  %v8175_v24 = vcombine.high %v8150_v33, %v8166_v60 }
0x1c2e   :  { %v8042_v46 = vcombine.low %v7946_v16, %v7953_v51  ;;  %v9761_v61 = vcombine.high %v7946_v16, %v7953_v51  ;;  %v8058_v19 = vcombine.low %v7962_v52, %v7969_v55  ;;  %v9762_v0 = vcombine.high %v7962_v52, %v7969_v55 }
0x1c2f   :  { %10349 = vmatprep.subr.mxu1 %v8174_v35  ;;  %10363 = vmatprep.subr.mxu0 %v8176_v44 }
0x1c30   :  { %10350 = vmatpush3.msra.mxu1 %v8174_v35  ;;  %10364 = vmatpush3.msra.mxu0 %v8176_v44  ;;  %v8049_v57 = vrot.slane %v8042_v46, %v11000_v59  ;;  %v8057_v6 = vrot.slane %v9761_v61, %v11000_v59  ;;  %v8065_v37 = vrot.slane %v8058_v19, %v11000_v59 }
0x1c31   :  { %v8073_v3 = vrot.slane %v9762_v0, %v11000_v59 }
0x1c32   :  { %v8074_v20 = vcombine.low %v8049_v57, %v8057_v6  ;;  %v8075_v39 = vcombine.high %v8049_v57, %v8057_v6 }
0x1c33   :  { %v8090_v14 = vcombine.low %v8065_v37, %v8073_v3  ;;  %v8091_v58 = vcombine.high %v8065_v37, %v8073_v3 }
0x1c34   :  { %v8082_v34 = vrot.slane %v8074_v20, %v11002_v2  ;;  %v8089_v21 = vrot.slane %v8075_v39, %v11002_v2 }
0x1c35   :  { %v8098_v47 = vrot.slane %v8090_v14, %v11002_v2  ;;  %v8105_v26 = vrot.slane %v8091_v58, %v11002_v2 }
0x1c37   :  { %v8106_v9 = vcombine.low %v8082_v34, %v8098_v47  ;;  %v8108_v62 = vcombine.low %v8089_v21, %v8105_v26  ;;  %v8107_v22 = vcombine.high %v8082_v34, %v8098_v47  ;;  %v8109_v45 = vcombine.high %v8089_v21, %v8105_v26 }
0x1c39   :  { %10351 = vmatprep.subr.mxu1 %v8106_v9  ;;  %10365 = vmatprep.subr.mxu0 %v8108_v62 }
0x1c3a   :  { %10352 = vmatpush3.msra.mxu1 %v8106_v9  ;;  %10366 = vmatpush3.msra.mxu0 %v8108_v62 }
0x1c3b   :  { %10356 = vmatprep.subr.mxu1 %v8175_v24 }
0x1c9f   :  { %v8587_v1 = vpop.xlane.xlu1 %8586 }
0x1ca0   :  { %10570 = vrcp.f32 %v8587_v1 }
0x1ca3   :  { %v8584_v17 = vpop.xlane.xlu0 %8583  ;;  %v8593_v27 = vpop.xlane.xlu1 %8592 }
0x1ca4   :  { %10572 = vrcp.f32 %v8584_v17 }
0x1ca5   :  { %10574 = vrcp.f32 %v8593_v27 }
0x1ca7   :  { %v8590_v25 = vpop.xlane.xlu0 %8589 }
0x1ca8   :  { %10576 = vrcp.f32 %v8590_v25 }
0x1ca9   :  { %v8602_v42 = vpop.xlane.xlu1 %8601 }
0x1caa   :  { %10578 = vrcp.f32 %v8602_v42 }
0x1cac   :  { %v8596_v28 = vpop.xlane.xlu0 %8595 }
0x1cad   :  { %10580 = vrcp.f32 %v8596_v28  ;;  %v10571_v18 = vpop.eup %10570 }
0x1cae   :  { %v8605_v8 = vpop.xlane.xlu1 %8604  ;;  %v8609_v29 = vmul.f32 %v10571_v18, %v12333_v36 }
0x1caf   :  { %10582 = vrcp.f32 %v8605_v8 }
0x1cb0   :  { %v8599_v41 = vpop.xlane.xlu0 %8598 }
0x1cb1   :  { %v10573_v50 = vpop.eup %10572  ;;  %10584 = vrcp.f32 %v8599_v41 }
0x1cb2   :  { %v8607_v23 = vmul.f32 %v10573_v50, %v12339_v48  ;;  %v10575_v30 = vpop.eup %10574 }
0x1cb3   :  { %v8613_v7 = vmul.f32 %v10575_v30, %v12337_v12  ;;  %v4885_v30 = vld [vmem:[#allocation11 + $0x38] sm:$0xff] }
0x1cb4   :  { %10353 = vmatprep.mubr.msk.f32.mxu1 %vm1592_vm3, %v8607_v23  ;;  %10377 = vmatprep.subr.mxu0 %v4885_v30 }
0x1cb5   :  { %v10577_v11 = vpop.eup %10576  ;;  %10354 = vmatmul.mubr.msk.f32.vlgmr.msra.gmra.mxu1 %vm1592_vm3, %v8609_v29 }
0x1cb6   :  { %10357 = vmatpush3.msra.mxu1 %v8175_v24  ;;  %v8611_v4 = vmul.f32 %v10577_v11, %v12345_v13 }
0x1cb7   :  { %10358 = vmatprep.subr.mxu1 %v8107_v22  ;;  %v10579_v38 = vpop.eup %10578 }
0x1cb8   :  { %10359 = vmatpush3.msra.mxu1 %v8107_v22  ;;  %10360 = vmatprep.mubr.msk.f32.mxu1 %vm1592_vm3, %v8611_v4  ;;  %v8619_v36 = vmul.f32 %v10579_v38, %v12349_v53 }
0x1cb9   :  { %10370 = vmatprep.subr.mxu1 %v12389_v63  ;;  %10361 = vmatmul.mubr.msk.f32.vlgmr.msra.gmra.mxu1 %vm1592_vm3, %v8613_v7 }
0x1cba   :  { %v10581_v48 = vpop.eup %10580  ;;  %10371 = vmatpush3.msra.mxu1 %v12389_v63  ;;  %10374 = vmatprep.mubr.msk.f32.mxu1 %vm1592_vm3, %v8619_v36  ;;  %v4884_v36 = vld [vmem:[#allocation11 + $0x30] sm:$0xff] }
0x1cbb   :  { %10372 = vmatprep.subr.mxu1 %v8109_v45  ;;  %v8615_v13 = vmul.f32 %v10581_v48, %v12355_v49 }
0x1cbc   :  { %v10583_v31 = vpop.eup %10582  ;;  %10373 = vmatpush3.msra.mxu1 %v8109_v45 }
0x1cbd   :  { %10367 = vmatprep.mubr.msk.f32.mxu0 %vm1592_vm3, %v8615_v13  ;;  %v8621_v12 = vmul.f32 %v10583_v31, %v12359_v56 }
0x1cbe   :  { %v10585_v15 = vpop.eup %10584 }
0x1cbf   :  { %10375 = vmatmul.mubr.msk.f32.vlgmr.msra.gmra.mxu1 %vm1592_vm3, %v8621_v12  ;;  %v8617_v54 = vmul.f32 %v10585_v15, %v12367_v40 }
0x1cc1   :  { %10368 = vmatmul.mubr.msk.f32.vlgmr.msra.gmra.mxu0 %vm1592_vm3, %v8617_v54 }
0x1cc2   :  { %10378 = vmatpush3.msra.mxu0 %v4885_v30 }
0x1cc3   :  { %10379 = vmatprep.subr.mxu0 %v4884_v36 }
0x1cc4   :  { %10380 = vmatpush3.msra.mxu0 %v4884_v36  ;;  %v4888_v36 = vld [vmem:[#allocation13 + $0x28] sm:$0xff] }
0x1d75   :  { %v10355_v53 = vpop.f32.mrf.mxu1 }
0x1d77   :  { %v8694_v33 = vpop.f32.mrf.mxu1 }
0x1d79   :  { %v10362_v60 = vpop.f32.mrf.mxu1 }
0x1d7b   :  { %v8775_v5 = vpop.f32.mrf.mxu1 }
0x1d7f   :  { %v10376_v32 = vpop.f32.mrf.mxu1 }
0x1d80   :  { %v9030_v16 = vcombine.low %v10362_v60, %v10376_v32  ;;  %v9031_v49 = vcombine.high %v10362_v60, %v10376_v32 }
0x1d81   :  { %v8937_v51 = vpop.f32.mrf.mxu1  ;;  %v10369_v52 = vpop.f32.mrf.mxu0 }
0x1d82   :  { %v8962_v55 = vcombine.low %v8775_v5, %v8937_v51  ;;  %v8963_v35 = vcombine.high %v8775_v5, %v8937_v51  ;;  %v9014_v44 = vcombine.low %v10355_v53, %v10369_v52  ;;  %v9015_v56 = vcombine.high %v10355_v53, %v10369_v52 }
0x1d83   :  { %v8856_v63 = vpop.f32.mrf.mxu0  ;;  %v9038_v40 = vrot.slane %v9030_v16, %v11000_v59  ;;  %v9045_v19 = vrot.slane %v9031_v49, %v11000_v59  ;;  %v4883_v49 = vld [vmem:[#allocation11 + $0x28] sm:$0xff] }
0x1d84   :  { %v8946_v46 = vcombine.low %v8694_v33, %v8856_v63  ;;  %v8947_v61 = vcombine.high %v8694_v33, %v8856_v63  ;;  %v9022_v0 = vrot.slane %v9014_v44, %v11000_v59  ;;  %v9029_v57 = vrot.slane %v9015_v56, %v11000_v59  ;;  %10381 = vmatprep.subr.mxu0 %v4883_v49 }
0x1d85   :  { %v8970_v6 = vrot.slane %v8962_v55, %v11000_v59  ;;  %v8977_v37 = vrot.slane %v8963_v35, %v11000_v59  ;;  %v4882_v55 = vld [vmem:[#allocation11 + $0x20] sm:$0xff]  ;;  %10382 = vmatpush3.msra.mxu0 %v4883_v49  ;;  %v9796_v49 = vld [vmem:[#allocation14 + $0x1b] ss:$0 sm:$0xff] }
0x1d86   :  { %v8954_v3 = vrot.slane %v8946_v46, %v11000_v59  ;;  %v8961_v20 = vrot.slane %v8947_v61, %v11000_v59  ;;  %v9046_v39 = vcombine.low %v9022_v0, %v9038_v40  ;;  %v9047_v14 = vcombine.high %v9022_v0, %v9038_v40  ;;  %10383 = vmatprep.subr.mxu0 %v4882_v55 }
0x1d87   :  { %v9062_v58 = vcombine.low %v9029_v57, %v9045_v19  ;;  %v9063_v34 = vcombine.high %v9029_v57, %v9045_v19  ;;  %10384 = vmatpush3.msra.mxu0 %v4882_v55 }
0x1d88   :  { %v8978_v21 = vcombine.low %v8954_v3, %v8970_v6  ;;  %v8979_v47 = vcombine.high %v8954_v3, %v8970_v6  ;;  %v8994_v26 = vcombine.low %v8961_v20, %v8977_v37  ;;  %v8995_v9 = vcombine.high %v8961_v20, %v8977_v37 }
0x1d89   :  { %v9054_v62 = vrot.slane %v9046_v39, %v11002_v2  ;;  %v9061_v22 = vrot.slane %v9047_v14, %v11002_v2  ;;  %v9070_v45 = vrot.slane %v9062_v58, %v11002_v2  ;;  %v9077_v24 = vrot.slane %v9063_v34, %v11002_v2 }
0x1d8a   :  { %v8986_v1 = vrot.slane %v8978_v21, %v11002_v2  ;;  %v8993_v17 = vrot.slane %v8979_v47, %v11002_v2  ;;  %v9002_v27 = vrot.slane %v8994_v26, %v11002_v2  ;;  %v9009_v25 = vrot.slane %v8995_v9, %v11002_v2 }
0x1d8b   :  { %v9150_v42 = vcombine.low %v9054_v62, %v9061_v22  ;;  %v9791_v28 = vcombine.high %v9054_v62, %v9061_v22  ;;  %v9166_v8 = vcombine.low %v9070_v45, %v9077_v24  ;;  %v9792_v18 = vcombine.high %v9070_v45, %v9077_v24  ;;  %v9793_v45 = vld [vmem:[#allocation14 + $0x14] ss:$0 sm:$0xff] }
0x1d8c   :  { %v9082_v41 = vcombine.low %v8986_v1, %v8993_v17  ;;  %v9789_v50 = vcombine.high %v8986_v1, %v8993_v17  ;;  %v9098_v23 = vcombine.low %v9002_v27, %v9009_v25  ;;  %v9790_v29 = vcombine.high %v9002_v27, %v9009_v25 }
0x1d8d   :  { %v9157_v11 = vrot.slane %v9150_v42, %v11000_v59  ;;  %v9165_v4 = vrot.slane %v9791_v28, %v11000_v59  ;;  %v9173_v7 = vrot.slane %v9166_v8, %v11000_v59  ;;  %v9181_v38 = vrot.slane %v9792_v18, %v11000_v59 }
0x1d8e   :  { %v9089_v48 = vrot.slane %v9082_v41, %v11000_v59  ;;  %v9097_v13 = vrot.slane %v9789_v50, %v11000_v59  ;;  %v9105_v31 = vrot.slane %v9098_v23, %v11000_v59  ;;  %v9113_v12 = vrot.slane %v9790_v29, %v11000_v59 }
0x1d8f   :  { %v9182_v15 = vcombine.low %v9157_v11, %v9165_v4  ;;  %v9198_v54 = vcombine.low %v9173_v7, %v9181_v38  ;;  %v9183_v53 = vcombine.high %v9157_v11, %v9165_v4  ;;  %v9199_v33 = vcombine.high %v9173_v7, %v9181_v38  ;;  %v4890_v7 = vld [vmem:[#allocation13 + $0x38] sm:$0xff]  ;;  %v4889_v38 = vld [vmem:[#allocation13 + $0x30] sm:$0xff] }
0x1d90   :  { %v9114_v60 = vcombine.low %v9089_v48, %v9097_v13  ;;  %v9130_v5 = vcombine.low %v9105_v31, %v9113_v12  ;;  %v9115_v32 = vcombine.high %v9089_v48, %v9097_v13  ;;  %v9131_v16 = vcombine.high %v9105_v31, %v9113_v12  ;;  %10388 = vmatprep.subr.mxu1 %v4890_v7  ;;  %v4887_v48 = vld [vmem:[#allocation13 + $0x20] sm:$0xff]  ;;  %v9696_v13 = vld [vmem:[%s12525_s10 + $0x78] sm:$0xff]  ;;  %v9695_v31 = vld [vmem:[%s12525_s10 + $0x70] sm:$0xff] }
0x1d91   :  { %v9190_v51 = vrot.slane %v9182_v15, %v11002_v2  ;;  %v9206_v52 = vrot.slane %v9198_v54, %v11002_v2  ;;  %v9197_v56 = vrot.slane %v9183_v53, %v11002_v2  ;;  %v9213_v63 = vrot.slane %v9199_v33, %v11002_v2  ;;  %10389 = vmatpush3.msra.mxu1 %v4890_v7  ;;  %v9694_v12 = vld [vmem:[%s12525_s10 + $0x68] sm:$0xff]  ;;  %v9693_v15 = vld [vmem:[%s12525_s10 + $0x60] sm:$0xff] }
0x1d92   :  { %v9122_v59 = vrot.slane %v9114_v60, %v11002_v2  ;;  %v9138_v35 = vrot.slane %v9130_v5, %v11002_v2  ;;  %v9129_v40 = vrot.slane %v9115_v32, %v11002_v2  ;;  %v9145_v19 = vrot.slane %v9131_v16, %v11002_v2  ;;  %10390 = vmatprep.subr.mxu1 %v4889_v38 }
0x1d93   :  { %v9215_v44 = vcombine.high %v9190_v51, %v9206_v52  ;;  %v9214_v46 = vcombine.low %v9190_v51, %v9206_v52  ;;  %v9216_v57 = vcombine.low %v9197_v56, %v9213_v63  ;;  %v9217_v37 = vcombine.high %v9197_v56, %v9213_v63  ;;  %10391 = vmatpush3.msra.mxu1 %v4889_v38  ;;  %v9797_v52 = vld [vmem:[#allocation14 + $0x1c] ss:$0 sm:$0xff] }
0x1d94   :  { %v9147_v61 = vcombine.high %v9122_v59, %v9138_v35  ;;  %v9146_v0 = vcombine.low %v9122_v59, %v9138_v35  ;;  %v9148_v6 = vcombine.low %v9129_v40, %v9145_v19  ;;  %v9149_v3 = vcombine.high %v9129_v40, %v9145_v19  ;;  %10392 = vmatprep.subr.mxu1 %v4888_v36  ;;  %v9690_v40 = vld [vmem:[%s12525_s10 + $0x48] sm:$0xff]  ;;  %v9689_v19 = vld [vmem:[%s12525_s10 + $0x40] sm:$0xff] }
0x1d95   :  { %9222 = vrot.lane.b32.xlu1 %v9215_v44, %s10789_s27  ;;  %10393 = vmatpush3.msra.mxu1 %v4888_v36 }
0x1d96   :  { %9220 = vrot.lane.b32.xlu0 %v9147_v61, %s10789_s27  ;;  %10394 = vmatprep.subr.mxu1 %v4887_v48  ;;  %v9691_v61 = vld [vmem:[%s12525_s10 + $0x50] sm:$0xff] }
0x1d97   :  { %10395 = vmatpush3.msra.mxu1 %v4887_v48  ;;  %10399 = vmatprep.subr.mxu0 %v9696_v13 }
0x1d99   :  { %9230 = vrot.lane.b32.xlu1 %v9216_v57, %s10803_s7 }
0x1d9a   :  { %9228 = vrot.lane.b32.xlu0 %v9148_v6, %s10803_s7 }
0x1d9d   :  { %9238 = vrot.lane.b32.xlu1 %v9217_v37, %s10804_s20 }
0x1d9e   :  { %9236 = vrot.lane.b32.xlu0 %v9149_v3, %s10804_s20 }
0x1e07   :  { %v9223_v20 = vpop.permute.xlu1 %9222 }
0x1e08   :  { %v9221_v2 = vpop.permute.xlu0 %9220  ;;  %v9243_v21 = vsel %vm1229_vm1, %v9214_v46, %v9223_v20  ;;  %v9692_v46 = vld [vmem:[%s12525_s10 + $0x58] sm:$0xff]  ;;  %s10805_s10 = smov [#allocation16]  }
0x1e09   :  { %v9242_v58 = vsel %vm1229_vm1, %v9146_v0, %v9221_v2  ;;  %v9798_v0 = vld [vmem:[#allocation14 + $0x15] ss:$0 sm:$0xff]  ;;  %s9554_s9 = sshll.u32 %s10805_s10, 4  ;;  %s9555_s9 = int_to_ptr.vmem [resolvable:$true] %s9554_s9 }
0x1e0a   :  { %s10754_s11 = scalar_lea.vmem %s9555_s9, 256  ;;  %p10759_p13 = scmp.lt.s32.totalorder %s9555_s9, %s9555_s9 }
0x1e0b   :  { %v9231_v39 = vpop.permute.xlu1 %9230  ;;  %p10755_p12 = scmp.ne.s32.totalorder %s9555_s9, %s10754_s11  ;;  %p10760_p0 = scmp.lt.s32.totalorder %s10754_s11, %s10754_s11 }
0x1e0c   :  { %v9229_v14 = vpop.permute.xlu0 %9228  ;;  %v9245_v9 = vsel %vm1592_vm3, %v9243_v21, %v9231_v39  ;;  %v9801_v39 = vld [vmem:[#allocation14 + $0x16] ss:$0 sm:$0xff] }
0x1e0d   :  { %v9244_v47 = vsel %vm1592_vm3, %v9242_v58, %v9229_v14  ;;  %p10761_p1 = por %p10760_p0, %p10759_p13 }
0x1e0f   :  { %v9239_v34 = vpop.permute.xlu1 %9238  ;;  %p10762_p2 = pnand %p10761_p1, %p10755_p12 }
0x1e10   :  { %v9237_v26 = vpop.permute.xlu0 %9236  ;;  %v9247_v22 = vsel %vm2305_vm5, %v9245_v9, %v9239_v34 }
0x1e11   :  { %v9246_v62 = vsel %vm2305_vm5, %v9244_v47, %v9237_v26 }
0x1e12   :  { %10385 = vmatprep.mubr.msk.f32.mxu0 %vm204_vm0, %v9246_v62 }
0x1e13   :  { %10386 = vmatmul.mubr.msk.f32.vlgmr.msra.gmra.mxu0 %vm204_vm0, %v9247_v22 }
0x1e14   :  { %10400 = vmatpush3.msra.mxu0 %v9696_v13 }
0x1e15   :  { %10401 = vmatprep.subr.mxu0 %v9695_v31 }
0x1e16   :  { %10402 = vmatpush3.msra.mxu0 %v9695_v31 }
0x1e17   :  { %10403 = vmatprep.subr.mxu0 %v9694_v12 }
0x1e18   :  { %10404 = vmatpush3.msra.mxu0 %v9694_v12 }
0x1e19   :  { %10405 = vmatprep.subr.mxu0 %v9693_v15 }
0x1e1a   :  { %10406 = vmatpush3.msra.mxu0 %v9693_v15 }
0x1e1b   :  { %10407 = vmatprep.subr.mxu0 %v9692_v46 }
0x1e1c   :  { %10408 = vmatpush3.msra.mxu0 %v9692_v46 }
0x1e1d   :  { %10409 = vmatprep.subr.mxu0 %v9691_v61 }
0x1e1e   :  { %10410 = vmatpush3.msra.mxu0 %v9691_v61 }
0x1e1f   :  { %10411 = vmatprep.subr.mxu0 %v9690_v40 }
0x1e20   :  { %10412 = vmatpush3.msra.mxu0 %v9690_v40 }
0x1e21   :  { %10413 = vmatprep.subr.mxu0 %v9689_v19 }
0x1e22   :  { %10414 = vmatpush3.msra.mxu0 %v9689_v19 }
0x1ed3   :  { %v10387_v24 = vpop.f32.mrf.mxu0 }
0x1ed4   :  { %v9330_v1 = vadd.f32 %v10387_v24, %v9793_v45 }
0x1ed5   :  { %v9324_v17 = vpop.f32.mrf.mxu0 }
0x1ed6   :  { %v12464_v27 = vadd.f32 %v9330_v1, %v12111_v43  ;;  %v9325_v25 = vadd.f32 %v9793_v45, %v9324_v17 }
0x1ed8   :  { %v12467_v42 = vadd.f32 %v9325_v25, %v12114_v10  ;;  %v9338_v28 = vsel %vm204_vm0, %v12464_v27, 0.0 }
0x1ed9   :  { %9339 = vadd.xlane.f32.xlu1 %v9338_v28 }
0x1eda   :  { %v9335_v8 = vsel %vm204_vm0, %v12467_v42, 0.0 }
0x1edb   :  { %9336 = vadd.xlane.f32.xlu0 %v9335_v8 }
0x1f62   :  { %v9340_v18 = vpop.xlane.xlu1 %9339 }
0x1f63   :  { %v9342_v41 = vmul.f32 0.03125, %v9340_v18 }
0x1f64   :  { %v9337_v50 = vpop.xlane.xlu0 %9336 }
0x1f65   :  { %v9341_v23 = vmul.f32 0.03125, %v9337_v50  ;;  %v9344_v29 = vsub.f32 %v12464_v27, %v9342_v41 }
0x1f67   :  { %v9343_v43 = vsub.f32 %v12467_v42, %v9341_v23  ;;  %v9346_v11 = vmul.f32 %v9344_v29, %v9344_v29 }
0x1f69   :  { %v9345_v30 = vmul.f32 %v9343_v43, %v9343_v43  ;;  %v9350_v4 = vsel %vm204_vm0, %v9346_v11, 0.0 }
0x1f6b   :  { %v9347_v10 = vsel %vm204_vm0, %v9345_v30, 0.0 }
0x1f6c   :  { %9348 = vadd.xlane.f32.xlu0 %v9347_v10 }
0x1f70   :  { %9351 = vadd.xlane.f32.xlu0 %v9350_v4 }
0x1ff5   :  { %v9349_v54 = vpop.xlane.xlu0 %9348 }
0x1ff6   :  { %v9353_v53 = vmul.f32 0.03125, %v9349_v54 }
0x1ff8   :  { %v9355_v33 = vadd.f32 1e-05, %v9353_v53 }
0x1ff9   :  { %v9352_v60 = vpop.xlane.xlu0 %9351 }
0x1ffa   :  { %10586 = vrsqrt.f32 %v9355_v33  ;;  %v9354_v5 = vmul.f32 0.03125, %v9352_v60 }
0x1ffc   :  { %v9356_v32 = vadd.f32 1e-05, %v9354_v5 }
0x1ffe   :  { %10588 = vrsqrt.f32 %v9356_v32 }
0x2007   :  { %v10587_v16 = vpop.eup %10586 }
0x2008   :  { %v9359_v51 = vmul.f32 %v10587_v16, %v9343_v43 }
0x200a   :  { %v9365_v55 = vmul.f32 %v9796_v49, %v9359_v51 }
0x200b   :  { %v10589_v59 = vpop.eup %10588 }
0x200c   :  { %v9360_v35 = vmul.f32 %v10589_v59, %v9344_v29  ;;  %v9371_v44 = vadd.f32 %v9797_v52, %v9365_v55 }
0x200e   :  { %v9366_v56 = vmul.f32 %v9796_v49, %v9360_v35  ;;  %10396 = vmatprep.mubr.msk.f32.mxu1 %vm204_vm0, %v9371_v44 }
0x2010   :  { %v9372_v63 = vadd.f32 %v9797_v52, %v9366_v56 }
0x2012   :  { %10397 = vmatmul.mubr.msk.f32.vlgmr.msra.gmra.mxu1 %vm204_vm0, %v9372_v63 }
0x20d2   :  { %v10398_v57 = vpop.f32.mrf.mxu1 }
0x20d3   :  { %v9455_v6 = vadd.f32 %v10398_v57, %v9798_v0 }
0x20d4   :  { %v9449_v37 = vpop.f32.mrf.mxu1 }
0x20d5   :  { %v9450_v3 = vadd.f32 %v9798_v0, %v9449_v37  ;;  %v9459_v2 = vmax.f32 %v9455_v6, 0.0 }
0x20d7   :  { %v9458_v20 = vmax.f32 %v9450_v3, 0.0 }
0x20d9   :  { %10415 = vmatprep.mubr.msk.f32.mxu0 %vm4777_vm8, %v9458_v20 }
0x20da   :  { %10416 = vmatmul.mubr.msk.f32.vlgmr.msra.gmra.mxu0 %vm4777_vm8, %v9459_v2 }
0x219a   :  { %v10417_v14 = vpop.f32.mrf.mxu0 }
0x219b   :  { %v9542_v58 = vadd.f32 %v10417_v14, %v9801_v39 }
0x219c   :  { %v9536_v34 = vpop.f32.mrf.mxu0 }
0x219d   :  { %v9546_v21 = vadd.f32 %v9542_v58, %v12464_v27  ;;  %v9537_v47 = vadd.f32 %v9801_v39, %v9536_v34 }
0x219f   :  { %9548 = vst.msk [vmem:[#allocation16 + $0x8] sm:$0xff] %vm204_vm0, %v9546_v21  ;;  %v9545_v26 = vadd.f32 %v9537_v47, %v12467_v42 }
0x21a1   :  { %9547 = vst.msk [vmem:[#allocation16] sm:$0xff] %vm204_vm0, %v9545_v26 }
0x21a2   :  { %10765 = shalt.err (!%p10762_p2)
}
0x21a3   :  { %9560 = dma.vmem_to_hbm [thread:$0]  %s9555_s9, 256, %s12527_s12, [#allocation4], %s10788_s26, %s10788_s26, %s10789_s27  }
0x21a4   :  { %10784 = dma.done.wait [#allocation4], 256  }
0x21a5   :  { %10785 = vsyncadd [#allocation4], 4294967040 }
0x21a6   :  { %9564 = vsyncpa [#allocation3], 1 }
0x21a7   :  { %9565 = vsyncpa [#allocation6], 1 }
0x21a8   :  { %9566 = vsyncpa [#allocation9], 1 }
0x21a9   :  { %9567 = vsyncpa [#allocation12], 1 }
0x21aa   :  { %9568 = vsyncpa [#allocation15], 1 }
0x21ab   :  { %9569 = vsyncpa [#allocation4], 1 }

</bundles_post_ra>
